<compile_context>
chip_gen: v5e
topology: v5e:2x2
jax: 0.10.0
libtpu: 0.0.40
codegen_flags: <defaults>
</compile_context>

<pallas_src>
import functools

import jax
import jax.numpy as jnp
import numpy as np
from jax.experimental import pallas as pl
from jax.experimental.pallas import tpu as pltpu


# ----------------------------- Pallas kernel ---------------------------------
def _pool_level(wf_ref, ww, wh, wd):
    """Separable trilinear ROI pooling of one pyramid level for a tile of boxes.

    wf_ref: [nc, W, D*H]  conv+bias-folded feature slab (resident in VMEM)
    ww:     [TB, Pw, W]   per-box 1-D interpolation factors (x axis)
    wh:     [TB, Ph, H]   per-box 1-D interpolation factors (y axis)
    wd:     [TB, Pd, D]   per-box 1-D interpolation factors (z axis)
    Returns a list of nc arrays [TB, Pw*Ph*Pd] (lane order: pw, ph, pd).
    """
    nc = wf_ref.shape[0]
    TB, Ph, H = wh.shape
    _, Pd, D = wd.shape
    Pw = ww.shape[1]
    outs = []
    for k in range(nc):                                   # nc is tiny (static loop)
        wf_k = wf_ref[k]                                  # [W, D*H]
        chunks = []
        for q in range(Pw):                               # Pw is tiny (static loop)
            # contract W: dense 2-D dot against the shared slab -> [TB, D*H]
            t1 = jnp.dot(ww[:, q, :], wf_k, preferred_element_type=jnp.float32)
            t1 = t1.reshape(TB, D, H)
            # contract H: batched rank-3 matmul                 -> [TB, Ph, D]
            t2 = jnp.einsum('bph,bdh->bpd', wh, t1,
                            preferred_element_type=jnp.float32)
            # contract D: batched rank-3 matmul                 -> [TB, Ph, Pd]
            t3 = jnp.einsum('bpd,bzd->bpz', t2, wd,
                            preferred_element_type=jnp.float32)
            chunks.append(t3.reshape(TB, Ph * Pd))
        outs.append(jnp.concatenate(chunks, axis=-1))     # [TB, Pw*Ph*Pd]
    return outs


def mask_head_kernel(sel_ref, ww2_ref, wh2_ref, wd2_ref,
                     ww3_ref, wh3_ref, wd3_ref, wf2_ref, wf3_ref,
                     logit_ref, prob_ref):
    sel = sel_ref[...]                                    # [TB, 1]; 1.0 => level P2
    lvl2 = _pool_level(wf2_ref, ww2_ref[...], wh2_ref[...], wd2_ref[...])
    lvl3 = _pool_level(wf3_ref, ww3_ref[...], wh3_ref[...], wd3_ref[...])
    # per-box pyramid-level selection (both levels computed; compute is trivial)
    logits = [sel * a + (1.0 - sel) * b for a, b in zip(lvl2, lvl3)]

    # softmax over the class axis (f32 epilogue).  Exact reciprocal here: the
    # approx EUP reciprocal has ~1e-2 worst-case relative error and breaks the
    # probs.sum(axis=1) == 1 invariant; this epilogue is not the bottleneck.
    m = logits[0]
    for t in logits[1:]:
        m = jnp.maximum(m, t)
    es = [jnp.exp(t - m) for t in logits]
    den = es[0]
    for t in es[1:]:
        den = den + t
    inv = pl.reciprocal(den)                              # exact (approx=False)

    # lane-dense stores: [TB, num_classes * Ppool] (= [8, 128] in the demo)
    logit_ref[...] = jnp.concatenate(logits, axis=-1)
    prob_ref[...] = jnp.concatenate([e * inv for e in es], axis=-1)


# -------------------- boxes -> separable interp factors (device) -------------
def _axis_weights(lo, hi, length, pooled):
    """Batched 1-D linear-interp weights [n, pooled, length] for crops [lo, hi)
    resized to `pooled` samples (torch F.interpolate, align_corners=True)."""
    lo = lo.astype(jnp.float32)
    crop = jnp.maximum(hi.astype(jnp.float32) - lo, 1.0)                    # [n]
    step = float(pooled - 1) if pooled > 1 else 1.0
    p = jnp.arange(pooled, dtype=jnp.float32)
    s = lo[:, None] + p[None, :] * (crop[:, None] - 1.0) / step             # [n, P]
    l = jnp.arange(length, dtype=jnp.float32)                               # [L]
    w = jnp.maximum(0.0, 1.0 - jnp.abs(l[None, None, :] - s[:, :, None]))   # [n, P, L]
    inside = (l[None, None, :] >= lo[:, None, None]) & \
             (l[None, None, :] < (lo + crop)[:, None, None])
    return w * inside.astype(jnp.float32)


def _level_factors(rois, dhw, pool_size):
    """Per-box separable trilinear factors for one pyramid level (all on device)."""
    D, H, W = dhw
    Pd, Ph, Pw = pool_size
    scale = jnp.asarray([D - 1, H - 1, W - 1, D - 1, H - 1, W - 1], jnp.float32)
    b = rois.astype(jnp.float32) * scale                  # denorm_boxes_graph
    z1 = jnp.clip(jnp.floor(b[:, 0]), 0, D - 1)
    y1 = jnp.clip(jnp.floor(b[:, 1]), 0, H - 1)
    x1 = jnp.clip(jnp.floor(b[:, 2]), 0, W - 1)
    z2 = jnp.clip(jnp.ceil(b[:, 3]), z1 + 1, D)
    y2 = jnp.clip(jnp.ceil(b[:, 4]), y1 + 1, H)
    x2 = jnp.clip(jnp.ceil(b[:, 5]), x1 + 1, W)
    wd = _axis_weights(z1, z2, D, Pd)                     # [n, Pd, D]
    wh = _axis_weights(y1, y2, H, Ph)                     # [n, Ph, H]
    ww = _axis_weights(x1, x2, W, Pw)                     # [n, Pw, W]
    return wd, wh, ww


def _roi_level_select(rois):
    """1.0 where a box is assigned to pyramid level P2, 0.0 for P3 (device-side)."""
    d = rois[:, 3] - rois[:, 0]
    h = rois[:, 4] - rois[:, 1]
    w = rois[:, 5] - rois[:, 2]
    vol = jnp.maximum(d * h * w, 1e-12)
    roi_level = jnp.clip(jnp.round(4.0 + jnp.log2(vol) / 3.0), 2.0, 3.0)
    return (roi_level <= 2.0).astype(jnp.float32)[:, None]                  # [n, 1]


# ----------------------------- Mask.forward ----------------------------------
def mask_forward(feature_maps, rois, params, pool_size, box_tile=8):
    """feature_maps: [P2, P3], each [1, C, D, H, W]; rois: [n, 6] normalized
    (z1, y1, x1, z2, y2, x2).  Returns (logits, softmax(logits)), each
    [n, num_classes, Pd, Ph, Pw]."""
    conv_w, conv_b = params
    nc = conv_w.shape[0]
    Pd, Ph, Pw = pool_size
    ppool = Pd * Ph * Pw
    n = rois.shape[0]
    if n == 0:                                            # empty-ROI guard
        z = jnp.zeros((0, nc, Pd, Ph, Pw), jnp.float32)
        return z, z
    assert len(feature_maps) == 2, "Mask head is defined for pyramid levels P2..P3"

    sel2 = _roi_level_select(rois)

    n_pad = ((n + box_tile - 1) // box_tile) * box_tile
    pad = n_pad - n

    def padn(x):
        return jnp.pad(x, ((0, pad),) + ((0, 0),) * (x.ndim - 1)) if pad else x

    per_level, dims = [], []
    for fm in feature_maps:
        C, D, H, W = fm.shape[1:]
        fm3 = fm[0].astype(jnp.float32)                   # [C, D, H, W]
        wd, wh, ww = _level_factors(rois, (D, H, W), pool_size)
        # Fold the 1x1x1 conv head (+ bias; exact because trilinear weights sum
        # to 1 per output position) into a small resident slab.
        wf = jnp.einsum('kc,cdhw->kdhw', conv_w, fm3) + conv_b.reshape(nc, 1, 1, 1)
        wfT = jnp.transpose(wf, (0, 3, 1, 2)).reshape(nc, W, D * H)   # [nc, W, D*H]
        per_level.append((padn(ww), padn(wh), padn(wd), wfT))
        dims.append((D, H, W))

    (ww2, wh2, wd2, wf2), (ww3, wh3, wd3, wf3) = per_level
    (D2, H2, W2), (D3, H3, W3) = dims
    TB = box_tile
    grid = (n_pad // TB,)

    grid_spec = pltpu.PrefetchScalarGridSpec(
        num_scalar_prefetch=0,
        grid=grid,
        in_specs=[
            pl.BlockSpec((TB, 1), lambda i: (i, 0)),                # level selector
            pl.BlockSpec((TB, Pw, W2), lambda i: (i, 0, 0)),        # P2 factors
            pl.BlockSpec((TB, Ph, H2), lambda i: (i, 0, 0)),
            pl.BlockSpec((TB, Pd, D2), lambda i: (i, 0, 0)),
            pl.BlockSpec((TB, Pw, W3), lambda i: (i, 0, 0)),        # P3 factors
            pl.BlockSpec((TB, Ph, H3), lambda i: (i, 0, 0)),
            pl.BlockSpec((TB, Pd, D3), lambda i: (i, 0, 0)),
            pl.BlockSpec((nc, W2, D2 * H2), lambda i: (0, 0, 0)),   # resident slabs
            pl.BlockSpec((nc, W3, D3 * H3), lambda i: (0, 0, 0)),
        ],
        out_specs=(
            pl.BlockSpec((TB, nc * ppool), lambda i: (i, 0)),       # lane-dense out
            pl.BlockSpec((TB, nc * ppool), lambda i: (i, 0)),
        ),
    )
    logits2d, probs2d = pl.pallas_call(
        mask_head_kernel,
        out_shape=(jax.ShapeDtypeStruct((n_pad, nc * ppool), jnp.float32),
                   jax.ShapeDtypeStruct((n_pad, nc * ppool), jnp.float32)),
        grid_spec=grid_spec,
        compiler_params=pltpu.CompilerParams(
            dimension_semantics=("parallel",),          # box tiles are independent
            vmem_limit_bytes=32 * 1024 * 1024),         # tiny blocks; fits v7x easily
    )(padn(sel2), ww2, wh2, wd2, ww3, wh3, wd3, wf2, wf3)

    def to5d(x):
        # kernel lane order per class is (pw, ph, pd) -> PyTorch (pd, ph, pw)
        return x[:n].reshape(n, nc, Pw, Ph, Pd).transpose(0, 1, 4, 3, 2)

    return to5d(logits2d), to5d(probs2d)


def mask_forward_ref(feature_maps, rois, params, pool_size):
    """Pure-JAX reference of the same forward (pool -> 1x1x1 conv -> softmax)."""
    conv_w, conv_b = params
    nc = conv_w.shape[0]
    sel2 = _roi_level_select(rois)[:, :, None, None, None]            # [n,1,1,1,1]
    per_level = []
    for fm in feature_maps:
        C, D, H, W = fm.shape[1:]
        fm3 = fm[0].astype(jnp.float32)
        wd, wh, ww = _level_factors(rois, (D, H, W), pool_size)
        pooled = jnp.einsum('bpd,bqh,brw,cdhw->bcpqr', wd, wh, ww, fm3)
        logits = jnp.einsum('kc,bcpqr->bkpqr', conv_w, pooled) \
            + conv_b.reshape(1, nc, 1, 1, 1)
        per_level.append(logits)
    logits = sel2 * per_level[0] + (1.0 - sel2) * per_level[1]
    z = logits - jnp.max(logits, axis=1, keepdims=True)
    e = jnp.exp(z)
    return logits, e / jnp.sum(e, axis=1, keepdims=True)


# --------------------------------- demo --------------------------------------
if __name__ == "__main__":
    key = jax.random.PRNGKey(0)
    k_fm2, k_fm3, k_lo, k_sz, k_w, k_b = jax.random.split(key, 6)

    channel = 4
    num_classes = 2
    pool_size = (4, 4, 4)
    num_rois = 20                       # padded to 24 -> grid of 3 parallel box tiles

    # Feature pyramid levels P2, P3 (NCDHW, batch = 1)
    p2 = jax.random.normal(k_fm2, (1, channel, 8, 16, 16), dtype=jnp.float32)
    p3 = jax.random.normal(k_fm3, (1, channel, 4, 8, 8), dtype=jnp.float32)

    # ROIs: [num_rois, (z1, y1, x1, z2, y2, x2)] in normalized coordinates
    lo = jax.random.uniform(k_lo, (num_rois, 3), minval=0.05, maxval=0.45)
    sz = jax.random.uniform(k_sz, (num_rois, 3), minval=0.2, maxval=0.55)
    rois = jnp.concatenate([lo, jnp.clip(lo + sz, 0.0, 1.0)], axis=1)

    # Deterministic head parameters (stand-in for Modified3DUNet — see TODO above)
    conv_w = 0.3 * jax.random.normal(k_w, (num_classes, channel), dtype=jnp.float32)
    conv_b = 0.1 * jax.random.normal(k_b, (num_classes,), dtype=jnp.float32)

    fwd = jax.jit(functools.partial(mask_forward, pool_size=pool_size))
    logits, probs = fwd([p2, p3], rois, (conv_w, conv_b))
    jax.block_until_ready((logits, probs))

    # Sanity check against a pure-JAX reference of the same math.
    ref_logits, ref_probs = mask_forward_ref([p2, p3], rois, (conv_w, conv_b), pool_size)
    jax.block_until_ready((ref_logits, ref_probs))

    assert logits.shape == (num_rois, num_classes, *pool_size)
    assert probs.shape == (num_rois, num_classes, *pool_size)
    np.testing.assert_allclose(np.asarray(logits), np.asarray(ref_logits),
                               atol=2e-2, rtol=2e-2)
    np.testing.assert_allclose(np.asarray(probs), np.asarray(ref_probs),
                               atol=2e-2, rtol=2e-2)
    assert np.allclose(np.asarray(probs).sum(axis=1), 1.0, atol=2e-3)

    print("KERNEL_OK")
</pallas_src>

<mosaic_0001>
module attributes {stable_mosaic.version = 11 : i64} {
  func.func @mask_head_kernel(%arg0: i32, %arg1: memref<8x1xf32, #tpu.memory_space<vmem>>, %arg2: memref<8x4x16xf32, #tpu.memory_space<vmem>>, %arg3: memref<8x4x16xf32, #tpu.memory_space<vmem>>, %arg4: memref<8x4x8xf32, #tpu.memory_space<vmem>>, %arg5: memref<8x4x8xf32, #tpu.memory_space<vmem>>, %arg6: memref<8x4x8xf32, #tpu.memory_space<vmem>>, %arg7: memref<8x4x4xf32, #tpu.memory_space<vmem>>, %arg8: memref<2x16x128xf32, #tpu.memory_space<vmem>>, %arg9: memref<2x8x32xf32, #tpu.memory_space<vmem>>, %arg10: memref<8x128xf32, #tpu.memory_space<vmem>>, %arg11: memref<8x128xf32, #tpu.memory_space<vmem>>) attributes {dimension_semantics = [#tpu.dimension_semantics<parallel>], iteration_bounds = array<i64: 3>, scalar_prefetch = 0 : i64, scratch_operands = 0 : i64, tpu.core_type = #tpu.core_type<tc>, window_params = [{transform_indices = @transform_0, window_bounds = array<i64: 8, 1>}, {transform_indices = @transform_1, window_bounds = array<i64: 8, 4, 16>}, {transform_indices = @transform_2, window_bounds = array<i64: 8, 4, 16>}, {transform_indices = @transform_3, window_bounds = array<i64: 8, 4, 8>}, {transform_indices = @transform_4, window_bounds = array<i64: 8, 4, 8>}, {transform_indices = @transform_5, window_bounds = array<i64: 8, 4, 8>}, {transform_indices = @transform_6, window_bounds = array<i64: 8, 4, 4>}, {pipeline_mode = #tpu.pipeline_mode<synchronous>, transform_indices = @transform_7, window_bounds = array<i64: 2, 16, 128>}, {pipeline_mode = #tpu.pipeline_mode<synchronous>, transform_indices = @transform_8, window_bounds = array<i64: 2, 8, 32>}, {transform_indices = @transform_9, window_bounds = array<i64: 8, 128>}, {transform_indices = @transform_10, window_bounds = array<i64: 8, 128>}]} {
    %c0 = arith.constant 0 : index
    %c0_0 = arith.constant 0 : index
    %0 = vector.load %arg1[%c0, %c0_0] : memref<8x1xf32, #tpu.memory_space<vmem>>, vector<8x1xf32>
    %c0_1 = arith.constant 0 : index
    %c0_2 = arith.constant 0 : index
    %c0_3 = arith.constant 0 : index
    %1 = vector.load %arg2[%c0_1, %c0_2, %c0_3] : memref<8x4x16xf32, #tpu.memory_space<vmem>>, vector<8x4x16xf32>
    %c0_4 = arith.constant 0 : index
    %c0_5 = arith.constant 0 : index
    %c0_6 = arith.constant 0 : index
    %2 = vector.load %arg3[%c0_4, %c0_5, %c0_6] : memref<8x4x16xf32, #tpu.memory_space<vmem>>, vector<8x4x16xf32>
    %c0_7 = arith.constant 0 : index
    %c0_8 = arith.constant 0 : index
    %c0_9 = arith.constant 0 : index
    %3 = vector.load %arg4[%c0_7, %c0_8, %c0_9] : memref<8x4x8xf32, #tpu.memory_space<vmem>>, vector<8x4x8xf32>
    %c0_10 = arith.constant 0 : index
    %c0_11 = arith.constant 0 : index
    %c0_12 = arith.constant 0 : index
    %4 = vector.load %arg8[%c0_10, %c0_11, %c0_12] : memref<2x16x128xf32, #tpu.memory_space<vmem>>, vector<1x16x128xf32>
    %5 = vector.shape_cast %4 : vector<1x16x128xf32> to vector<16x128xf32>
    %6 = vector.extract_strided_slice %1 {offsets = [0, 0, 0], sizes = [8, 1, 16], strides = [1, 1, 1]} : vector<8x4x16xf32> to vector<8x1x16xf32>
    %7 = vector.shape_cast %6 : vector<8x1x16xf32> to vector<8x16xf32>
    %cst = arith.constant dense<0.000000e+00> : vector<8x128xf32>
    %8 = tpu.matmul %7, %5, %cst {dimension_numbers = #tpu.dot_dimension_numbers<[1], [0], [0], [1], [0, 0, 1, 1], [], []>} : vector<8x16xf32>, vector<16x128xf32>, vector<8x128xf32> -> vector<8x128xf32>
    %9 = vector.shape_cast %8 : vector<8x128xf32> to vector<8x8x16xf32>
    "tpu.trace_start"() <{level = 10 : i32, message = "bph,bdh->bpd"}> : () -> ()
    %cst_13 = arith.constant dense<0.000000e+00> : vector<8x4x8xf32>
    %10 = tpu.matmul %2, %9, %cst_13 {dimension_numbers = #tpu.dot_dimension_numbers<[2], [2], [1], [1], [0, 0, 0, 1, 1, 1], [0], [0]>} : vector<8x4x16xf32>, vector<8x8x16xf32>, vector<8x4x8xf32> -> vector<8x4x8xf32>
    "tpu.trace_stop"() : () -> ()
    "tpu.trace_start"() <{level = 10 : i32, message = "bpd,bzd->bpz"}> : () -> ()
    %cst_14 = arith.constant dense<0.000000e+00> : vector<8x4x4xf32>
    %11 = tpu.matmul %10, %3, %cst_14 {dimension_numbers = #tpu.dot_dimension_numbers<[2], [2], [1], [1], [0, 0, 0, 1, 1, 1], [0], [0]>} : vector<8x4x8xf32>, vector<8x4x8xf32>, vector<8x4x4xf32> -> vector<8x4x4xf32>
    "tpu.trace_stop"() : () -> ()
    %12 = vector.shape_cast %11 : vector<8x4x4xf32> to vector<8x16xf32>
    %13 = vector.extract_strided_slice %1 {offsets = [0, 1, 0], sizes = [8, 1, 16], strides = [1, 1, 1]} : vector<8x4x16xf32> to vector<8x1x16xf32>
    %14 = vector.shape_cast %13 : vector<8x1x16xf32> to vector<8x16xf32>
    %cst_15 = arith.constant dense<0.000000e+00> : vector<8x128xf32>
    %15 = tpu.matmul %14, %5, %cst_15 {dimension_numbers = #tpu.dot_dimension_numbers<[1], [0], [0], [1], [0, 0, 1, 1], [], []>} : vector<8x16xf32>, vector<16x128xf32>, vector<8x128xf32> -> vector<8x128xf32>
    %16 = vector.shape_cast %15 : vector<8x128xf32> to vector<8x8x16xf32>
    "tpu.trace_start"() <{level = 10 : i32, message = "bph,bdh->bpd"}> : () -> ()
    %cst_16 = arith.constant dense<0.000000e+00> : vector<8x4x8xf32>
    %17 = tpu.matmul %2, %16, %cst_16 {dimension_numbers = #tpu.dot_dimension_numbers<[2], [2], [1], [1], [0, 0, 0, 1, 1, 1], [0], [0]>} : vector<8x4x16xf32>, vector<8x8x16xf32>, vector<8x4x8xf32> -> vector<8x4x8xf32>
    "tpu.trace_stop"() : () -> ()
    "tpu.trace_start"() <{level = 10 : i32, message = "bpd,bzd->bpz"}> : () -> ()
    %cst_17 = arith.constant dense<0.000000e+00> : vector<8x4x4xf32>
    %18 = tpu.matmul %17, %3, %cst_17 {dimension_numbers = #tpu.dot_dimension_numbers<[2], [2], [1], [1], [0, 0, 0, 1, 1, 1], [0], [0]>} : vector<8x4x8xf32>, vector<8x4x8xf32>, vector<8x4x4xf32> -> vector<8x4x4xf32>
    "tpu.trace_stop"() : () -> ()
    %19 = vector.shape_cast %18 : vector<8x4x4xf32> to vector<8x16xf32>
    %20 = vector.extract_strided_slice %1 {offsets = [0, 2, 0], sizes = [8, 1, 16], strides = [1, 1, 1]} : vector<8x4x16xf32> to vector<8x1x16xf32>
    %21 = vector.shape_cast %20 : vector<8x1x16xf32> to vector<8x16xf32>
    %cst_18 = arith.constant dense<0.000000e+00> : vector<8x128xf32>
    %22 = tpu.matmul %21, %5, %cst_18 {dimension_numbers = #tpu.dot_dimension_numbers<[1], [0], [0], [1], [0, 0, 1, 1], [], []>} : vector<8x16xf32>, vector<16x128xf32>, vector<8x128xf32> -> vector<8x128xf32>
    %23 = vector.shape_cast %22 : vector<8x128xf32> to vector<8x8x16xf32>
    "tpu.trace_start"() <{level = 10 : i32, message = "bph,bdh->bpd"}> : () -> ()
    %cst_19 = arith.constant dense<0.000000e+00> : vector<8x4x8xf32>
    %24 = tpu.matmul %2, %23, %cst_19 {dimension_numbers = #tpu.dot_dimension_numbers<[2], [2], [1], [1], [0, 0, 0, 1, 1, 1], [0], [0]>} : vector<8x4x16xf32>, vector<8x8x16xf32>, vector<8x4x8xf32> -> vector<8x4x8xf32>
    "tpu.trace_stop"() : () -> ()
    "tpu.trace_start"() <{level = 10 : i32, message = "bpd,bzd->bpz"}> : () -> ()
    %cst_20 = arith.constant dense<0.000000e+00> : vector<8x4x4xf32>
    %25 = tpu.matmul %24, %3, %cst_20 {dimension_numbers = #tpu.dot_dimension_numbers<[2], [2], [1], [1], [0, 0, 0, 1, 1, 1], [0], [0]>} : vector<8x4x8xf32>, vector<8x4x8xf32>, vector<8x4x4xf32> -> vector<8x4x4xf32>
    "tpu.trace_stop"() : () -> ()
    %26 = vector.shape_cast %25 : vector<8x4x4xf32> to vector<8x16xf32>
    %27 = vector.extract_strided_slice %1 {offsets = [0, 3, 0], sizes = [8, 1, 16], strides = [1, 1, 1]} : vector<8x4x16xf32> to vector<8x1x16xf32>
    %28 = vector.shape_cast %27 : vector<8x1x16xf32> to vector<8x16xf32>
    %cst_21 = arith.constant dense<0.000000e+00> : vector<8x128xf32>
    %29 = tpu.matmul %28, %5, %cst_21 {dimension_numbers = #tpu.dot_dimension_numbers<[1], [0], [0], [1], [0, 0, 1, 1], [], []>} : vector<8x16xf32>, vector<16x128xf32>, vector<8x128xf32> -> vector<8x128xf32>
    %30 = vector.shape_cast %29 : vector<8x128xf32> to vector<8x8x16xf32>
    "tpu.trace_start"() <{level = 10 : i32, message = "bph,bdh->bpd"}> : () -> ()
    %cst_22 = arith.constant dense<0.000000e+00> : vector<8x4x8xf32>
    %31 = tpu.matmul %2, %30, %cst_22 {dimension_numbers = #tpu.dot_dimension_numbers<[2], [2], [1], [1], [0, 0, 0, 1, 1, 1], [0], [0]>} : vector<8x4x16xf32>, vector<8x8x16xf32>, vector<8x4x8xf32> -> vector<8x4x8xf32>
    "tpu.trace_stop"() : () -> ()
    "tpu.trace_start"() <{level = 10 : i32, message = "bpd,bzd->bpz"}> : () -> ()
    %cst_23 = arith.constant dense<0.000000e+00> : vector<8x4x4xf32>
    %32 = tpu.matmul %31, %3, %cst_23 {dimension_numbers = #tpu.dot_dimension_numbers<[2], [2], [1], [1], [0, 0, 0, 1, 1, 1], [0], [0]>} : vector<8x4x8xf32>, vector<8x4x8xf32>, vector<8x4x4xf32> -> vector<8x4x4xf32>
    "tpu.trace_stop"() : () -> ()
    %33 = vector.shape_cast %32 : vector<8x4x4xf32> to vector<8x16xf32>
    %34 = tpu.concatenate %12, %19, %26, %33 in 1 : vector<8x16xf32>, vector<8x16xf32>, vector<8x16xf32>, vector<8x16xf32> -> vector<8x64xf32>
    %c1 = arith.constant 1 : index
    %c0_24 = arith.constant 0 : index
    %c0_25 = arith.constant 0 : index
    %35 = vector.load %arg8[%c1, %c0_24, %c0_25] : memref<2x16x128xf32, #tpu.memory_space<vmem>>, vector<1x16x128xf32>
    %36 = vector.shape_cast %35 : vector<1x16x128xf32> to vector<16x128xf32>
    %37 = vector.extract_strided_slice %1 {offsets = [0, 0, 0], sizes = [8, 1, 16], strides = [1, 1, 1]} : vector<8x4x16xf32> to vector<8x1x16xf32>
    %38 = vector.shape_cast %37 : vector<8x1x16xf32> to vector<8x16xf32>
    %cst_26 = arith.constant dense<0.000000e+00> : vector<8x128xf32>
    %39 = tpu.matmul %38, %36, %cst_26 {dimension_numbers = #tpu.dot_dimension_numbers<[1], [0], [0], [1], [0, 0, 1, 1], [], []>} : vector<8x16xf32>, vector<16x128xf32>, vector<8x128xf32> -> vector<8x128xf32>
    %40 = vector.shape_cast %39 : vector<8x128xf32> to vector<8x8x16xf32>
    "tpu.trace_start"() <{level = 10 : i32, message = "bph,bdh->bpd"}> : () -> ()
    %cst_27 = arith.constant dense<0.000000e+00> : vector<8x4x8xf32>
    %41 = tpu.matmul %2, %40, %cst_27 {dimension_numbers = #tpu.dot_dimension_numbers<[2], [2], [1], [1], [0, 0, 0, 1, 1, 1], [0], [0]>} : vector<8x4x16xf32>, vector<8x8x16xf32>, vector<8x4x8xf32> -> vector<8x4x8xf32>
    "tpu.trace_stop"() : () -> ()
    "tpu.trace_start"() <{level = 10 : i32, message = "bpd,bzd->bpz"}> : () -> ()
    %cst_28 = arith.constant dense<0.000000e+00> : vector<8x4x4xf32>
    %42 = tpu.matmul %41, %3, %cst_28 {dimension_numbers = #tpu.dot_dimension_numbers<[2], [2], [1], [1], [0, 0, 0, 1, 1, 1], [0], [0]>} : vector<8x4x8xf32>, vector<8x4x8xf32>, vector<8x4x4xf32> -> vector<8x4x4xf32>
    "tpu.trace_stop"() : () -> ()
    %43 = vector.shape_cast %42 : vector<8x4x4xf32> to vector<8x16xf32>
    %44 = vector.extract_strided_slice %1 {offsets = [0, 1, 0], sizes = [8, 1, 16], strides = [1, 1, 1]} : vector<8x4x16xf32> to vector<8x1x16xf32>
    %45 = vector.shape_cast %44 : vector<8x1x16xf32> to vector<8x16xf32>
    %cst_29 = arith.constant dense<0.000000e+00> : vector<8x128xf32>
    %46 = tpu.matmul %45, %36, %cst_29 {dimension_numbers = #tpu.dot_dimension_numbers<[1], [0], [0], [1], [0, 0, 1, 1], [], []>} : vector<8x16xf32>, vector<16x128xf32>, vector<8x128xf32> -> vector<8x128xf32>
    %47 = vector.shape_cast %46 : vector<8x128xf32> to vector<8x8x16xf32>
    "tpu.trace_start"() <{level = 10 : i32, message = "bph,bdh->bpd"}> : () -> ()
    %cst_30 = arith.constant dense<0.000000e+00> : vector<8x4x8xf32>
    %48 = tpu.matmul %2, %47, %cst_30 {dimension_numbers = #tpu.dot_dimension_numbers<[2], [2], [1], [1], [0, 0, 0, 1, 1, 1], [0], [0]>} : vector<8x4x16xf32>, vector<8x8x16xf32>, vector<8x4x8xf32> -> vector<8x4x8xf32>
    "tpu.trace_stop"() : () -> ()
    "tpu.trace_start"() <{level = 10 : i32, message = "bpd,bzd->bpz"}> : () -> ()
    %cst_31 = arith.constant dense<0.000000e+00> : vector<8x4x4xf32>
    %49 = tpu.matmul %48, %3, %cst_31 {dimension_numbers = #tpu.dot_dimension_numbers<[2], [2], [1], [1], [0, 0, 0, 1, 1, 1], [0], [0]>} : vector<8x4x8xf32>, vector<8x4x8xf32>, vector<8x4x4xf32> -> vector<8x4x4xf32>
    "tpu.trace_stop"() : () -> ()
    %50 = vector.shape_cast %49 : vector<8x4x4xf32> to vector<8x16xf32>
    %51 = vector.extract_strided_slice %1 {offsets = [0, 2, 0], sizes = [8, 1, 16], strides = [1, 1, 1]} : vector<8x4x16xf32> to vector<8x1x16xf32>
    %52 = vector.shape_cast %51 : vector<8x1x16xf32> to vector<8x16xf32>
    %cst_32 = arith.constant dense<0.000000e+00> : vector<8x128xf32>
    %53 = tpu.matmul %52, %36, %cst_32 {dimension_numbers = #tpu.dot_dimension_numbers<[1], [0], [0], [1], [0, 0, 1, 1], [], []>} : vector<8x16xf32>, vector<16x128xf32>, vector<8x128xf32> -> vector<8x128xf32>
    %54 = vector.shape_cast %53 : vector<8x128xf32> to vector<8x8x16xf32>
    "tpu.trace_start"() <{level = 10 : i32, message = "bph,bdh->bpd"}> : () -> ()
    %cst_33 = arith.constant dense<0.000000e+00> : vector<8x4x8xf32>
    %55 = tpu.matmul %2, %54, %cst_33 {dimension_numbers = #tpu.dot_dimension_numbers<[2], [2], [1], [1], [0, 0, 0, 1, 1, 1], [0], [0]>} : vector<8x4x16xf32>, vector<8x8x16xf32>, vector<8x4x8xf32> -> vector<8x4x8xf32>
    "tpu.trace_stop"() : () -> ()
    "tpu.trace_start"() <{level = 10 : i32, message = "bpd,bzd->bpz"}> : () -> ()
    %cst_34 = arith.constant dense<0.000000e+00> : vector<8x4x4xf32>
    %56 = tpu.matmul %55, %3, %cst_34 {dimension_numbers = #tpu.dot_dimension_numbers<[2], [2], [1], [1], [0, 0, 0, 1, 1, 1], [0], [0]>} : vector<8x4x8xf32>, vector<8x4x8xf32>, vector<8x4x4xf32> -> vector<8x4x4xf32>
    "tpu.trace_stop"() : () -> ()
    %57 = vector.shape_cast %56 : vector<8x4x4xf32> to vector<8x16xf32>
    %58 = vector.extract_strided_slice %1 {offsets = [0, 3, 0], sizes = [8, 1, 16], strides = [1, 1, 1]} : vector<8x4x16xf32> to vector<8x1x16xf32>
    %59 = vector.shape_cast %58 : vector<8x1x16xf32> to vector<8x16xf32>
    %cst_35 = arith.constant dense<0.000000e+00> : vector<8x128xf32>
    %60 = tpu.matmul %59, %36, %cst_35 {dimension_numbers = #tpu.dot_dimension_numbers<[1], [0], [0], [1], [0, 0, 1, 1], [], []>} : vector<8x16xf32>, vector<16x128xf32>, vector<8x128xf32> -> vector<8x128xf32>
    %61 = vector.shape_cast %60 : vector<8x128xf32> to vector<8x8x16xf32>
    "tpu.trace_start"() <{level = 10 : i32, message = "bph,bdh->bpd"}> : () -> ()
    %cst_36 = arith.constant dense<0.000000e+00> : vector<8x4x8xf32>
    %62 = tpu.matmul %2, %61, %cst_36 {dimension_numbers = #tpu.dot_dimension_numbers<[2], [2], [1], [1], [0, 0, 0, 1, 1, 1], [0], [0]>} : vector<8x4x16xf32>, vector<8x8x16xf32>, vector<8x4x8xf32> -> vector<8x4x8xf32>
    "tpu.trace_stop"() : () -> ()
    "tpu.trace_start"() <{level = 10 : i32, message = "bpd,bzd->bpz"}> : () -> ()
    %cst_37 = arith.constant dense<0.000000e+00> : vector<8x4x4xf32>
    %63 = tpu.matmul %62, %3, %cst_37 {dimension_numbers = #tpu.dot_dimension_numbers<[2], [2], [1], [1], [0, 0, 0, 1, 1, 1], [0], [0]>} : vector<8x4x8xf32>, vector<8x4x8xf32>, vector<8x4x4xf32> -> vector<8x4x4xf32>
    "tpu.trace_stop"() : () -> ()
    %64 = vector.shape_cast %63 : vector<8x4x4xf32> to vector<8x16xf32>
    %65 = tpu.concatenate %43, %50, %57, %64 in 1 : vector<8x16xf32>, vector<8x16xf32>, vector<8x16xf32>, vector<8x16xf32> -> vector<8x64xf32>
    %c0_38 = arith.constant 0 : index
    %c0_39 = arith.constant 0 : index
    %c0_40 = arith.constant 0 : index
    %66 = vector.load %arg5[%c0_38, %c0_39, %c0_40] : memref<8x4x8xf32, #tpu.memory_space<vmem>>, vector<8x4x8xf32>
    %c0_41 = arith.constant 0 : index
    %c0_42 = arith.constant 0 : index
    %c0_43 = arith.constant 0 : index
    %67 = vector.load %arg6[%c0_41, %c0_42, %c0_43] : memref<8x4x8xf32, #tpu.memory_space<vmem>>, vector<8x4x8xf32>
    %c0_44 = arith.constant 0 : index
    %c0_45 = arith.constant 0 : index
    %c0_46 = arith.constant 0 : index
    %68 = vector.load %arg7[%c0_44, %c0_45, %c0_46] : memref<8x4x4xf32, #tpu.memory_space<vmem>>, vector<8x4x4xf32>
    %c0_47 = arith.constant 0 : index
    %c0_48 = arith.constant 0 : index
    %c0_49 = arith.constant 0 : index
    %69 = vector.load %arg9[%c0_47, %c0_48, %c0_49] : memref<2x8x32xf32, #tpu.memory_space<vmem>>, vector<1x8x32xf32>
    %70 = vector.shape_cast %69 : vector<1x8x32xf32> to vector<8x32xf32>
    %71 = vector.extract_strided_slice %66 {offsets = [0, 0, 0], sizes = [8, 1, 8], strides = [1, 1, 1]} : vector<8x4x8xf32> to vector<8x1x8xf32>
    %72 = vector.shape_cast %71 : vector<8x1x8xf32> to vector<8x8xf32>
    %cst_50 = arith.constant dense<0.000000e+00> : vector<8x32xf32>
    %73 = tpu.matmul %72, %70, %cst_50 {dimension_numbers = #tpu.dot_dimension_numbers<[1], [0], [0], [1], [0, 0, 1, 1], [], []>} : vector<8x8xf32>, vector<8x32xf32>, vector<8x32xf32> -> vector<8x32xf32>
    %74 = vector.shape_cast %73 : vector<8x32xf32> to vector<8x4x8xf32>
    "tpu.trace_start"() <{level = 10 : i32, message = "bph,bdh->bpd"}> : () -> ()
    %cst_51 = arith.constant dense<0.000000e+00> : vector<8x4x4xf32>
    %75 = tpu.matmul %67, %74, %cst_51 {dimension_numbers = #tpu.dot_dimension_numbers<[2], [2], [1], [1], [0, 0, 0, 1, 1, 1], [0], [0]>} : vector<8x4x8xf32>, vector<8x4x8xf32>, vector<8x4x4xf32> -> vector<8x4x4xf32>
    "tpu.trace_stop"() : () -> ()
    "tpu.trace_start"() <{level = 10 : i32, message = "bpd,bzd->bpz"}> : () -> ()
    %cst_52 = arith.constant dense<0.000000e+00> : vector<8x4x4xf32>
    %76 = tpu.matmul %75, %68, %cst_52 {dimension_numbers = #tpu.dot_dimension_numbers<[2], [2], [1], [1], [0, 0, 0, 1, 1, 1], [0], [0]>} : vector<8x4x4xf32>, vector<8x4x4xf32>, vector<8x4x4xf32> -> vector<8x4x4xf32>
    "tpu.trace_stop"() : () -> ()
    %77 = vector.shape_cast %76 : vector<8x4x4xf32> to vector<8x16xf32>
    %78 = vector.extract_strided_slice %66 {offsets = [0, 1, 0], sizes = [8, 1, 8], strides = [1, 1, 1]} : vector<8x4x8xf32> to vector<8x1x8xf32>
    %79 = vector.shape_cast %78 : vector<8x1x8xf32> to vector<8x8xf32>
    %cst_53 = arith.constant dense<0.000000e+00> : vector<8x32xf32>
    %80 = tpu.matmul %79, %70, %cst_53 {dimension_numbers = #tpu.dot_dimension_numbers<[1], [0], [0], [1], [0, 0, 1, 1], [], []>} : vector<8x8xf32>, vector<8x32xf32>, vector<8x32xf32> -> vector<8x32xf32>
    %81 = vector.shape_cast %80 : vector<8x32xf32> to vector<8x4x8xf32>
    "tpu.trace_start"() <{level = 10 : i32, message = "bph,bdh->bpd"}> : () -> ()
    %cst_54 = arith.constant dense<0.000000e+00> : vector<8x4x4xf32>
    %82 = tpu.matmul %67, %81, %cst_54 {dimension_numbers = #tpu.dot_dimension_numbers<[2], [2], [1], [1], [0, 0, 0, 1, 1, 1], [0], [0]>} : vector<8x4x8xf32>, vector<8x4x8xf32>, vector<8x4x4xf32> -> vector<8x4x4xf32>
    "tpu.trace_stop"() : () -> ()
    "tpu.trace_start"() <{level = 10 : i32, message = "bpd,bzd->bpz"}> : () -> ()
    %cst_55 = arith.constant dense<0.000000e+00> : vector<8x4x4xf32>
    %83 = tpu.matmul %82, %68, %cst_55 {dimension_numbers = #tpu.dot_dimension_numbers<[2], [2], [1], [1], [0, 0, 0, 1, 1, 1], [0], [0]>} : vector<8x4x4xf32>, vector<8x4x4xf32>, vector<8x4x4xf32> -> vector<8x4x4xf32>
    "tpu.trace_stop"() : () -> ()
    %84 = vector.shape_cast %83 : vector<8x4x4xf32> to vector<8x16xf32>
    %85 = vector.extract_strided_slice %66 {offsets = [0, 2, 0], sizes = [8, 1, 8], strides = [1, 1, 1]} : vector<8x4x8xf32> to vector<8x1x8xf32>
    %86 = vector.shape_cast %85 : vector<8x1x8xf32> to vector<8x8xf32>
    %cst_56 = arith.constant dense<0.000000e+00> : vector<8x32xf32>
    %87 = tpu.matmul %86, %70, %cst_56 {dimension_numbers = #tpu.dot_dimension_numbers<[1], [0], [0], [1], [0, 0, 1, 1], [], []>} : vector<8x8xf32>, vector<8x32xf32>, vector<8x32xf32> -> vector<8x32xf32>
    %88 = vector.shape_cast %87 : vector<8x32xf32> to vector<8x4x8xf32>
    "tpu.trace_start"() <{level = 10 : i32, message = "bph,bdh->bpd"}> : () -> ()
    %cst_57 = arith.constant dense<0.000000e+00> : vector<8x4x4xf32>
    %89 = tpu.matmul %67, %88, %cst_57 {dimension_numbers = #tpu.dot_dimension_numbers<[2], [2], [1], [1], [0, 0, 0, 1, 1, 1], [0], [0]>} : vector<8x4x8xf32>, vector<8x4x8xf32>, vector<8x4x4xf32> -> vector<8x4x4xf32>
    "tpu.trace_stop"() : () -> ()
    "tpu.trace_start"() <{level = 10 : i32, message = "bpd,bzd->bpz"}> : () -> ()
    %cst_58 = arith.constant dense<0.000000e+00> : vector<8x4x4xf32>
    %90 = tpu.matmul %89, %68, %cst_58 {dimension_numbers = #tpu.dot_dimension_numbers<[2], [2], [1], [1], [0, 0, 0, 1, 1, 1], [0], [0]>} : vector<8x4x4xf32>, vector<8x4x4xf32>, vector<8x4x4xf32> -> vector<8x4x4xf32>
    "tpu.trace_stop"() : () -> ()
    %91 = vector.shape_cast %90 : vector<8x4x4xf32> to vector<8x16xf32>
    %92 = vector.extract_strided_slice %66 {offsets = [0, 3, 0], sizes = [8, 1, 8], strides = [1, 1, 1]} : vector<8x4x8xf32> to vector<8x1x8xf32>
    %93 = vector.shape_cast %92 : vector<8x1x8xf32> to vector<8x8xf32>
    %cst_59 = arith.constant dense<0.000000e+00> : vector<8x32xf32>
    %94 = tpu.matmul %93, %70, %cst_59 {dimension_numbers = #tpu.dot_dimension_numbers<[1], [0], [0], [1], [0, 0, 1, 1], [], []>} : vector<8x8xf32>, vector<8x32xf32>, vector<8x32xf32> -> vector<8x32xf32>
    %95 = vector.shape_cast %94 : vector<8x32xf32> to vector<8x4x8xf32>
    "tpu.trace_start"() <{level = 10 : i32, message = "bph,bdh->bpd"}> : () -> ()
    %cst_60 = arith.constant dense<0.000000e+00> : vector<8x4x4xf32>
    %96 = tpu.matmul %67, %95, %cst_60 {dimension_numbers = #tpu.dot_dimension_numbers<[2], [2], [1], [1], [0, 0, 0, 1, 1, 1], [0], [0]>} : vector<8x4x8xf32>, vector<8x4x8xf32>, vector<8x4x4xf32> -> vector<8x4x4xf32>
    "tpu.trace_stop"() : () -> ()
    "tpu.trace_start"() <{level = 10 : i32, message = "bpd,bzd->bpz"}> : () -> ()
    %cst_61 = arith.constant dense<0.000000e+00> : vector<8x4x4xf32>
    %97 = tpu.matmul %96, %68, %cst_61 {dimension_numbers = #tpu.dot_dimension_numbers<[2], [2], [1], [1], [0, 0, 0, 1, 1, 1], [0], [0]>} : vector<8x4x4xf32>, vector<8x4x4xf32>, vector<8x4x4xf32> -> vector<8x4x4xf32>
    "tpu.trace_stop"() : () -> ()
    %98 = vector.shape_cast %97 : vector<8x4x4xf32> to vector<8x16xf32>
    %99 = tpu.concatenate %77, %84, %91, %98 in 1 : vector<8x16xf32>, vector<8x16xf32>, vector<8x16xf32>, vector<8x16xf32> -> vector<8x64xf32>
    %c1_62 = arith.constant 1 : index
    %c0_63 = arith.constant 0 : index
    %c0_64 = arith.constant 0 : index
    %100 = vector.load %arg9[%c1_62, %c0_63, %c0_64] : memref<2x8x32xf32, #tpu.memory_space<vmem>>, vector<1x8x32xf32>
    %101 = vector.shape_cast %100 : vector<1x8x32xf32> to vector<8x32xf32>
    %102 = vector.extract_strided_slice %66 {offsets = [0, 0, 0], sizes = [8, 1, 8], strides = [1, 1, 1]} : vector<8x4x8xf32> to vector<8x1x8xf32>
    %103 = vector.shape_cast %102 : vector<8x1x8xf32> to vector<8x8xf32>
    %cst_65 = arith.constant dense<0.000000e+00> : vector<8x32xf32>
    %104 = tpu.matmul %103, %101, %cst_65 {dimension_numbers = #tpu.dot_dimension_numbers<[1], [0], [0], [1], [0, 0, 1, 1], [], []>} : vector<8x8xf32>, vector<8x32xf32>, vector<8x32xf32> -> vector<8x32xf32>
    %105 = vector.shape_cast %104 : vector<8x32xf32> to vector<8x4x8xf32>
    "tpu.trace_start"() <{level = 10 : i32, message = "bph,bdh->bpd"}> : () -> ()
    %cst_66 = arith.constant dense<0.000000e+00> : vector<8x4x4xf32>
    %106 = tpu.matmul %67, %105, %cst_66 {dimension_numbers = #tpu.dot_dimension_numbers<[2], [2], [1], [1], [0, 0, 0, 1, 1, 1], [0], [0]>} : vector<8x4x8xf32>, vector<8x4x8xf32>, vector<8x4x4xf32> -> vector<8x4x4xf32>
    "tpu.trace_stop"() : () -> ()
    "tpu.trace_start"() <{level = 10 : i32, message = "bpd,bzd->bpz"}> : () -> ()
    %cst_67 = arith.constant dense<0.000000e+00> : vector<8x4x4xf32>
    %107 = tpu.matmul %106, %68, %cst_67 {dimension_numbers = #tpu.dot_dimension_numbers<[2], [2], [1], [1], [0, 0, 0, 1, 1, 1], [0], [0]>} : vector<8x4x4xf32>, vector<8x4x4xf32>, vector<8x4x4xf32> -> vector<8x4x4xf32>
    "tpu.trace_stop"() : () -> ()
    %108 = vector.shape_cast %107 : vector<8x4x4xf32> to vector<8x16xf32>
    %109 = vector.extract_strided_slice %66 {offsets = [0, 1, 0], sizes = [8, 1, 8], strides = [1, 1, 1]} : vector<8x4x8xf32> to vector<8x1x8xf32>
    %110 = vector.shape_cast %109 : vector<8x1x8xf32> to vector<8x8xf32>
    %cst_68 = arith.constant dense<0.000000e+00> : vector<8x32xf32>
    %111 = tpu.matmul %110, %101, %cst_68 {dimension_numbers = #tpu.dot_dimension_numbers<[1], [0], [0], [1], [0, 0, 1, 1], [], []>} : vector<8x8xf32>, vector<8x32xf32>, vector<8x32xf32> -> vector<8x32xf32>
    %112 = vector.shape_cast %111 : vector<8x32xf32> to vector<8x4x8xf32>
    "tpu.trace_start"() <{level = 10 : i32, message = "bph,bdh->bpd"}> : () -> ()
    %cst_69 = arith.constant dense<0.000000e+00> : vector<8x4x4xf32>
    %113 = tpu.matmul %67, %112, %cst_69 {dimension_numbers = #tpu.dot_dimension_numbers<[2], [2], [1], [1], [0, 0, 0, 1, 1, 1], [0], [0]>} : vector<8x4x8xf32>, vector<8x4x8xf32>, vector<8x4x4xf32> -> vector<8x4x4xf32>
    "tpu.trace_stop"() : () -> ()
    "tpu.trace_start"() <{level = 10 : i32, message = "bpd,bzd->bpz"}> : () -> ()
    %cst_70 = arith.constant dense<0.000000e+00> : vector<8x4x4xf32>
    %114 = tpu.matmul %113, %68, %cst_70 {dimension_numbers = #tpu.dot_dimension_numbers<[2], [2], [1], [1], [0, 0, 0, 1, 1, 1], [0], [0]>} : vector<8x4x4xf32>, vector<8x4x4xf32>, vector<8x4x4xf32> -> vector<8x4x4xf32>
    "tpu.trace_stop"() : () -> ()
    %115 = vector.shape_cast %114 : vector<8x4x4xf32> to vector<8x16xf32>
    %116 = vector.extract_strided_slice %66 {offsets = [0, 2, 0], sizes = [8, 1, 8], strides = [1, 1, 1]} : vector<8x4x8xf32> to vector<8x1x8xf32>
    %117 = vector.shape_cast %116 : vector<8x1x8xf32> to vector<8x8xf32>
    %cst_71 = arith.constant dense<0.000000e+00> : vector<8x32xf32>
    %118 = tpu.matmul %117, %101, %cst_71 {dimension_numbers = #tpu.dot_dimension_numbers<[1], [0], [0], [1], [0, 0, 1, 1], [], []>} : vector<8x8xf32>, vector<8x32xf32>, vector<8x32xf32> -> vector<8x32xf32>
    %119 = vector.shape_cast %118 : vector<8x32xf32> to vector<8x4x8xf32>
    "tpu.trace_start"() <{level = 10 : i32, message = "bph,bdh->bpd"}> : () -> ()
    %cst_72 = arith.constant dense<0.000000e+00> : vector<8x4x4xf32>
    %120 = tpu.matmul %67, %119, %cst_72 {dimension_numbers = #tpu.dot_dimension_numbers<[2], [2], [1], [1], [0, 0, 0, 1, 1, 1], [0], [0]>} : vector<8x4x8xf32>, vector<8x4x8xf32>, vector<8x4x4xf32> -> vector<8x4x4xf32>
    "tpu.trace_stop"() : () -> ()
    "tpu.trace_start"() <{level = 10 : i32, message = "bpd,bzd->bpz"}> : () -> ()
    %cst_73 = arith.constant dense<0.000000e+00> : vector<8x4x4xf32>
    %121 = tpu.matmul %120, %68, %cst_73 {dimension_numbers = #tpu.dot_dimension_numbers<[2], [2], [1], [1], [0, 0, 0, 1, 1, 1], [0], [0]>} : vector<8x4x4xf32>, vector<8x4x4xf32>, vector<8x4x4xf32> -> vector<8x4x4xf32>
    "tpu.trace_stop"() : () -> ()
    %122 = vector.shape_cast %121 : vector<8x4x4xf32> to vector<8x16xf32>
    %123 = vector.extract_strided_slice %66 {offsets = [0, 3, 0], sizes = [8, 1, 8], strides = [1, 1, 1]} : vector<8x4x8xf32> to vector<8x1x8xf32>
    %124 = vector.shape_cast %123 : vector<8x1x8xf32> to vector<8x8xf32>
    %cst_74 = arith.constant dense<0.000000e+00> : vector<8x32xf32>
    %125 = tpu.matmul %124, %101, %cst_74 {dimension_numbers = #tpu.dot_dimension_numbers<[1], [0], [0], [1], [0, 0, 1, 1], [], []>} : vector<8x8xf32>, vector<8x32xf32>, vector<8x32xf32> -> vector<8x32xf32>
    %126 = vector.shape_cast %125 : vector<8x32xf32> to vector<8x4x8xf32>
    "tpu.trace_start"() <{level = 10 : i32, message = "bph,bdh->bpd"}> : () -> ()
    %cst_75 = arith.constant dense<0.000000e+00> : vector<8x4x4xf32>
    %127 = tpu.matmul %67, %126, %cst_75 {dimension_numbers = #tpu.dot_dimension_numbers<[2], [2], [1], [1], [0, 0, 0, 1, 1, 1], [0], [0]>} : vector<8x4x8xf32>, vector<8x4x8xf32>, vector<8x4x4xf32> -> vector<8x4x4xf32>
    "tpu.trace_stop"() : () -> ()
    "tpu.trace_start"() <{level = 10 : i32, message = "bpd,bzd->bpz"}> : () -> ()
    %cst_76 = arith.constant dense<0.000000e+00> : vector<8x4x4xf32>
    %128 = tpu.matmul %127, %68, %cst_76 {dimension_numbers = #tpu.dot_dimension_numbers<[2], [2], [1], [1], [0, 0, 0, 1, 1, 1], [0], [0]>} : vector<8x4x4xf32>, vector<8x4x4xf32>, vector<8x4x4xf32> -> vector<8x4x4xf32>
    "tpu.trace_stop"() : () -> ()
    %129 = vector.shape_cast %128 : vector<8x4x4xf32> to vector<8x16xf32>
    %130 = tpu.concatenate %108, %115, %122, %129 in 1 : vector<8x16xf32>, vector<8x16xf32>, vector<8x16xf32>, vector<8x16xf32> -> vector<8x64xf32>
    %131 = vector.broadcast %0 : vector<8x1xf32> to vector<8x64xf32>
    %132 = arith.mulf %131, %34 : vector<8x64xf32>
    %cst_77 = arith.constant 1.000000e+00 : f32
    %133 = vector.broadcast %cst_77 : f32 to vector<8x1xf32>
    %134 = arith.subf %133, %0 : vector<8x1xf32>
    %135 = vector.broadcast %134 : vector<8x1xf32> to vector<8x64xf32>
    %136 = arith.mulf %135, %99 : vector<8x64xf32>
    %137 = arith.addf %132, %136 : vector<8x64xf32>
    %138 = vector.broadcast %0 : vector<8x1xf32> to vector<8x64xf32>
    %139 = arith.mulf %138, %65 : vector<8x64xf32>
    %cst_78 = arith.constant 1.000000e+00 : f32
    %140 = vector.broadcast %cst_78 : f32 to vector<8x1xf32>
    %141 = arith.subf %140, %0 : vector<8x1xf32>
    %142 = vector.broadcast %141 : vector<8x1xf32> to vector<8x64xf32>
    %143 = arith.mulf %142, %130 : vector<8x64xf32>
    %144 = arith.addf %139, %143 : vector<8x64xf32>
    %145 = arith.maximumf %137, %144 : vector<8x64xf32>
    %146 = arith.subf %137, %145 : vector<8x64xf32>
    %147 = math.exp %146 : vector<8x64xf32>
    %148 = arith.subf %144, %145 : vector<8x64xf32>
    %149 = math.exp %148 : vector<8x64xf32>
    %150 = arith.addf %147, %149 : vector<8x64xf32>
    %151 = tpu.reciprocal %150 : vector<8x64xf32> -> vector<8x64xf32>
    %152 = tpu.concatenate %137, %144 in 1 : vector<8x64xf32>, vector<8x64xf32> -> vector<8x128xf32>
    %c0_79 = arith.constant 0 : index
    %c0_80 = arith.constant 0 : index
    %153 = vector.load %arg10[%c0_79, %c0_80] : memref<8x128xf32, #tpu.memory_space<vmem>>, vector<8x128xf32>
    tpu.vector_store %arg10[%c0_79, %c0_80], %152 {strides = array<i32>} : memref<8x128xf32, #tpu.memory_space<vmem>>, vector<8x128xf32>,
    %154 = arith.mulf %147, %151 : vector<8x64xf32>
    %155 = arith.mulf %149, %151 : vector<8x64xf32>
    %156 = tpu.concatenate %154, %155 in 1 : vector<8x64xf32>, vector<8x64xf32> -> vector<8x128xf32>
    %c0_81 = arith.constant 0 : index
    %c0_82 = arith.constant 0 : index
    %157 = vector.load %arg11[%c0_81, %c0_82] : memref<8x128xf32, #tpu.memory_space<vmem>>, vector<8x128xf32>
    tpu.vector_store %arg11[%c0_81, %c0_82], %156 {strides = array<i32>} : memref<8x128xf32, #tpu.memory_space<vmem>>, vector<8x128xf32>,
    return
  }
  func.func @transform_0(%arg0: i32) -> (i32, i32) {
    %c0_i32 = arith.constant 0 : i32
    %c0_i32_0 = arith.constant 0 : i32
    return %arg0, %c0_i32 : i32, i32
  }
  func.func @transform_1(%arg0: i32) -> (i32, i32, i32) {
    %c0_i32 = arith.constant 0 : i32
    %c0_i32_0 = arith.constant 0 : i32
    %c0_i32_1 = arith.constant 0 : i32
    return %arg0, %c0_i32, %c0_i32_0 : i32, i32, i32
  }
  func.func @transform_2(%arg0: i32) -> (i32, i32, i32) {
    %c0_i32 = arith.constant 0 : i32
    %c0_i32_0 = arith.constant 0 : i32
    %c0_i32_1 = arith.constant 0 : i32
    return %arg0, %c0_i32, %c0_i32_0 : i32, i32, i32
  }
  func.func @transform_3(%arg0: i32) -> (i32, i32, i32) {
    %c0_i32 = arith.constant 0 : i32
    %c0_i32_0 = arith.constant 0 : i32
    %c0_i32_1 = arith.constant 0 : i32
    return %arg0, %c0_i32, %c0_i32_0 : i32, i32, i32
  }
  func.func @transform_4(%arg0: i32) -> (i32, i32, i32) {
    %c0_i32 = arith.constant 0 : i32
    %c0_i32_0 = arith.constant 0 : i32
    %c0_i32_1 = arith.constant 0 : i32
    return %arg0, %c0_i32, %c0_i32_0 : i32, i32, i32
  }
  func.func @transform_5(%arg0: i32) -> (i32, i32, i32) {
    %c0_i32 = arith.constant 0 : i32
    %c0_i32_0 = arith.constant 0 : i32
    %c0_i32_1 = arith.constant 0 : i32
    return %arg0, %c0_i32, %c0_i32_0 : i32, i32, i32
  }
  func.func @transform_6(%arg0: i32) -> (i32, i32, i32) {
    %c0_i32 = arith.constant 0 : i32
    %c0_i32_0 = arith.constant 0 : i32
    %c0_i32_1 = arith.constant 0 : i32
    return %arg0, %c0_i32, %c0_i32_0 : i32, i32, i32
  }
  func.func @transform_7(%arg0: i32) -> (i32, i32, i32) {
    %c0_i32 = arith.constant 0 : i32
    %c0_i32_0 = arith.constant 0 : i32
    %c0_i32_1 = arith.constant 0 : i32
    %c0_i32_2 = arith.constant 0 : i32
    return %c0_i32, %c0_i32_0, %c0_i32_1 : i32, i32, i32
  }
  func.func @transform_8(%arg0: i32) -> (i32, i32, i32) {
    %c0_i32 = arith.constant 0 : i32
    %c0_i32_0 = arith.constant 0 : i32
    %c0_i32_1 = arith.constant 0 : i32
    %c0_i32_2 = arith.constant 0 : i32
    return %c0_i32, %c0_i32_0, %c0_i32_1 : i32, i32, i32
  }
  func.func @transform_9(%arg0: i32) -> (i32, i32) {
    %c0_i32 = arith.constant 0 : i32
    %c0_i32_0 = arith.constant 0 : i32
    return %arg0, %c0_i32 : i32, i32
  }
  func.func @transform_10(%arg0: i32) -> (i32, i32) {
    %c0_i32 = arith.constant 0 : i32
    %c0_i32_0 = arith.constant 0 : i32
    return %arg0, %c0_i32 : i32, i32
  }
}

</mosaic_0001>

<bundles_post_ra>
// kernel: mask_forward.1
= control target key start
LH: loop header
LB: loop body
LE: loop exit
PB: predicated region body
PF: predicated region fallthrough
CT: control target
= control target key end

     0   :  { %s10732_s13 = smov 0   ;;  %s13400_s0 = inlined_call_operand.vmem [shape: f32[24,1], index: 0, kind: input, shape index: {}]   ;;  %s13401_s1 = inlined_call_operand.vmem [shape: f32[24,4,16], index: 1, kind: input, shape index: {}]   ;;  %s13402_s2 = inlined_call_operand.vmem [shape: f32[24,4,16], index: 2, kind: input, shape index: {}]   ;;  %s13403_s3 = inlined_call_operand.vmem [shape: f32[24,4,8], index: 3, kind: input, shape index: {}]   ;;  %s13404_s4 = inlined_call_operand.vmem [shape: f32[24,4,8], index: 4, kind: input, shape index: {}]   ;;  %s13405_s5 = inlined_call_operand.vmem [shape: f32[24,4,8], index: 5, kind: input, shape index: {}]   ;;  %s13406_s6 = inlined_call_operand.vmem [shape: f32[24,4,4], index: 6, kind: input, shape index: {}]   ;;  %s13407_s7 = inlined_call_operand.vmem [shape: f32[2,16,128], index: 7, kind: input, shape index: {}]   ;;  %s13408_s8 = inlined_call_operand.vmem [shape: f32[2,8,32], index: 8, kind: input, shape index: {}]   ;;  %s13409_s9 = inlined_call_operand.vmem [shape: f32[24,128], index: 9, kind: output, shape index: {0}]   ;;  %s13410_s10 = inlined_call_operand.vmem [shape: f32[24,128], index: 10, kind: output, shape index: {1}]  }
   0x1 LB: > { %s10738_s14 = sadd.s32 4294967295, %s10660_s13   ;;  %p10027_p0 = scmp.ge.s32.totalorder %s10660_s13, 1  ;;  %s10660_s13 = sphi %s10732_s13, %s21_s13  }
   0x2   : > { %p380_p1 = scmp.lt.s32.totalorder %s10660_s13, 4 }
   0x4   : > { %p381_p2 = pnand %p10027_p0, %p380_p1 }
   0x6   : > { %384 = sbr.rel (%p381_p2) target bundleno = 7079 (0x1ba7), region = 56 }
   0xb   : > { %v10745_v0 = vld [vmem:[%s13407_s7 + $0x8] sm:$0xff]  ;;  %v10750_v1 = vld [vmem:[%s13407_s7] sm:$0xff]  ;;  %s10029_s19 = sshll.u32 %s10738_s14, 3  ;;  %vm534_vm0 = vcmask 1041409   ;;  %vm537_vm1 = vcmask 1042434   ;;  %vm540_vm2 = vcmask 1043459  }
   0xc   : > { %571 = vmatpush.msra.mxu0 %v10745_v0  ;;  %p455_p3 = scmp.lt.s32.totalorder %s10029_s19, 23  ;;  %vm543_vm3 = vcmask 1044484   ;;  %vm546_vm4 = vcmask 1045509   ;;  %vm549_vm5 = vcmask 1046534   ;;  %vm552_vm6 = vcmask 1047559   ;;  %s10662_s24 = smov 112  }
   0xd   : > { %vm554_vm7 = vcmask 130048   ;;  %s10663_s25 = smov 48   ;;  %s10664_s26 = smov 16   ;;  %v10669_v29 = vmov 1983009808   ;;  %vm600_vm8 = vcmask 1047556  }
   0xe   : > { %572 = vmatpush.msra.mxu0 %v10750_v1  ;;  %s13579_s19 = smov (!%p455_p3, %s10029_s19), 23  ;;  %s10665_s27 = smov 96   ;;  %v605_v30 = vunpack.c.l.s4 %v10669_v29  ;;  %v10670_v45 = vmov 1934713408   ;;  %vm920_vm9 = vcmask 64512   ;;  %vm1197_vm10 = vcmask 31744  }
   0xf   : > { %s10755_s20 = sshll.u32 %s13579_s19, 2  ;;  %s10666_s28 = smov 32   ;;  %v653_v46 = vunpack.c.l.s4 %v10670_v45  ;;  %vm1200_vm11 = vcmask 97280   ;;  %vm3042_vm12 = vcmask 261120   ;;  %vm3044_vm13 = vcmask 392192  }
  0x10   : > { %s458_s23 = scalar_lea.vmem %s13401_s1, %s10755_s20  ;;  %s10667_s29 = smov 80   ;;  %v10804_v33 = vunpack.c.0.s8 %v605_v30 }
  0x11   : > { %v10761_v2 = vld [vmem:[%s458_s23] sm:$0xf]  ;;  %v10763_v3 = vld [vmem:[%s458_s23 + $0x4] sm:$0xf]  ;;  %v10765_v4 = vld [vmem:[%s458_s23 + $0x8] sm:$0xf]  ;;  %v10817_v58 = vunpack.c.0.s8 %v653_v46  ;;  %s10844_s15 = scalar_lea.vmem %s13402_s2, %s10755_s20  ;;  %s10856_s18 = scalar_lea.vmem %s13403_s3, %s10755_s20 }
  0x12   : > { %v10767_v5 = vld [vmem:[%s458_s23 + $0xc] sm:$0xf]  ;;  %v10769_v6 = vld [vmem:[%s458_s23 + $0x10] sm:$0xf]  ;;  %v10771_v7 = vld [vmem:[%s458_s23 + $0x14] sm:$0xf]  ;;  %s12098_s12 = scalar_lea.vmem %s13405_s5, %s10755_s20 }
  0x13   : > { %v10773_v8 = vld [vmem:[%s458_s23 + $0x18] sm:$0xf]  ;;  %v533_v9 = vrot.slane %v10763_v3, 7  ;;  %v536_v10 = vrot.slane %v10765_v4, 6  ;;  %v10777_v11 = vld [vmem:[%s458_s23 + $0x1c] sm:$0xf] }
  0x14   : > { %v539_v12 = vrot.slane %v10767_v5, 5  ;;  %v542_v13 = vrot.slane %v10769_v6, 4  ;;  %v545_v15 = vrot.slane %v10771_v7, 3  ;;  %v548_v17 = vrot.slane %v10773_v8, 2  ;;  %s10668_s30 = smov 64   ;;  %s10671_s21 = smov 120  }
  0x15   : > { %v535_v14 = vsel %vm534_vm0, %v533_v9, %v10761_v2  ;;  %v551_v19 = vrot.slane %v10777_v11, 1  ;;  %s10672_s22 = smov 104   ;;  %p450_p4 = scmp.lt.s32.totalorder %s10738_s14, 2 }
  0x16   : > { %v538_v16 = vsel %vm537_vm1, %v536_v10, %v535_v14 }
  0x17   : > { %v541_v18 = vsel %vm540_vm2, %v539_v12, %v538_v16  ;;  %s13581_s14 = smov (!%p450_p4, %s10738_s14), 2 }
  0x18   : > { %v544_v20 = vsel %vm543_vm3, %v542_v13, %v541_v18  ;;  %s13340_s19 = sshll.u32 %s13581_s14, 3 }
  0x19   : > { %v547_v21 = vsel %vm546_vm4, %v545_v15, %v544_v20  ;;  %s453_s23 = scalar_lea.vmem %s13400_s0, %s13340_s19 }
  0x1a   : > { %v550_v22 = vsel %vm549_vm5, %v548_v17, %v547_v21 }
  0x1b   : > { %v10792_v23 = vsel %vm552_vm6, %v551_v19, %v550_v22 }
  0x1c   : > { %10043 = vmatmul.msk.f32.vlgmr.msra.gmra.mxu0 %vm554_vm7, %v10792_v23 }
  0x99   : > { %v574_v24 = vpop.f32.mrf.mxu0 }
  0x9a   : > { %578 = vrot.lane.b32.xlu2 %v574_v24, %s10662_s24  ;;  %590 = vrot.lane.b32.xlu1 %v574_v24, %s10663_s25  ;;  %v602_v35 = vrot.slane %v574_v24, 4 }
  0x9b   : > { %596 = vrot.lane.b32.xlu0 %v574_v24, %s10664_s26 }
  0xa2   : > { %581 = vrot.lane.b32.xlu2 %v574_v24, %s10665_s27  ;;  %593 = vrot.lane.b32.xlu1 %v574_v24, %s10666_s28 }
  0xa3   : > { %584 = vrot.lane.b32.xlu0 %v574_v24, %s10667_s29 }
  0xab   : > { %587 = vrot.lane.b32.xlu0 %v574_v24, %s10668_s30 }
  0xf4   : > { %v579_v25 = vpop.permute.xlu2 %578 }
  0xf5   : > { %v614_v34 = vrot.slane %v579_v25, 4 }
  0xfc   : > { %v582_v26 = vpop.permute.xlu2 %581 }
  0xfd   : > { %v599_v28 = vrot.slane %v582_v26, 4  ;;  %v603_v39 = vsel %vm600_vm8, %v582_v26, %v602_v35 }
  0xfe   : > { %v611_v48 = vperm.slane %v603_v39, %v10804_v33 }
  0xff   : > { %v601_v32 = vsel %vm600_vm8, %v599_v28, %v574_v24 }
 0x100   : > { %v607_v37 = vperm.slane %v601_v32, %v10804_v33  ;;  %v662_v60 = vrot.slane %v611_v48, 4 }
 0x102   : > { %v650_v49 = vrot.slane %v607_v37, 4 }
 0x10c   : > { %v591_v31 = vpop.permute.xlu1 %590 }
 0x10d   : > { %v597_v27 = vpop.permute.xlu0 %596  ;;  %v638_v40 = vrot.slane %v591_v31, 4 }
 0x10e   : > { %v636_v36 = vrot.slane %v597_v27, 4 }
 0x10f   : > { %v639_v53 = vsel %vm600_vm8, %v597_v27, %v638_v40 }
 0x110   : > { %v637_v44 = vsel %vm600_vm8, %v636_v36, %v591_v31  ;;  %v647_v61 = vperm.slane %v639_v53, %v10804_v33  ;;  %v10880_v53 = vld [vmem:[%s10844_s15 + $0x8] sm:$0xf] }
 0x111   : > { %v643_v54 = vperm.slane %v637_v44, %v10804_v33 }
 0x112   : > { %v684_v19 = vrot.slane %v647_v61, 4 }
 0x113   : > { %v672_v14 = vrot.slane %v643_v54, 4 }
 0x114   : > { %v594_v50 = vpop.permute.xlu1 %593 }
 0x115   : > { %v585_v38 = vpop.permute.xlu0 %584  ;;  %v624_v57 = vrot.slane %v594_v50, 4 }
 0x116   : > { %v612_v41 = vrot.slane %v585_v38, 4  ;;  %v615_v42 = vsel %vm600_vm8, %v585_v38, %v614_v34 }
 0x117   : > { %v623_v43 = vperm.slane %v615_v42, %v10804_v33  ;;  %v10850_v42 = vld [vmem:[%s10844_s15 + $0x4] sm:$0xf] }
 0x118   : > { %v613_v47 = vsel %vm600_vm8, %v612_v41, %v579_v25 }
 0x119   : > { %v619_v51 = vperm.slane %v613_v47, %v10804_v33  ;;  %v660_v52 = vrot.slane %v623_v43, 4  ;;  %v663_v15 = vsel %vm600_vm8, %v623_v43, %v662_v60  ;;  %v10864_v47 = vld [vmem:[%s10844_s15] sm:$0xf]  ;;  %v10913_v60 = vld [vmem:[%s10856_s18 + $0x4] sm:$0xf] }
 0x11a   : > { %v671_v24 = vperm.slane %v663_v15, %v10817_v58 }
 0x11b   : > { %v648_v55 = vrot.slane %v619_v51, 4  ;;  %v651_v56 = vsel %vm600_vm8, %v619_v51, %v650_v49  ;;  %v661_v59 = vsel %vm600_vm8, %v660_v52, %v611_v48  ;;  %v10867_v48 = vld [vmem:[%s10844_s15 + $0xc] sm:$0xf]  ;;  %v10875_v52 = vld [vmem:[%s10856_s18] sm:$0xf] }
 0x11c   : > { %v659_v13 = vperm.slane %v651_v56, %v10817_v58  ;;  %v667_v17 = vperm.slane %v661_v59, %v10817_v58  ;;  %v710_v45 = vrot.slane %v671_v24, 4  ;;  %v10896_v56 = vld [vmem:[%s10844_s15 + $0x10] sm:$0xf]  ;;  %v10904_v59 = vld [vmem:[%s10844_s15 + $0x18] sm:$0xf] }
 0x11d   : > { %v588_v62 = vpop.permute.xlu0 %587  ;;  %v649_v63 = vsel %vm600_vm8, %v648_v55, %v607_v37  ;;  %v10893_v55 = vld [vmem:[%s10844_s15 + $0x14] sm:$0xf] }
 0x11e   : > { %v625_v9 = vsel %vm600_vm8, %v624_v57, %v588_v62  ;;  %v626_v10 = vrot.slane %v588_v62, 4  ;;  %v655_v12 = vperm.slane %v649_v63, %v10817_v58  ;;  %v702_v27 = vrot.slane %v659_v13, 4  ;;  %v10899_v57 = vld [vmem:[%s10844_s15 + $0x1c] sm:$0xf]  ;;  %v10919_v62 = vld [vmem:[%s10856_s18 + $0x10] sm:$0xf] }
 0x11f   : > { %v631_v16 = vperm.slane %v625_v9, %v10804_v33  ;;  %v706_v31 = vrot.slane %v667_v17, 4  ;;  %v10928_v63 = vld [vmem:[%s10856_s18 + $0xc] sm:$0xf]  ;;  %v10931_v9 = vld [vmem:[%s10856_s18 + $0x14] sm:$0xf] }
 0x120   : > { %v627_v18 = vsel %vm600_vm8, %v594_v50, %v626_v10  ;;  %v698_v26 = vrot.slane %v655_v12, 4  ;;  %v10934_v10 = vld [vmem:[%s10856_s18 + $0x18] sm:$0xf] }
 0x121   : > { %v635_v20 = vperm.slane %v627_v18, %v10804_v33  ;;  %v674_v21 = vrot.slane %v631_v16, 4  ;;  %v673_v22 = vsel %vm600_vm8, %v672_v14, %v631_v16  ;;  %v1204_v14 = vrot.slane %v10765_v4, 7 }
 0x122   : > { %v679_v25 = vperm.slane %v673_v22, %v10817_v58  ;;  %v1206_v16 = vrot.slane %v10767_v5, 6 }
 0x123   : > { %v686_v28 = vrot.slane %v635_v20, 4  ;;  %v675_v29 = vsel %vm600_vm8, %v643_v54, %v674_v21  ;;  %v685_v30 = vsel %vm600_vm8, %v684_v19, %v635_v20  ;;  %v1208_v20 = vrot.slane %v10769_v6, 5 }
 0x124   : > { %v699_v32 = vsel %vm600_vm8, %v679_v25, %v698_v26  ;;  %v696_v34 = vrot.slane %v679_v25, 4  ;;  %v683_v35 = vperm.slane %v675_v29, %v10817_v58  ;;  %v691_v36 = vperm.slane %v685_v30, %v10817_v58 }
 0x125   : > { %10046 = vmatpush.xpose.msk.msra.mxu2 %vm554_vm7, %v699_v32  ;;  %v687_v37 = vsel %vm600_vm8, %v647_v61, %v686_v28  ;;  %v10916_v61 = vld [vmem:[%s10856_s18 + $0x8] sm:$0xf]  ;;  %v1212_v26 = vrot.slane %v10773_v8, 3 }
 0x126   : > { %v697_v38 = vsel %vm600_vm8, %v696_v34, %v655_v12  ;;  %v703_v39 = vsel %vm600_vm8, %v683_v35, %v702_v27  ;;  %v707_v40 = vsel %vm600_vm8, %v691_v36, %v706_v31  ;;  %v700_v41 = vrot.slane %v683_v35, 4  ;;  %v10943_v12 = vld [vmem:[%s10856_s18 + $0x1c] sm:$0xf] }
 0x127   : > { %10044 = vmatpush.xpose.msk.msra.mxu1 %vm554_vm7, %v697_v38  ;;  %10050 = vmatpush.xpose.msk.msrb.mxu0 %vm554_vm7, %v703_v39  ;;  %v704_v43 = vrot.slane %v691_v36, 4  ;;  %v695_v44 = vperm.slane %v687_v37, %v10817_v58  ;;  %v1214_v31 = vrot.slane %v10777_v11, 2 }
 0x128   : > { %v701_v46 = vsel %vm600_vm8, %v700_v41, %v659_v13  ;;  %10047 = vmatmul.msk.f32.vlgmr.msra.gmra.mxu2 %vm554_vm7, %v10850_v42  ;;  %v1202_v13 = vrot.slane %v10761_v2, 1 }
 0x129   : > { %10054 = vmatpush.xpose.msk.msrb.mxu2 %vm554_vm7, %v707_v40  ;;  %10048 = vmatpush.xpose.msk.msra.mxu3 %vm554_vm7, %v701_v46  ;;  %v705_v49 = vsel %vm600_vm8, %v704_v43, %v667_v17  ;;  %v711_v50 = vsel %vm600_vm8, %v695_v44, %v710_v45  ;;  %v708_v51 = vrot.slane %v695_v44, 4 }
 0x12a   : > { %10045 = vmatmul.msk.f32.vlgmr.msra.gmra.mxu1 %vm554_vm7, %v10864_v47  ;;  %10051 = vmatmul.msk.f32.vlgmr.msrb.gmra.mxu0 %vm554_vm7, %v10867_v48  ;;  %v1203_v15 = vsel %vm534_vm0, %v10763_v3, %v1202_v13 }
 0x12b   : > { %10052 = vmatpush.xpose.msk.msrb.mxu1 %vm554_vm7, %v705_v49  ;;  %10058 = vmatpush.xpose.msk.msra.mxu0 %vm554_vm7, %v711_v50  ;;  %v709_v54 = vsel %vm600_vm8, %v708_v51, %v671_v24  ;;  %v1205_v17 = vsel %vm537_vm1, %v1204_v14, %v1203_v15  ;;  %v1210_v24 = vrot.slane %v10771_v7, 4 }
 0x12c   : > { %10049 = vmatmul.msk.f32.vlgmr.msra.gmra.mxu3 %vm554_vm7, %v10880_v53  ;;  %v1207_v21 = vsel %vm540_vm2, %v1206_v16, %v1205_v17 }
 0x12d   : > { %10056 = vmatpush.xpose.msk.msrb.mxu3 %vm554_vm7, %v709_v54  ;;  %10062 = vmatpush.xpose.msk.msra.mxu2 %vm920_vm9, %v10913_v60  ;;  %v1209_v25 = vsel %vm543_vm3, %v1208_v20, %v1207_v21 }
 0x12e   : > { %v1211_v29 = vsel %vm546_vm4, %v1210_v24, %v1209_v25 }
 0x12f   : > { %10060 = vmatpush.xpose.msk.msra.mxu1 %vm920_vm9, %v10875_v52  ;;  %10066 = vmatpush.xpose.msk.msrb.mxu0 %vm920_vm9, %v10928_v63  ;;  %v1213_v32 = vsel %vm549_vm5, %v1212_v26, %v1211_v29 }
 0x130   : > { %10055 = vmatmul.msk.f32.vlgmr.msrb.gmra.mxu2 %vm554_vm7, %v10893_v55  ;;  %v10971_v35 = vsel %vm552_vm6, %v1214_v31, %v1213_v32 }
 0x131   : > { %10064 = vmatpush.xpose.msk.msra.mxu3 %vm920_vm9, %v10916_v61  ;;  %10070 = vmatpush.xpose.msk.msrb.mxu2 %vm920_vm9, %v10931_v9 }
 0x132   : > { %10053 = vmatmul.msk.f32.vlgmr.msrb.gmra.mxu1 %vm554_vm7, %v10896_v56  ;;  %10059 = vmatmul.msk.f32.vlgmr.msra.gmra.mxu0 %vm554_vm7, %v10899_v57 }
 0x133   : > { %10068 = vmatpush.xpose.msk.msrb.mxu1 %vm920_vm9, %v10919_v62  ;;  %10074 = vmatpush.xpose.msk.msra.mxu0 %vm920_vm9, %v10943_v12 }
 0x134   : > { %10057 = vmatmul.msk.f32.vlgmr.msrb.gmra.mxu3 %vm554_vm7, %v10904_v59 }
 0x135   : > { %10072 = vmatpush.xpose.msk.msrb.mxu3 %vm920_vm9, %v10934_v10 }
 0x1a7   : > { %v735_v18 = vpop.f32.mrf.mxu1  ;;  %v813_v19 = vpop.f32.mrf.mxu0 }
 0x1a8   : > { %10061 = vmatmul.msk.f32.vlgmr.msra.gmra.mxu1 %vm920_vm9, %v735_v18  ;;  %10067 = vmatmul.msk.f32.vlgmr.msrb.gmra.mxu0 %vm920_vm9, %v813_v19 }
 0x1a9   : > { %1232 = vmatpush.msra.mxu1 %v10745_v0 }
 0x1ab   : > { %v761_v22 = vpop.f32.mrf.mxu2  ;;  %1233 = vmatpush.msra.mxu1 %v10750_v1 }
 0x1ac   : > { %10063 = vmatmul.msk.f32.vlgmr.msra.gmra.mxu2 %vm920_vm9, %v761_v22 }
 0x1af   : > { %v787_v27 = vpop.f32.mrf.mxu3  ;;  %v839_v28 = vpop.f32.mrf.mxu1 }
 0x1b0   : > { %10065 = vmatmul.msk.f32.vlgmr.msra.gmra.mxu3 %vm920_vm9, %v787_v27  ;;  %10069 = vmatmul.msk.f32.vlgmr.msrb.gmra.mxu1 %vm920_vm9, %v839_v28  ;;  %v917_v30 = vpop.f32.mrf.mxu0 }
 0x1b1   : > { %10075 = vmatmul.msk.f32.vlgmr.msra.gmra.mxu0 %vm920_vm9, %v917_v30 }
 0x1b3   : > { %v865_v34 = vpop.f32.mrf.mxu2 }
 0x1b4   : > { %10071 = vmatmul.msk.f32.vlgmr.msrb.gmra.mxu2 %vm920_vm9, %v865_v34 }
 0x1b7   : > { %v891_v36 = vpop.f32.mrf.mxu3 }
 0x1b8   : > { %10073 = vmatmul.msk.f32.vlgmr.msrb.gmra.mxu3 %vm920_vm9, %v891_v36  ;;  %10076 = vmatmul.msk.f32.vlgmr.msra.gmra.mxu1 %vm554_vm7, %v10971_v35 }
 0x225   : > { %v944_v37 = vpop.f32.mrf.mxu1  ;;  %v1022_v38 = vpop.f32.mrf.mxu0 }
 0x226   : > { %v1135_v43 = vrot.slane %v1022_v38, 4 }
 0x22d   : > { %v1048_v39 = vpop.f32.mrf.mxu1 }
 0x22e   : > { %v1126_v41 = vpop.f32.mrf.mxu0 }
 0x22f   : > { %v970_v40 = vpop.f32.mrf.mxu2  ;;  %v1147_v45 = vrot.slane %v1126_v41, 4 }
 0x230   : > { %v1136_v49 = vsel %vm600_vm8, %v1135_v43, %v970_v40 }
 0x231   : > { %v10982_v13 = vperm.slane %v1136_v49, %v10804_v33 }
 0x233   : > { %v996_v44 = vpop.f32.mrf.mxu3  ;;  %v1153_v18 = vrot.slane %v10982_v13, 4 }
 0x234   : > { %v1129_v50 = vrot.slane %v996_v44, 4 }
 0x235   : > { %v1235_v46 = vpop.f32.mrf.mxu1 }
 0x236   : > { %1251 = vrot.lane.b32.xlu0 %v1235_v46, %s10663_s25  ;;  %1245 = vrot.lane.b32.xlu2 %v1235_v46, %s10667_s29  ;;  %v1130_v15 = vsel %vm600_vm8, %v1129_v50, %v944_v37  ;;  %v1262_v40 = vrot.slane %v1235_v46, 4 }
 0x237   : > { %1257 = vrot.lane.b32.xlu1 %v1235_v46, %s10664_s26  ;;  %v1074_v51 = vpop.f32.mrf.mxu2  ;;  %v10990_v19 = vperm.slane %v1130_v15, %v10804_v33 }
 0x238   : > { %v1148_v54 = vsel %vm600_vm8, %v1147_v45, %v1074_v51 }
 0x239   : > { %v10985_v14 = vperm.slane %v1148_v54, %v10804_v33  ;;  %v1154_v24 = vsel %vm600_vm8, %v1153_v18, %v10990_v19 }
 0x23a   : > { %v11008_v27 = vperm.slane %v1154_v24, %v10817_v58 }
 0x23b   : > { %v1100_v16 = vpop.f32.mrf.mxu3  ;;  %v1165_v20 = vrot.slane %v10985_v14, 4 }
 0x23c   : > { %v1141_v17 = vrot.slane %v1100_v16, 4 }
 0x23e   : > { %v1142_v21 = vsel %vm600_vm8, %v1141_v17, %v1048_v39  ;;  %1242 = vrot.lane.b32.xlu0 %v1235_v46, %s10665_s27  ;;  %1239 = vrot.lane.b32.xlu2 %v1235_v46, %s10662_s24 }
 0x23f   : > { %v10997_v22 = vperm.slane %v1142_v21, %v10804_v33  ;;  %1254 = vrot.lane.b32.xlu1 %v1235_v46, %s10666_s28 }
 0x241   : > { %v1166_v25 = vsel %vm600_vm8, %v1165_v20, %v10997_v22 }
 0x242   : > { %v11005_v26 = vperm.slane %v1166_v25, %v10817_v58 }
 0x244   : > { %v1177_v28 = vrot.slane %v11005_v26, 4 }
 0x246   : > { %v11013_v29 = vsel %vm600_vm8, %v1177_v28, %v11008_v27 }
 0x247   : > { %13456 = vst [vmem:[#allocation2_spill] sm:$0xff] %v11013_v29  ;;  %1248 = vrot.lane.b32.xlu1 %v1235_v46, %s10668_s30 }
 0x290   : > { %v1246_v30 = vpop.permute.xlu2 %1245 }
 0x291   : > { %v1272_v37 = vrot.slane %v1246_v30, 4 }
 0x298   : > { %v1240_v31 = vpop.permute.xlu2 %1239 }
 0x299   : > { %v1274_v36 = vrot.slane %v1240_v31, 4  ;;  %v1273_v38 = vsel %vm600_vm8, %v1272_v37, %v1240_v31 }
 0x29a   : > { %v1279_v44 = vperm.slane %v1273_v38, %v10804_v33 }
 0x29b   : > { %v1275_v39 = vsel %vm600_vm8, %v1246_v30, %v1274_v36 }
 0x29c   : > { %v1283_v45 = vperm.slane %v1275_v39, %v10804_v33  ;;  %v1308_v20 = vrot.slane %v1279_v44, 4 }
 0x29e   : > { %v1320_v21 = vrot.slane %v1283_v45, 4 }
 0x2a8   : > { %v1252_v32 = vpop.permute.xlu0 %1251 }
 0x2a9   : > { %v1258_v34 = vpop.permute.xlu1 %1257  ;;  %v1298_v54 = vrot.slane %v1252_v32, 4 }
 0x2aa   : > { %v1296_v41 = vrot.slane %v1258_v34, 4 }
 0x2ab   : > { %v1299_v24 = vsel %vm600_vm8, %v1258_v34, %v1298_v54 }
 0x2ac   : > { %v1297_v17 = vsel %vm600_vm8, %v1296_v41, %v1252_v32  ;;  %v1307_v38 = vperm.slane %v1299_v24, %v10804_v33 }
 0x2ad   : > { %v1303_v28 = vperm.slane %v1297_v17, %v10804_v33 }
 0x2b0   : > { %v1243_v43 = vpop.permute.xlu0 %1242 }
 0x2b1   : > { %v1260_v49 = vrot.slane %v1243_v43, 4  ;;  %v1263_v50 = vsel %vm600_vm8, %v1243_v43, %v1262_v40  ;;  %v1255_v51 = vpop.permute.xlu1 %1254  ;;  %v1332_v43 = vrot.slane %v1303_v28, 4 }
 0x2b2   : > { %v1271_v16 = vperm.slane %v1263_v50, %v10804_v33  ;;  %v1284_v37 = vrot.slane %v1255_v51, 4 }
 0x2b3   : > { %v1261_v15 = vsel %vm600_vm8, %v1260_v49, %v1235_v46 }
 0x2b4   : > { %v1267_v18 = vperm.slane %v1261_v15, %v10804_v33  ;;  %v1321_v31 = vsel %vm600_vm8, %v1320_v21, %v1271_v16  ;;  %v1322_v36 = vrot.slane %v1271_v16, 4 }
 0x2b5   : > { %v1327_v39 = vperm.slane %v1321_v31, %v10817_v58 }
 0x2b6   : > { %v1310_v25 = vrot.slane %v1267_v18, 4  ;;  %v1309_v30 = vsel %vm600_vm8, %v1308_v20, %v1267_v18  ;;  %v1323_v49 = vsel %vm600_vm8, %v1283_v45, %v1322_v36 }
 0x2b7   : > { %v1315_v34 = vperm.slane %v1309_v30, %v10817_v58  ;;  %v1331_v20 = vperm.slane %v1323_v49, %v10817_v58 }
 0x2b8   : > { %v1311_v46 = vsel %vm600_vm8, %v1279_v44, %v1310_v25  ;;  %v1344_v44 = vrot.slane %v1307_v38, 4  ;;  %v1366_v25 = vrot.slane %v1327_v39, 4 }
 0x2b9   : > { %v1249_v32 = vpop.permute.xlu1 %1248  ;;  %v1319_v54 = vperm.slane %v1311_v46, %v10817_v58  ;;  %v1358_v24 = vrot.slane %v1315_v34, 4 }
 0x2ba   : > { %v1285_v40 = vsel %vm600_vm8, %v1284_v37, %v1249_v32  ;;  %v1286_v41 = vrot.slane %v1249_v32, 4 }
 0x2bb   : > { %v1291_v50 = vperm.slane %v1285_v40, %v10804_v33  ;;  %v1362_v31 = vrot.slane %v1319_v54, 4 }
 0x2bc   : > { %v1287_v15 = vsel %vm600_vm8, %v1255_v51, %v1286_v41 }
 0x2bd   : > { %v1295_v16 = vperm.slane %v1287_v15, %v10804_v33  ;;  %v1333_v17 = vsel %vm600_vm8, %v1332_v43, %v1291_v50  ;;  %v1334_v18 = vrot.slane %v1291_v50, 4 }
 0x2be   : > { %v1339_v21 = vperm.slane %v1333_v17, %v10817_v58 }
 0x2bf   : > { %v1335_v45 = vsel %vm600_vm8, %v1303_v28, %v1334_v18  ;;  %v1346_v30 = vrot.slane %v1295_v16, 4  ;;  %v1345_v36 = vsel %vm600_vm8, %v1344_v44, %v1295_v16  ;;  %v1370_v44 = vrot.slane %v1331_v20, 4 }
 0x2c0   : > { %v1359_v51 = vsel %vm600_vm8, %v1339_v21, %v1358_v24  ;;  %v1356_v37 = vrot.slane %v1339_v21, 4  ;;  %v1343_v46 = vperm.slane %v1335_v45, %v10817_v58  ;;  %v1351_v32 = vperm.slane %v1345_v36, %v10817_v58 }
 0x2c1   : > { %10079 = vmatpush.xpose.msk.msra.mxu3 %vm554_vm7, %v1359_v51  ;;  %v1347_v40 = vsel %vm600_vm8, %v1307_v38, %v1346_v30  ;;  %v1815_v45 = vrot.slane %v10767_v5, 7  ;;  %v1817_v36 = vrot.slane %v10769_v6, 6 }
 0x2c2   : > { %v1357_v41 = vsel %vm600_vm8, %v1356_v37, %v1315_v34  ;;  %v1363_v43 = vsel %vm600_vm8, %v1343_v46, %v1362_v31  ;;  %v1367_v28 = vsel %vm600_vm8, %v1351_v32, %v1366_v25  ;;  %v1360_v49 = vrot.slane %v1343_v46, 4 }
 0x2c3   : > { %10077 = vmatpush.xpose.msk.msra.mxu2 %vm554_vm7, %v1357_v41  ;;  %10083 = vmatpush.xpose.msk.msrb.mxu1 %vm554_vm7, %v1363_v43  ;;  %v1364_v50 = vrot.slane %v1351_v32, 4  ;;  %v1355_v15 = vperm.slane %v1347_v40, %v10817_v58  ;;  %v1819_v32 = vrot.slane %v10771_v7, 5  ;;  %v1821_v43 = vrot.slane %v10773_v8, 4 }
 0x2c4   : > { %v1361_v16 = vsel %vm600_vm8, %v1360_v49, %v1319_v54  ;;  %10080 = vmatmul.msk.f32.vlgmr.msra.gmra.mxu3 %vm554_vm7, %v10850_v42  ;;  %v1812_v54 = vrot.slane %v10763_v3, 1  ;;  %v1823_v49 = vrot.slane %v10777_v11, 3 }
 0x2c5   : > { %10087 = vmatpush.xpose.msk.msrb.mxu3 %vm554_vm7, %v1367_v28  ;;  %10081 = vmatpush.xpose.msk.msrb.mxu0 %vm554_vm7, %v1361_v16  ;;  %v1365_v38 = vsel %vm600_vm8, %v1364_v50, %v1327_v39  ;;  %v1371_v34 = vsel %vm600_vm8, %v1355_v15, %v1370_v44  ;;  %v1368_v17 = vrot.slane %v1355_v15, 4  ;;  %v1811_v39 = vrot.slane %v10761_v2, 2 }
 0x2c6   : > { %10078 = vmatmul.msk.f32.vlgmr.msra.gmra.mxu2 %vm554_vm7, %v10864_v47  ;;  %10084 = vmatmul.msk.f32.vlgmr.msrb.gmra.mxu1 %vm554_vm7, %v10867_v48 }
 0x2c7   : > { %10085 = vmatpush.xpose.msk.msrb.mxu2 %vm554_vm7, %v1365_v38  ;;  %10091 = vmatpush.xpose.msk.msra.mxu1 %vm554_vm7, %v1371_v34  ;;  %v1369_v18 = vsel %vm600_vm8, %v1368_v17, %v1331_v20  ;;  %v1813_v24 = vsel %vm534_vm0, %v1812_v54, %v1811_v39 }
 0x2c8   : > { %10082 = vmatmul.msk.f32.vlgmr.msrb.gmra.mxu0 %vm554_vm7, %v10880_v53  ;;  %v1814_v30 = vsel %vm537_vm1, %v10765_v4, %v1813_v24 }
 0x2c9   : > { %10089 = vmatpush.xpose.msk.msra.mxu0 %vm554_vm7, %v1369_v18  ;;  %10095 = vmatpush.xpose.msk.msra.mxu3 %vm920_vm9, %v10913_v60  ;;  %v1816_v37 = vsel %vm540_vm2, %v1815_v45, %v1814_v30 }
 0x2ca   : > { %v1818_v40 = vsel %vm543_vm3, %v1817_v36, %v1816_v37 }
 0x2cb   : > { %10093 = vmatpush.xpose.msk.msra.mxu2 %vm920_vm9, %v10875_v52  ;;  %10099 = vmatpush.xpose.msk.msrb.mxu1 %vm920_vm9, %v10928_v63 }
 0x2cc   : > { %10088 = vmatmul.msk.f32.vlgmr.msrb.gmra.mxu3 %vm554_vm7, %v10893_v55 }
 0x2cd   : > { %10097 = vmatpush.xpose.msk.msrb.mxu0 %vm920_vm9, %v10916_v61  ;;  %10103 = vmatpush.xpose.msk.msrb.mxu3 %vm920_vm9, %v10931_v9 }
 0x2ce   : > { %10086 = vmatmul.msk.f32.vlgmr.msrb.gmra.mxu2 %vm554_vm7, %v10896_v56  ;;  %10092 = vmatmul.msk.f32.vlgmr.msra.gmra.mxu1 %vm554_vm7, %v10899_v57 }
 0x2cf   : > { %10101 = vmatpush.xpose.msk.msrb.mxu2 %vm920_vm9, %v10919_v62  ;;  %10107 = vmatpush.xpose.msk.msra.mxu1 %vm920_vm9, %v10943_v12 }
 0x2d0   : > { %10090 = vmatmul.msk.f32.vlgmr.msra.gmra.mxu0 %vm554_vm7, %v10904_v59 }
 0x2d1   : > { %10105 = vmatpush.xpose.msk.msra.mxu0 %vm920_vm9, %v10934_v10 }
 0x343   : > { %v1461_v20 = vpop.f32.mrf.mxu1 }
 0x344   : > { %10100 = vmatmul.msk.f32.vlgmr.msrb.gmra.mxu1 %vm920_vm9, %v1461_v20 }
 0x345   : > { %v1438_v21 = vpop.f32.mrf.mxu0 }
 0x346   : > { %10098 = vmatmul.msk.f32.vlgmr.msrb.gmra.mxu0 %vm920_vm9, %v1438_v21 }
 0x347   : > { %v1415_v25 = vpop.f32.mrf.mxu3 }
 0x348   : > { %10096 = vmatmul.msk.f32.vlgmr.msra.gmra.mxu3 %vm920_vm9, %v1415_v25 }
 0x349   : > { %v1392_v31 = vpop.f32.mrf.mxu2 }
 0x34a   : > { %10094 = vmatmul.msk.f32.vlgmr.msra.gmra.mxu2 %vm920_vm9, %v1392_v31 }
 0x34b   : > { %v1553_v51 = vpop.f32.mrf.mxu1  ;;  %1841 = vmatpush.msra.mxu2 %v10745_v0  ;;  %v1820_v0 = vsel %vm546_vm4, %v1819_v32, %v1818_v40 }
 0x34c   : > { %10108 = vmatmul.msk.f32.vlgmr.msra.gmra.mxu1 %vm920_vm9, %v1553_v51 }
 0x34d   : > { %v1530_v46 = vpop.f32.mrf.mxu0  ;;  %1842 = vmatpush.msra.mxu2 %v10750_v1  ;;  %v1822_v1 = vsel %vm549_vm5, %v1821_v43, %v1820_v0 }
 0x34e   : > { %10106 = vmatmul.msk.f32.vlgmr.msra.gmra.mxu0 %vm920_vm9, %v1530_v46  ;;  %v11121_v50 = vsel %vm552_vm6, %v1823_v49, %v1822_v1 }
 0x34f   : > { %v1507_v41 = vpop.f32.mrf.mxu3 }
 0x350   : > { %10104 = vmatmul.msk.f32.vlgmr.msrb.gmra.mxu3 %vm920_vm9, %v1507_v41 }
 0x351   : > { %v1484_v28 = vpop.f32.mrf.mxu2 }
 0x352   : > { %10102 = vmatmul.msk.f32.vlgmr.msrb.gmra.mxu2 %vm920_vm9, %v1484_v28 }
 0x35a   : > { %10109 = vmatmul.msk.f32.vlgmr.msra.gmra.mxu2 %vm554_vm7, %v11121_v50 }
 0x3c1   : > { %v1645_v15 = vpop.f32.mrf.mxu1 }
 0x3c2   : > { %v1746_v16 = vrot.slane %v1645_v15, 4 }
 0x3c3   : > { %v1622_v44 = vpop.f32.mrf.mxu0 }
 0x3c4   : > { %v1740_v39 = vrot.slane %v1622_v44, 4 }
 0x3c9   : > { %v1737_v17 = vpop.f32.mrf.mxu1 }
 0x3ca   : > { %v1758_v20 = vrot.slane %v1737_v17, 4 }
 0x3cb   : > { %v1599_v38 = vpop.f32.mrf.mxu3  ;;  %v1714_v54 = vpop.f32.mrf.mxu0 }
 0x3cc   : > { %v1747_v18 = vsel %vm600_vm8, %v1746_v16, %v1599_v38  ;;  %v1752_v25 = vrot.slane %v1714_v54, 4 }
 0x3cd   : > { %v1576_v34 = vpop.f32.mrf.mxu2  ;;  %v11127_v21 = vperm.slane %v1747_v18, %v10804_v33 }
 0x3ce   : > { %v1741_v24 = vsel %vm600_vm8, %v1740_v39, %v1576_v34 }
 0x3cf   : > { %v1764_v31 = vrot.slane %v11127_v21, 4  ;;  %v11133_v36 = vperm.slane %v1741_v24, %v10804_v33 }
 0x3d1   : > { %v1765_v41 = vsel %vm600_vm8, %v1764_v31, %v11133_v36 }
 0x3d2   : > { %v11151_v0 = vperm.slane %v1765_v41, %v10817_v58 }
 0x3d3   : > { %v1691_v45 = vpop.f32.mrf.mxu3 }
 0x3d4   : > { %v1759_v30 = vsel %vm600_vm8, %v1758_v20, %v1691_v45 }
 0x3d5   : > { %v11136_v51 = vperm.slane %v1759_v30, %v10804_v33  ;;  %v1668_v37 = vpop.f32.mrf.mxu2 }
 0x3d6   : > { %v1753_v46 = vsel %vm600_vm8, %v1752_v25, %v1668_v37 }
 0x3d7   : > { %v1776_v32 = vrot.slane %v11136_v51, 4  ;;  %v11141_v40 = vperm.slane %v1753_v46, %v10804_v33 }
 0x3d9   : > { %v1777_v43 = vsel %vm600_vm8, %v1776_v32, %v11141_v40 }
 0x3da   : > { %v11148_v28 = vperm.slane %v1777_v43, %v10817_v58 }
 0x3dc   : > { %13457 = vst [vmem:[#allocation3_spill] sm:$0xff] %v11148_v28  ;;  %v1788_v49 = vrot.slane %v11148_v28, 4 }
 0x3dd   : > { %v1844_v1 = vpop.f32.mrf.mxu2 }
 0x3de   : > { %1860 = vrot.lane.b32.xlu1 %v1844_v1, %s10663_s25  ;;  %1854 = vrot.lane.b32.xlu0 %v1844_v1, %s10667_s29  ;;  %v11158_v15 = vsel %vm600_vm8, %v1788_v49, %v11151_v0 }
 0x3df   : > { %13458 = vst [vmem:[#allocation4_spill] sm:$0xff] %v11158_v15  ;;  %1866 = vrot.lane.b32.xlu2 %v1844_v1, %s10664_s26 }
 0x3e6   : > { %1851 = vrot.lane.b32.xlu1 %v1844_v1, %s10665_s27  ;;  %1848 = vrot.lane.b32.xlu0 %v1844_v1, %s10662_s24 }
 0x3e7   : > { %1863 = vrot.lane.b32.xlu2 %v1844_v1, %s10666_s28 }
 0x3ef   : > { %1857 = vrot.lane.b32.xlu2 %v1844_v1, %s10668_s30 }
 0x439   : > { %v1867_v44 = vpop.permute.xlu2 %1866 }
 0x43a   : > { %v1905_v39 = vrot.slane %v1867_v44, 4 }
 0x441   : > { %v1864_v16 = vpop.permute.xlu2 %1863 }
 0x442   : > { %v1893_v34 = vrot.slane %v1864_v16, 4 }
 0x449   : > { %v1858_v38 = vpop.permute.xlu2 %1857 }
 0x44a   : > { %v1895_v17 = vrot.slane %v1858_v38, 4  ;;  %v1894_v18 = vsel %vm600_vm8, %v1893_v34, %v1858_v38 }
 0x44b   : > { %v1900_v25 = vperm.slane %v1894_v18, %v10804_v33 }
 0x44c   : > { %v1896_v24 = vsel %vm600_vm8, %v1864_v16, %v1895_v17  ;;  %v1871_v16 = vrot.slane %v1844_v1, 4 }
 0x44d   : > { %v1904_v46 = vperm.slane %v1896_v24, %v10804_v33  ;;  %v1943_v43 = vrot.slane %v1900_v25, 4 }
 0x44f   : > { %v1955_v17 = vrot.slane %v1904_v46, 4 }
 0x450   : > { %v1861_v54 = vpop.permute.xlu1 %1860  ;;  %v1855_v20 = vpop.permute.xlu0 %1854 }
 0x451   : > { %v1906_v45 = vsel %vm600_vm8, %v1905_v39, %v1861_v54  ;;  %v1907_v30 = vrot.slane %v1861_v54, 4  ;;  %v1881_v34 = vrot.slane %v1855_v20, 4 }
 0x452   : > { %v1912_v31 = vperm.slane %v1906_v45, %v10804_v33 }
 0x453   : > { %v1908_v37 = vsel %vm600_vm8, %v1867_v44, %v1907_v30 }
 0x454   : > { %v1916_v32 = vperm.slane %v1908_v37, %v10804_v33  ;;  %v1941_v41 = vrot.slane %v1912_v31, 4  ;;  %v1944_v38 = vsel %vm600_vm8, %v1912_v31, %v1943_v43 }
 0x455   : > { %v1952_v37 = vperm.slane %v1944_v38, %v10817_v58 }
 0x456   : > { %v1953_v49 = vrot.slane %v1916_v32, 4  ;;  %v1942_v18 = vsel %vm600_vm8, %v1941_v41, %v1900_v25  ;;  %v1956_v29 = vsel %vm600_vm8, %v1916_v32, %v1955_v17 }
 0x457   : > { %v1948_v25 = vperm.slane %v1942_v18, %v10817_v58  ;;  %v1964_v32 = vperm.slane %v1956_v29, %v10817_v58 }
 0x458   : > { %v1852_v39 = vpop.permute.xlu1 %1851  ;;  %v1849_v54 = vpop.permute.xlu0 %1848  ;;  %v1954_v45 = vsel %vm600_vm8, %v1953_v49, %v1904_v46 }
 0x459   : > { %v1869_v15 = vrot.slane %v1852_v39, 4  ;;  %v1872_v44 = vsel %vm600_vm8, %v1852_v39, %v1871_v16  ;;  %v1882_v24 = vsel %vm600_vm8, %v1881_v34, %v1849_v54  ;;  %v1883_v30 = vrot.slane %v1849_v54, 4 }
 0x45a   : > { %v1880_v31 = vperm.slane %v1872_v44, %v10804_v33  ;;  %v1888_v43 = vperm.slane %v1882_v24, %v10804_v33  ;;  %v1960_v49 = vperm.slane %v1954_v45, %v10817_v58  ;;  %v1969_v24 = vrot.slane %v1952_v37, 4 }
 0x45b   : > { %v1870_v41 = vsel %vm600_vm8, %v1869_v15, %v1844_v1  ;;  %v1884_v46 = vsel %vm600_vm8, %v1855_v20, %v1883_v30  ;;  %v1965_v15 = vrot.slane %v1948_v25, 4 }
 0x45c   : > { %v1876_v16 = vperm.slane %v1870_v41, %v10804_v33  ;;  %v1931_v34 = vrot.slane %v1880_v31, 4  ;;  %v1892_v39 = vperm.slane %v1884_v46, %v10804_v33  ;;  %v1917_v38 = vrot.slane %v1888_v43, 4 }
 0x45d   : > { %v1973_v41 = vrot.slane %v1960_v49, 4 }
 0x45e   : > { %v1919_v17 = vrot.slane %v1876_v16, 4  ;;  %v1918_v54 = vsel %vm600_vm8, %v1917_v38, %v1876_v16  ;;  %v1929_v44 = vrot.slane %v1892_v39, 4  ;;  %v1932_v18 = vsel %vm600_vm8, %v1892_v39, %v1931_v34 }
 0x45f   : > { %v1924_v1 = vperm.slane %v1918_v54, %v10817_v58  ;;  %v1940_v20 = vperm.slane %v1932_v18, %v10817_v58  ;;  %v1977_v34 = vrot.slane %v1964_v32, 4 }
 0x460   : > { %v1920_v45 = vsel %vm600_vm8, %v1888_v43, %v1919_v17  ;;  %v1930_v30 = vsel %vm600_vm8, %v1929_v44, %v1880_v31 }
 0x461   : > { %v1928_v46 = vperm.slane %v1920_v45, %v10817_v58  ;;  %v1966_v29 = vsel %vm600_vm8, %v1965_v15, %v1924_v1  ;;  %v1967_v28 = vrot.slane %v1924_v1, 4  ;;  %v1936_v16 = vperm.slane %v1930_v30, %v10817_v58  ;;  %v10608_v45 = vld [vmem:[%s13407_s7] sm:$0xff] }
 0x462   : > { %10110 = vmatpush.xpose.msk.msra.mxu3 %vm554_vm7, %v1966_v29  ;;  %v1979_v39 = vrot.slane %v1940_v20, 4  ;;  %v1978_v31 = vsel %vm600_vm8, %v1977_v34, %v1940_v20  ;;  %v2426_v15 = vrot.slane %v10769_v6, 7  ;;  %v2432_v29 = vrot.slane %v10777_v11, 4 }
 0x463   : > { %v1968_v38 = vsel %vm600_vm8, %v1948_v25, %v1967_v28  ;;  %v1970_v54 = vsel %vm600_vm8, %v1969_v24, %v1928_v46  ;;  %v1974_v43 = vsel %vm600_vm8, %v1973_v41, %v1936_v16  ;;  %v1971_v17 = vrot.slane %v1928_v46, 4 }
 0x464   : > { %10112 = vmatpush.xpose.msk.msrb.mxu0 %vm554_vm7, %v1968_v38  ;;  %10114 = vmatpush.xpose.msk.msrb.mxu1 %vm554_vm7, %v1970_v54  ;;  %v1975_v44 = vrot.slane %v1936_v16, 4  ;;  %v1980_v25 = vsel %vm600_vm8, %v1964_v32, %v1979_v39  ;;  %v2428_v24 = vrot.slane %v10771_v7, 6 }
 0x465   : > { %v1972_v18 = vsel %vm600_vm8, %v1952_v37, %v1971_v17  ;;  %10111 = vmatmul.msk.f32.vlgmr.msra.gmra.mxu3 %vm554_vm7, %v10864_v47  ;;  %v2421_v47 = vrot.slane %v10763_v3, 2 }
 0x466   : > { %10118 = vmatpush.xpose.msk.msrb.mxu3 %vm554_vm7, %v1974_v43  ;;  %10116 = vmatpush.xpose.msk.msrb.mxu2 %vm554_vm7, %v1972_v18  ;;  %v1976_v28 = vsel %vm600_vm8, %v1960_v49, %v1975_v44 }
 0x467   : > { %10115 = vmatmul.msk.f32.vlgmr.msrb.gmra.mxu1 %vm554_vm7, %v10880_v53  ;;  %10113 = vmatmul.msk.f32.vlgmr.msrb.gmra.mxu0 %vm554_vm7, %v10850_v42  ;;  %v2420_v42 = vrot.slane %v10761_v2, 3  ;;  %v10607_v2 = vld [vmem:[%s13407_s7 + $0x8] sm:$0xff] }
 0x468   : > { %10122 = vmatpush.xpose.msk.msra.mxu1 %vm554_vm7, %v1978_v31  ;;  %10120 = vmatpush.xpose.msk.msra.mxu0 %vm554_vm7, %v1976_v28 }
 0x469   : > { %10117 = vmatmul.msk.f32.vlgmr.msrb.gmra.mxu2 %vm554_vm7, %v10867_v48  ;;  %v2423_v48 = vrot.slane %v10765_v4, 1  ;;  %v2422_v49 = vsel %vm534_vm0, %v2421_v47, %v2420_v42 }
 0x46a   : > { %10124 = vmatpush.xpose.msk.msra.mxu2 %vm554_vm7, %v1980_v25  ;;  %10126 = vmatpush.xpose.msk.msra.mxu3 %vm920_vm9, %v10875_v52 }
 0x46b   : > { %v2424_v32 = vsel %vm537_vm1, %v2423_v48, %v2422_v49 }
 0x46c   : > { %10130 = vmatpush.xpose.msk.msrb.mxu1 %vm920_vm9, %v10916_v61  ;;  %10128 = vmatpush.xpose.msk.msrb.mxu0 %vm920_vm9, %v10913_v60  ;;  %v2425_v3 = vsel %vm540_vm2, %v10767_v5, %v2424_v32  ;;  %v2430_v5 = vrot.slane %v10773_v8, 5 }
 0x46d   : > { %10119 = vmatmul.msk.f32.vlgmr.msrb.gmra.mxu3 %vm554_vm7, %v10896_v56  ;;  %v2427_v30 = vsel %vm543_vm3, %v2426_v15, %v2425_v3 }
 0x46e   : > { %10132 = vmatpush.xpose.msk.msrb.mxu2 %vm920_vm9, %v10928_v63  ;;  %10134 = vmatpush.xpose.msk.msrb.mxu3 %vm920_vm9, %v10919_v62  ;;  %v2429_v46 = vsel %vm546_vm4, %v2428_v24, %v2427_v30 }
 0x46f   : > { %10123 = vmatmul.msk.f32.vlgmr.msra.gmra.mxu1 %vm554_vm7, %v10904_v59  ;;  %10121 = vmatmul.msk.f32.vlgmr.msra.gmra.mxu0 %vm554_vm7, %v10893_v55  ;;  %v2431_v34 = vsel %vm549_vm5, %v2430_v5, %v2429_v46 }
 0x470   : > { %10138 = vmatpush.xpose.msk.msra.mxu1 %vm920_vm9, %v10934_v10  ;;  %10136 = vmatpush.xpose.msk.msra.mxu0 %vm920_vm9, %v10931_v9  ;;  %v11274_v7 = vsel %vm552_vm6, %v2432_v29, %v2431_v34 }
 0x471   : > { %10125 = vmatmul.msk.f32.vlgmr.msra.gmra.mxu2 %vm554_vm7, %v10899_v57 }
 0x472   : > { %10140 = vmatpush.xpose.msk.msra.mxu2 %vm920_vm9, %v10943_v12 }
 0x4e4   : > { %v2047_v52 = vpop.f32.mrf.mxu1  ;;  %v2024_v37 = vpop.f32.mrf.mxu0 }
 0x4e5   : > { %10131 = vmatmul.msk.f32.vlgmr.msrb.gmra.mxu1 %vm920_vm9, %v2047_v52  ;;  %10129 = vmatmul.msk.f32.vlgmr.msrb.gmra.mxu0 %vm920_vm9, %v2024_v37 }
 0x4e8   : > { %v2001_v1 = vpop.f32.mrf.mxu3 }
 0x4e9   : > { %10127 = vmatmul.msk.f32.vlgmr.msra.gmra.mxu3 %vm920_vm9, %v2001_v1 }
 0x4ea   : > { %2450 = vmatpush.msra.mxu3 %v10607_v2 }
 0x4ec   : > { %v2070_v4 = vpop.f32.mrf.mxu2  ;;  %v2139_v20 = vpop.f32.mrf.mxu1  ;;  %2451 = vmatpush.msra.mxu3 %v10608_v45 }
 0x4ed   : > { %10133 = vmatmul.msk.f32.vlgmr.msrb.gmra.mxu2 %vm920_vm9, %v2070_v4  ;;  %v2116_v6 = vpop.f32.mrf.mxu0  ;;  %10139 = vmatmul.msk.f32.vlgmr.msra.gmra.mxu1 %vm920_vm9, %v2139_v20 }
 0x4ee   : > { %10137 = vmatmul.msk.f32.vlgmr.msra.gmra.mxu0 %vm920_vm9, %v2116_v6 }
 0x4f0   : > { %v2093_v41 = vpop.f32.mrf.mxu3 }
 0x4f1   : > { %10135 = vmatmul.msk.f32.vlgmr.msrb.gmra.mxu3 %vm920_vm9, %v2093_v41 }
 0x4f4   : > { %v2162_v16 = vpop.f32.mrf.mxu2 }
 0x4f5   : > { %10141 = vmatmul.msk.f32.vlgmr.msra.gmra.mxu2 %vm920_vm9, %v2162_v16 }
 0x4f9   : > { %10142 = vmatmul.msk.f32.vlgmr.msra.gmra.mxu3 %vm554_vm7, %v11274_v7 }
 0x562   : > { %v2231_v39 = vpop.f32.mrf.mxu1  ;;  %v2208_v38 = vpop.f32.mrf.mxu0 }
 0x563   : > { %v2349_v44 = vrot.slane %v2231_v39, 4 }
 0x56a   : > { %v2323_v17 = vpop.f32.mrf.mxu1 }
 0x56b   : > { %v2361_v18 = vrot.slane %v2323_v17, 4  ;;  %v2300_v42 = vpop.f32.mrf.mxu0 }
 0x56c   : > { %v2185_v8 = vpop.f32.mrf.mxu3 }
 0x56d   : > { %v2350_v48 = vsel %vm600_vm8, %v2349_v44, %v2185_v8 }
 0x56e   : > { %v11290_v15 = vperm.slane %v2350_v48, %v10804_v33 }
 0x570   : > { %v2254_v54 = vpop.f32.mrf.mxu2 }
 0x571   : > { %v2355_v43 = vrot.slane %v2254_v54, 4 }
 0x573   : > { %v2356_v31 = vsel %vm600_vm8, %v2355_v43, %v2208_v38 }
 0x574   : > { %v2277_v11 = vpop.f32.mrf.mxu3  ;;  %v11280_v28 = vperm.slane %v2356_v31, %v10804_v33 }
 0x575   : > { %v2362_v52 = vsel %vm600_vm8, %v2361_v18, %v2277_v11 }
 0x576   : > { %v2373_v49 = vrot.slane %v11280_v28, 4  ;;  %v11293_v2 = vperm.slane %v2362_v52, %v10804_v33 }
 0x578   : > { %v2346_v25 = vpop.f32.mrf.mxu2  ;;  %v2374_v4 = vsel %vm600_vm8, %v2373_v49, %v11290_v15 }
 0x579   : > { %v2367_v47 = vrot.slane %v2346_v25, 4  ;;  %v11307_v24 = vperm.slane %v2374_v4, %v10817_v58 }
 0x57b   : > { %v2368_v37 = vsel %vm600_vm8, %v2367_v47, %v2300_v42  ;;  %13460 = vst [vmem:[#allocation6_spill] sm:$0xff] %v11307_v24 }
 0x57c   : > { %v11287_v32 = vperm.slane %v2368_v37, %v10804_v33  ;;  %v2453_v1 = vpop.f32.mrf.mxu3 }
 0x57d   : > { %2469 = vrot.lane.b32.xlu2 %v2453_v1, %s10663_s25  ;;  %2463 = vrot.lane.b32.xlu1 %v2453_v1, %s10667_s29  ;;  %v2480_v8 = vrot.slane %v2453_v1, 4 }
 0x57e   : > { %v2385_v3 = vrot.slane %v11287_v32, 4  ;;  %2475 = vrot.lane.b32.xlu0 %v2453_v1, %s10664_s26 }
 0x580   : > { %v2386_v20 = vsel %vm600_vm8, %v2385_v3, %v11293_v2 }
 0x581   : > { %v11304_v45 = vperm.slane %v2386_v20, %v10817_v58 }
 0x583   : > { %13459 = vst [vmem:[#allocation5_spill] sm:$0xff] %v11304_v45  ;;  %v2397_v6 = vrot.slane %v11304_v45, 4 }
 0x585   : > { %v11312_v30 = vsel %vm600_vm8, %v2397_v6, %v11307_v24  ;;  %2460 = vrot.lane.b32.xlu2 %v2453_v1, %s10665_s27  ;;  %2457 = vrot.lane.b32.xlu1 %v2453_v1, %s10662_s24 }
 0x586   : > { %13461 = vst [vmem:[#allocation7_spill] sm:$0xff] %v11312_v30  ;;  %2472 = vrot.lane.b32.xlu0 %v2453_v1, %s10666_s28 }
 0x58e   : > { %2466 = vrot.lane.b32.xlu0 %v2453_v1, %s10668_s30 }
 0x5d7   : > { %v2470_v5 = vpop.permute.xlu2 %2469 }
 0x5d8   : > { %v2516_v42 = vrot.slane %v2470_v5, 4 }
 0x5df   : > { %v2461_v41 = vpop.permute.xlu2 %2460 }
 0x5e0   : > { %v2478_v16 = vrot.slane %v2461_v41, 4  ;;  %v2481_v44 = vsel %vm600_vm8, %v2461_v41, %v2480_v8 }
 0x5e1   : > { %v2489_v37 = vperm.slane %v2481_v44, %v10804_v33 }
 0x5e2   : > { %v2479_v34 = vsel %vm600_vm8, %v2478_v16, %v2453_v1 }
 0x5e3   : > { %v2485_v43 = vperm.slane %v2479_v34, %v10804_v33  ;;  %v2540_v16 = vrot.slane %v2489_v37, 4 }
 0x5e5   : > { %v2528_v49 = vrot.slane %v2485_v43, 4 }
 0x5ef   : > { %v2464_v46 = vpop.permute.xlu1 %2463 }
 0x5f0   : > { %v2476_v29 = vpop.permute.xlu0 %2475  ;;  %v2490_v39 = vrot.slane %v2464_v46, 4 }
 0x5f1   : > { %v2514_v38 = vrot.slane %v2476_v29, 4  ;;  %v2517_v1 = vsel %vm600_vm8, %v2476_v29, %v2516_v42 }
 0x5f3   : > { %v2515_v47 = vsel %vm600_vm8, %v2514_v38, %v2470_v5  ;;  %v2525_v5 = vperm.slane %v2517_v1, %v10804_v33 }
 0x5f4   : > { %v2521_v4 = vperm.slane %v2515_v47, %v10804_v33 }
 0x5f7   : > { %v2458_v54 = vpop.permute.xlu1 %2457 }
 0x5f8   : > { %v2491_v17 = vsel %vm600_vm8, %v2490_v39, %v2458_v54  ;;  %v2492_v31 = vrot.slane %v2458_v54, 4  ;;  %v2473_v11 = vpop.permute.xlu0 %2472  ;;  %v2550_v54 = vrot.slane %v2521_v4, 4 }
 0x5f9   : > { %v2497_v18 = vperm.slane %v2491_v17, %v10804_v33  ;;  %v2502_v41 = vrot.slane %v2473_v11, 4 }
 0x5fa   : > { %v2493_v25 = vsel %vm600_vm8, %v2464_v46, %v2492_v31 }
 0x5fb   : > { %v2501_v48 = vperm.slane %v2493_v25, %v10804_v33  ;;  %v2526_v52 = vrot.slane %v2497_v18, 4  ;;  %v2529_v6 = vsel %vm600_vm8, %v2497_v18, %v2528_v49  ;;  %v2562_v18 = vrot.slane %v2525_v5, 4 }
 0x5fc   : > { %v2537_v8 = vperm.slane %v2529_v6, %v10817_v58 }
 0x5fd   : > { %v2538_v3 = vrot.slane %v2501_v48, 4  ;;  %v2527_v20 = vsel %vm600_vm8, %v2526_v52, %v2485_v43  ;;  %v2541_v17 = vsel %vm600_vm8, %v2501_v48, %v2540_v16 }
 0x5fe   : > { %v2533_v39 = vperm.slane %v2527_v20, %v10817_v58  ;;  %v2580_v49 = vrot.slane %v2537_v8, 4  ;;  %v2549_v1 = vperm.slane %v2541_v17, %v10817_v58 }
 0x5ff   : > { %v2539_v46 = vsel %vm600_vm8, %v2538_v3, %v2489_v37 }
 0x600   : > { %v2467_v34 = vpop.permute.xlu0 %2466  ;;  %v2545_v31 = vperm.slane %v2539_v46, %v10817_v58  ;;  %v2576_v37 = vrot.slane %v2533_v39, 4 }
 0x601   : > { %v2503_v29 = vsel %vm600_vm8, %v2502_v41, %v2467_v34  ;;  %v2504_v38 = vrot.slane %v2467_v34, 4 }
 0x602   : > { %v2509_v43 = vperm.slane %v2503_v29, %v10804_v33  ;;  %v2584_v6 = vrot.slane %v2545_v31, 4 }
 0x603   : > { %v2505_v44 = vsel %vm600_vm8, %v2473_v11, %v2504_v38 }
 0x604   : > { %v2513_v25 = vperm.slane %v2505_v44, %v10804_v33  ;;  %v2551_v42 = vsel %vm600_vm8, %v2550_v54, %v2509_v43  ;;  %v2552_v47 = vrot.slane %v2509_v43, 4  ;;  %v2588_v44 = vrot.slane %v2549_v1, 4 }
 0x605   : > { %v2557_v52 = vperm.slane %v2551_v42, %v10817_v58  ;;  %v11363_v42 = vld [vmem:[%s10844_s15 + $0x4] sm:$0xf] }
 0x606   : > { %v2553_v48 = vsel %vm600_vm8, %v2521_v4, %v2552_v47  ;;  %v2564_v3 = vrot.slane %v2513_v25, 4  ;;  %v2563_v20 = vsel %vm600_vm8, %v2562_v18, %v2513_v25  ;;  %v11370_v47 = vld [vmem:[%s10844_s15] sm:$0xf] }
 0x607   : > { %v2577_v11 = vsel %vm600_vm8, %v2557_v52, %v2576_v37  ;;  %v2574_v41 = vrot.slane %v2557_v52, 4  ;;  %v2561_v46 = vperm.slane %v2553_v48, %v10817_v58  ;;  %v2569_v16 = vperm.slane %v2563_v20, %v10817_v58  ;;  %v11382_v52 = vld [vmem:[%s10856_s18] sm:$0xf] }
 0x608   : > { %10145 = vmatpush.xpose.msk.msrb.mxu1 %vm554_vm7, %v2577_v11  ;;  %v2565_v34 = vsel %vm600_vm8, %v2525_v5, %v2564_v3 }
 0x609   : > { %v2575_v29 = vsel %vm600_vm8, %v2574_v41, %v2533_v39  ;;  %v2581_v4 = vsel %vm600_vm8, %v2561_v46, %v2580_v49  ;;  %v2585_v38 = vsel %vm600_vm8, %v2569_v16, %v2584_v6  ;;  %v2578_v54 = vrot.slane %v2561_v46, 4 }
 0x60a   : > { %10143 = vmatpush.xpose.msk.msrb.mxu0 %vm554_vm7, %v2575_v29  ;;  %10149 = vmatpush.xpose.msk.msrb.mxu3 %vm554_vm7, %v2581_v4  ;;  %v2582_v17 = vrot.slane %v2569_v16, 4  ;;  %v2573_v43 = vperm.slane %v2565_v34, %v10817_v58 }
 0x60b   : > { %v2579_v5 = vsel %vm600_vm8, %v2578_v54, %v2537_v8  ;;  %10146 = vmatmul.msk.f32.vlgmr.msrb.gmra.mxu1 %vm554_vm7, %v11363_v42  ;;  %v11375_v8 = vld [vmem:[%s10844_s15 + $0xc] sm:$0xf] }
 0x60c   : > { %10153 = vmatpush.xpose.msk.msra.mxu1 %vm554_vm7, %v2585_v38  ;;  %10147 = vmatpush.xpose.msk.msrb.mxu2 %vm554_vm7, %v2579_v5  ;;  %v2583_v39 = vsel %vm600_vm8, %v2582_v17, %v2545_v31  ;;  %v2589_v18 = vsel %vm600_vm8, %v2573_v43, %v2588_v44  ;;  %v2586_v25 = vrot.slane %v2573_v43, 4 }
 0x60d   : > { %10144 = vmatmul.msk.f32.vlgmr.msrb.gmra.mxu0 %vm554_vm7, %v11370_v47  ;;  %10150 = vmatmul.msk.f32.vlgmr.msrb.gmra.mxu3 %vm554_vm7, %v11375_v8 }
 0x60e   : > { %10151 = vmatpush.xpose.msk.msra.mxu0 %vm554_vm7, %v2583_v39  ;;  %10157 = vmatpush.xpose.msk.msra.mxu3 %vm554_vm7, %v2589_v18  ;;  %v2587_v31 = vsel %vm600_vm8, %v2586_v25, %v2549_v1 }
 0x60f   : > { %10148 = vmatmul.msk.f32.vlgmr.msrb.gmra.mxu2 %vm554_vm7, %v10880_v53 }
 0x610   : > { %10155 = vmatpush.xpose.msk.msra.mxu2 %vm554_vm7, %v2587_v31  ;;  %10161 = vmatpush.xpose.msk.msrb.mxu1 %vm920_vm9, %v10913_v60 }
 0x612   : > { %10159 = vmatpush.xpose.msk.msrb.mxu0 %vm920_vm9, %v11382_v52  ;;  %10165 = vmatpush.xpose.msk.msrb.mxu3 %vm920_vm9, %v10928_v63 }
 0x613   : > { %10154 = vmatmul.msk.f32.vlgmr.msra.gmra.mxu1 %vm554_vm7, %v10893_v55  ;;  %v11413_v55 = vld [vmem:[%s13407_s7 + $0x18] sm:$0xff] }
 0x614   : > { %10163 = vmatpush.xpose.msk.msrb.mxu2 %vm920_vm9, %v10916_v61  ;;  %10169 = vmatpush.xpose.msk.msra.mxu1 %vm920_vm9, %v10931_v9 }
 0x615   : > { %10152 = vmatmul.msk.f32.vlgmr.msra.gmra.mxu0 %vm554_vm7, %v10896_v56  ;;  %10158 = vmatmul.msk.f32.vlgmr.msra.gmra.mxu3 %vm554_vm7, %v10899_v57  ;;  %v11420_v57 = vld [vmem:[%s13407_s7 + $0x10] sm:$0xff] }
 0x616   : > { %10167 = vmatpush.xpose.msk.msra.mxu0 %vm920_vm9, %v10919_v62  ;;  %10173 = vmatpush.xpose.msk.msra.mxu3 %vm920_vm9, %v10943_v12 }
 0x617   : > { %10156 = vmatmul.msk.f32.vlgmr.msra.gmra.mxu2 %vm554_vm7, %v10904_v59 }
 0x618   : > { %10171 = vmatpush.xpose.msk.msra.mxu2 %vm920_vm9, %v10934_v10 }
 0x688   : > { %v2633_v53 = vpop.f32.mrf.mxu1 }
 0x689   : > { %10162 = vmatmul.msk.f32.vlgmr.msrb.gmra.mxu1 %vm920_vm9, %v2633_v53 }
 0x68a   : > { %v2610_v56 = vpop.f32.mrf.mxu0 }
 0x68b   : > { %10160 = vmatmul.msk.f32.vlgmr.msrb.gmra.mxu0 %vm920_vm9, %v2610_v56 }
 0x68c   : > { %3063 = vmatpush.msrb.mxu0 %v11413_v55 }
 0x68e   : > { %3064 = vmatpush.msrb.mxu0 %v11420_v57 }
 0x690   : > { %v2679_v59 = vpop.f32.mrf.mxu3  ;;  %v2725_v60 = vpop.f32.mrf.mxu1 }
 0x691   : > { %10166 = vmatmul.msk.f32.vlgmr.msrb.gmra.mxu3 %vm920_vm9, %v2679_v59  ;;  %10170 = vmatmul.msk.f32.vlgmr.msra.gmra.mxu1 %vm920_vm9, %v2725_v60 }
 0x692   : > { %v2656_v61 = vpop.f32.mrf.mxu2  ;;  %v2702_v62 = vpop.f32.mrf.mxu0 }
 0x693   : > { %10164 = vmatmul.msk.f32.vlgmr.msrb.gmra.mxu2 %vm920_vm9, %v2656_v61  ;;  %10168 = vmatmul.msk.f32.vlgmr.msra.gmra.mxu0 %vm920_vm9, %v2702_v62 }
 0x698   : > { %v2771_v63 = vpop.f32.mrf.mxu3 }
 0x699   : > { %10174 = vmatmul.msk.f32.vlgmr.msra.gmra.mxu3 %vm920_vm9, %v2771_v63 }
 0x69a   : > { %v2748_v9 = vpop.f32.mrf.mxu2 }
 0x69b   : > { %10172 = vmatmul.msk.f32.vlgmr.msra.gmra.mxu2 %vm920_vm9, %v2748_v9  ;;  %10177 = vmatmul.msk.f32.vlgmr.msrb.gmra.mxu0 %vm554_vm7, %v10792_v23 }
 0x706   : > { %v2817_v37 = vpop.f32.mrf.mxu1 }
 0x708   : > { %v2794_v10 = vpop.f32.mrf.mxu0 }
 0x70e   : > { %v2909_v41 = vpop.f32.mrf.mxu1 }
 0x710   : > { %v2886_v12 = vpop.f32.mrf.mxu0 }
 0x714   : > { %v2863_v49 = vpop.f32.mrf.mxu3 }
 0x715   : > { %v2964_v1 = vrot.slane %v2863_v49, 4 }
 0x716   : > { %v2840_v48 = vpop.f32.mrf.mxu2 }
 0x717   : > { %v2965_v20 = vsel %vm600_vm8, %v2964_v1, %v2817_v37  ;;  %v2958_v6 = vrot.slane %v2840_v48, 4 }
 0x718   : > { %v3066_v3 = vpop.f32.mrf.mxu0  ;;  %v11437_v11 = vperm.slane %v2965_v20, %v10804_v33 }
 0x719   : > { %3082 = vrot.lane.b32.xlu0 %v3066_v3, %s10663_s25  ;;  %3076 = vrot.lane.b32.xlu2 %v3066_v3, %s10667_s29  ;;  %v2959_v46 = vsel %vm600_vm8, %v2958_v6, %v2794_v10  ;;  %v3093_v37 = vrot.slane %v3066_v3, 4 }
 0x71a   : > { %3088 = vrot.lane.b32.xlu1 %v3066_v3, %s10664_s26  ;;  %13462 = vst [vmem:[#allocation8_spill] sm:$0xff] %v11437_v11  ;;  %v2982_v38 = vrot.slane %v11437_v11, 4  ;;  %v11443_v54 = vperm.slane %v2959_v46, %v10804_v33 }
 0x71c   : > { %v2955_v23 = vpop.f32.mrf.mxu3  ;;  %13463 = vst [vmem:[#allocation9_spill] sm:$0xff] %v11443_v54  ;;  %v2983_v39 = vsel %vm600_vm8, %v2982_v38, %v11443_v54 }
 0x71d   : > { %v2976_v16 = vrot.slane %v2955_v23, 4  ;;  %v11464_v31 = vperm.slane %v2983_v39, %v10817_v58 }
 0x71e   : > { %v2932_v34 = vpop.f32.mrf.mxu2 }
 0x71f   : > { %v2977_v29 = vsel %vm600_vm8, %v2976_v16, %v2909_v41  ;;  %v2970_v4 = vrot.slane %v2932_v34, 4  ;;  %13467 = vst [vmem:[#allocation13_spill] sm:$0xff] %v11464_v31 }
 0x720   : > { %v11446_v17 = vperm.slane %v2977_v29, %v10804_v33 }
 0x721   : > { %v2971_v43 = vsel %vm600_vm8, %v2970_v4, %v2886_v12  ;;  %3073 = vrot.lane.b32.xlu0 %v3066_v3, %s10665_s27  ;;  %3070 = vrot.lane.b32.xlu2 %v3066_v3, %s10662_s24 }
 0x722   : > { %13464 = vst [vmem:[#allocation10_spill] sm:$0xff] %v11446_v17  ;;  %v2994_v44 = vrot.slane %v11446_v17, 4  ;;  %v11453_v5 = vperm.slane %v2971_v43, %v10804_v33  ;;  %3085 = vrot.lane.b32.xlu1 %v3066_v3, %s10666_s28 }
 0x724   : > { %13465 = vst [vmem:[#allocation11_spill] sm:$0xff] %v11453_v5  ;;  %v2995_v18 = vsel %vm600_vm8, %v2994_v44, %v11453_v5 }
 0x725   : > { %v11461_v25 = vperm.slane %v2995_v18, %v10817_v58 }
 0x727   : > { %13466 = vst [vmem:[#allocation12_spill] sm:$0xff] %v11461_v25  ;;  %v3006_v53 = vrot.slane %v11461_v25, 4 }
 0x729   : > { %v11469_v56 = vsel %vm600_vm8, %v3006_v53, %v11464_v31 }
 0x72a   : > { %13468 = vst [vmem:[#allocation14_spill] sm:$0xff] %v11469_v56  ;;  %3079 = vrot.lane.b32.xlu1 %v3066_v3, %s10668_s30 }
 0x773   : > { %v3077_v59 = vpop.permute.xlu2 %3076 }
 0x774   : > { %v3103_v9 = vrot.slane %v3077_v59, 4 }
 0x77b   : > { %v3071_v60 = vpop.permute.xlu2 %3070 }
 0x77c   : > { %v3105_v63 = vrot.slane %v3071_v60, 4  ;;  %v3104_v10 = vsel %vm600_vm8, %v3103_v9, %v3071_v60 }
 0x77d   : > { %v3110_v48 = vperm.slane %v3104_v10, %v10804_v33 }
 0x77e   : > { %v3106_v12 = vsel %vm600_vm8, %v3077_v59, %v3105_v63 }
 0x77f   : > { %v3114_v20 = vperm.slane %v3106_v12, %v10804_v33  ;;  %v3139_v38 = vrot.slane %v3110_v48, 4 }
 0x781   : > { %v3151_v43 = vrot.slane %v3114_v20, 4 }
 0x78b   : > { %v3083_v61 = vpop.permute.xlu0 %3082 }
 0x78c   : > { %v3089_v62 = vpop.permute.xlu1 %3088  ;;  %v3129_v46 = vrot.slane %v3083_v61, 4 }
 0x78d   : > { %v3127_v49 = vrot.slane %v3089_v62, 4 }
 0x78e   : > { %v3130_v44 = vsel %vm600_vm8, %v3089_v62, %v3129_v46 }
 0x78f   : > { %v3128_v29 = vsel %vm600_vm8, %v3127_v49, %v3083_v61  ;;  %v3138_v9 = vperm.slane %v3130_v44, %v10804_v33 }
 0x790   : > { %v3134_v18 = vperm.slane %v3128_v29, %v10804_v33 }
 0x792   : > { %v3163_v49 = vrot.slane %v3134_v18, 4 }
 0x793   : > { %v3074_v1 = vpop.permute.xlu0 %3073 }
 0x794   : > { %v3091_v6 = vrot.slane %v3074_v1, 4  ;;  %v3094_v23 = vsel %vm600_vm8, %v3074_v1, %v3093_v37  ;;  %v3086_v41 = vpop.permute.xlu1 %3085 }
 0x795   : > { %v3102_v34 = vperm.slane %v3094_v23, %v10804_v33  ;;  %v3115_v63 = vrot.slane %v3086_v41, 4 }
 0x796   : > { %v3092_v16 = vsel %vm600_vm8, %v3091_v6, %v3066_v3 }
 0x797   : > { %v3098_v4 = vperm.slane %v3092_v16, %v10804_v33  ;;  %v3152_v59 = vsel %vm600_vm8, %v3151_v43, %v3102_v34  ;;  %v3153_v60 = vrot.slane %v3102_v34, 4 }
 0x798   : > { %v3158_v10 = vperm.slane %v3152_v59, %v10817_v58 }
 0x799   : > { %v3141_v39 = vrot.slane %v3098_v4, 4  ;;  %v3140_v53 = vsel %vm600_vm8, %v3139_v38, %v3098_v4  ;;  %v3154_v1 = vsel %vm600_vm8, %v3114_v20, %v3153_v60 }
 0x79a   : > { %v3146_v62 = vperm.slane %v3140_v53, %v10817_v58  ;;  %v3162_v4 = vperm.slane %v3154_v1, %v10817_v58  ;;  %v3197_v44 = vrot.slane %v3158_v10, 4 }
 0x79b   : > { %v3142_v3 = vsel %vm600_vm8, %v3110_v48, %v3141_v39  ;;  %v3175_v48 = vrot.slane %v3138_v9, 4 }
 0x79c   : > { %v3080_v61 = vpop.permute.xlu1 %3079  ;;  %v3150_v23 = vperm.slane %v3142_v3, %v10817_v58  ;;  %v3189_v43 = vrot.slane %v3146_v62, 4 }
 0x79d   : > { %v3116_v12 = vsel %vm600_vm8, %v3115_v63, %v3080_v61  ;;  %v3117_v37 = vrot.slane %v3080_v61, 4 }
 0x79e   : > { %v3122_v6 = vperm.slane %v3116_v12, %v10804_v33  ;;  %v3193_v53 = vrot.slane %v3150_v23, 4 }
 0x79f   : > { %v3118_v46 = vsel %vm600_vm8, %v3086_v41, %v3117_v37 }
 0x7a0   : > { %v3126_v16 = vperm.slane %v3118_v46, %v10804_v33  ;;  %v3164_v34 = vsel %vm600_vm8, %v3163_v49, %v3122_v6  ;;  %v3165_v29 = vrot.slane %v3122_v6, 4  ;;  %v3201_v46 = vrot.slane %v3162_v4, 4 }
 0x7a1   : > { %v3170_v38 = vperm.slane %v3164_v34, %v10817_v58  ;;  %v11534_v34 = vld [vmem:[%s10856_s18 + $0x4] sm:$0xf] }
 0x7a2   : > { %v3166_v20 = vsel %vm600_vm8, %v3134_v18, %v3165_v29  ;;  %v3177_v39 = vrot.slane %v3126_v16, 4  ;;  %v3176_v59 = vsel %vm600_vm8, %v3175_v48, %v3126_v16  ;;  %v11539_v29 = vld [vmem:[%s10856_s18 + $0x8] sm:$0xf] }
 0x7a3   : > { %v3190_v41 = vsel %vm600_vm8, %v3170_v38, %v3189_v43  ;;  %v3187_v60 = vrot.slane %v3170_v38, 4  ;;  %v3174_v63 = vperm.slane %v3166_v20, %v10817_v58  ;;  %v3182_v3 = vperm.slane %v3176_v59, %v10817_v58  ;;  %v11549_v38 = vld [vmem:[%s10844_s15 + $0x14] sm:$0xf]  ;;  %v11564_v20 = vld [vmem:[%s10844_s15 + $0x1c] sm:$0xf] }
 0x7a4   : > { %10180 = vmatpush.xpose.msk.msrb.mxu2 %vm554_vm7, %v3190_v41  ;;  %v3178_v61 = vsel %vm600_vm8, %v3138_v9, %v3177_v39  ;;  %v11554_v43 = vld [vmem:[%s10856_s18 + $0x14] sm:$0xf]  ;;  %v11569_v39 = vld [vmem:[%s10856_s18 + $0x10] sm:$0xf]  ;;  %v11579_v59 = vld [vmem:[%s10844_s15 + $0x18] sm:$0xf] }
 0x7a5   : > { %v3188_v12 = vsel %vm600_vm8, %v3187_v60, %v3146_v62  ;;  %v3194_v37 = vsel %vm600_vm8, %v3174_v63, %v3193_v53  ;;  %v3198_v18 = vsel %vm600_vm8, %v3182_v3, %v3197_v44  ;;  %v3191_v49 = vrot.slane %v3174_v63, 4  ;;  %v11559_v44 = vld [vmem:[%s10844_s15 + $0x10] sm:$0xf]  ;;  %v11574_v53 = vld [vmem:[%s10856_s18 + $0x1c] sm:$0xf] }
 0x7a6   : > { %10178 = vmatpush.xpose.msk.msrb.mxu1 %vm554_vm7, %v3188_v12  ;;  %10184 = vmatpush.xpose.msk.msra.mxu0 %vm554_vm7, %v3194_v37  ;;  %v3195_v1 = vrot.slane %v3182_v3, 4  ;;  %v3186_v6 = vperm.slane %v3178_v61, %v10817_v58  ;;  %v11584_v41 = vld [vmem:[%s10856_s18 + $0x18] sm:$0xf] }
 0x7a7   : > { %v3192_v9 = vsel %vm600_vm8, %v3191_v49, %v3150_v23  ;;  %10181 = vmatmul.msk.f32.vlgmr.msrb.gmra.mxu2 %vm554_vm7, %v11363_v42 }
 0x7a8   : > { %10188 = vmatpush.xpose.msk.msra.mxu2 %vm554_vm7, %v3198_v18  ;;  %10182 = vmatpush.xpose.msk.msrb.mxu3 %vm554_vm7, %v3192_v9  ;;  %v3196_v62 = vsel %vm600_vm8, %v3195_v1, %v3158_v10  ;;  %v3202_v48 = vsel %vm600_vm8, %v3186_v6, %v3201_v46  ;;  %v3199_v16 = vrot.slane %v3186_v6, 4  ;;  %v11529_v10 = vld [vmem:[%s10844_s15 + $0x8] sm:$0xf] }
 0x7a9   : > { %10179 = vmatmul.msk.f32.vlgmr.msrb.gmra.mxu1 %vm554_vm7, %v11370_v47  ;;  %10185 = vmatmul.msk.f32.vlgmr.msra.gmra.mxu0 %vm554_vm7, %v11375_v8 }
 0x7aa   : > { %10186 = vmatpush.xpose.msk.msra.mxu1 %vm554_vm7, %v3196_v62  ;;  %10192 = vmatpush.xpose.msk.msrb.mxu0 %vm554_vm7, %v3202_v48  ;;  %v3200_v23 = vsel %vm600_vm8, %v3199_v16, %v3162_v4  ;;  %v11544_v4 = vld [vmem:[%s10856_s18 + $0xc] sm:$0xf] }
 0x7ab   : > { %10183 = vmatmul.msk.f32.vlgmr.msrb.gmra.mxu3 %vm554_vm7, %v11529_v10 }
 0x7ac   : > { %10190 = vmatpush.xpose.msk.msra.mxu3 %vm554_vm7, %v3200_v23  ;;  %10196 = vmatpush.xpose.msk.msrb.mxu2 %vm920_vm9, %v11534_v34 }
 0x7ae   : > { %10194 = vmatpush.xpose.msk.msrb.mxu1 %vm920_vm9, %v11382_v52  ;;  %10200 = vmatpush.xpose.msk.msra.mxu0 %vm920_vm9, %v11544_v4 }
 0x7af   : > { %10189 = vmatmul.msk.f32.vlgmr.msra.gmra.mxu2 %vm554_vm7, %v11549_v38 }
 0x7b0   : > { %10198 = vmatpush.xpose.msk.msrb.mxu3 %vm920_vm9, %v11539_v29  ;;  %10204 = vmatpush.xpose.msk.msra.mxu2 %vm920_vm9, %v11554_v43 }
 0x7b1   : > { %10187 = vmatmul.msk.f32.vlgmr.msra.gmra.mxu1 %vm554_vm7, %v11559_v44  ;;  %10193 = vmatmul.msk.f32.vlgmr.msrb.gmra.mxu0 %vm554_vm7, %v11564_v20 }
 0x7b2   : > { %10202 = vmatpush.xpose.msk.msra.mxu1 %vm920_vm9, %v11569_v39  ;;  %10208 = vmatpush.xpose.msk.msrb.mxu0 %vm920_vm9, %v11574_v53 }
 0x7b3   : > { %10191 = vmatmul.msk.f32.vlgmr.msra.gmra.mxu3 %vm554_vm7, %v11579_v59 }
 0x7b4   : > { %10206 = vmatpush.xpose.msk.msra.mxu3 %vm920_vm9, %v11584_v41 }
 0x826   : > { %v3223_v60 = vpop.f32.mrf.mxu1  ;;  %v3292_v63 = vpop.f32.mrf.mxu0 }
 0x827   : > { %10195 = vmatmul.msk.f32.vlgmr.msrb.gmra.mxu1 %vm920_vm9, %v3223_v60  ;;  %10201 = vmatmul.msk.f32.vlgmr.msra.gmra.mxu0 %vm920_vm9, %v3292_v63 }
 0x828   : > { %3656 = vmatpush.msrb.mxu1 %v11413_v55 }
 0x82a   : > { %v3246_v3 = vpop.f32.mrf.mxu2  ;;  %3657 = vmatpush.msrb.mxu1 %v11420_v57 }
 0x82b   : > { %10197 = vmatmul.msk.f32.vlgmr.msrb.gmra.mxu2 %vm920_vm9, %v3246_v3 }
 0x82e   : > { %v3269_v61 = vpop.f32.mrf.mxu3  ;;  %v3315_v12 = vpop.f32.mrf.mxu1 }
 0x82f   : > { %10199 = vmatmul.msk.f32.vlgmr.msrb.gmra.mxu3 %vm920_vm9, %v3269_v61  ;;  %10203 = vmatmul.msk.f32.vlgmr.msra.gmra.mxu1 %vm920_vm9, %v3315_v12  ;;  %v3384_v37 = vpop.f32.mrf.mxu0 }
 0x830   : > { %10209 = vmatmul.msk.f32.vlgmr.msrb.gmra.mxu0 %vm920_vm9, %v3384_v37 }
 0x832   : > { %v3338_v18 = vpop.f32.mrf.mxu2 }
 0x833   : > { %10205 = vmatmul.msk.f32.vlgmr.msra.gmra.mxu2 %vm920_vm9, %v3338_v18 }
 0x836   : > { %v3361_v49 = vpop.f32.mrf.mxu3 }
 0x837   : > { %10207 = vmatmul.msk.f32.vlgmr.msra.gmra.mxu3 %vm920_vm9, %v3361_v49  ;;  %10210 = vmatmul.msk.f32.vlgmr.msrb.gmra.mxu1 %vm554_vm7, %v10971_v35 }
 0x8a4   : > { %v3407_v1 = vpop.f32.mrf.mxu1  ;;  %v3476_v6 = vpop.f32.mrf.mxu0 }
 0x8a5   : > { %v3577_v48 = vrot.slane %v3476_v6, 4 }
 0x8ac   : > { %v3499_v46 = vpop.f32.mrf.mxu1 }
 0x8ad   : > { %v3568_v62 = vpop.f32.mrf.mxu0 }
 0x8ae   : > { %v3430_v9 = vpop.f32.mrf.mxu2  ;;  %v3589_v23 = vrot.slane %v3568_v62, 4 }
 0x8af   : > { %v3578_v63 = vsel %vm600_vm8, %v3577_v48, %v3430_v9 }
 0x8b0   : > { %v11611_v12 = vperm.slane %v3578_v63, %v10804_v33 }
 0x8b2   : > { %v3453_v16 = vpop.f32.mrf.mxu3  ;;  %13469 = vst [vmem:[#allocation15_spill] sm:$0xff] %v11611_v12  ;;  %v3595_v9 = vrot.slane %v11611_v12, 4 }
 0x8b3   : > { %v3571_v3 = vrot.slane %v3453_v16, 4 }
 0x8b4   : > { %v11600_v60 = vpop.f32.mrf.mxu1 }
 0x8b5   : > { %3675 = vrot.lane.b32.xlu1 %v11600_v60, %s10663_s25  ;;  %3669 = vrot.lane.b32.xlu0 %v11600_v60, %s10667_s29  ;;  %v3572_v18 = vsel %vm600_vm8, %v3571_v3, %v3407_v1 }
 0x8b6   : > { %3681 = vrot.lane.b32.xlu2 %v11600_v60, %s10664_s26  ;;  %v3522_v35 = vpop.f32.mrf.mxu2  ;;  %v11619_v62 = vperm.slane %v3572_v18, %v10804_v33 }
 0x8b7   : > { %v3590_v61 = vsel %vm600_vm8, %v3589_v23, %v3522_v35 }
 0x8b8   : > { %v11614_v37 = vperm.slane %v3590_v61, %v10804_v33  ;;  %13471 = vst [vmem:[#allocation17_spill] sm:$0xff] %v11619_v62  ;;  %v3596_v1 = vsel %vm600_vm8, %v3595_v9, %v11619_v62 }
 0x8b9   : > { %v11640_v3 = vperm.slane %v3596_v1, %v10817_v58 }
 0x8ba   : > { %13470 = vst [vmem:[#allocation16_spill] sm:$0xff] %v11614_v37  ;;  %v3545_v49 = vpop.f32.mrf.mxu3  ;;  %v3607_v48 = vrot.slane %v11614_v37, 4 }
 0x8bb   : > { %v3583_v6 = vrot.slane %v3545_v49, 4  ;;  %13474 = vst [vmem:[#allocation20_spill] sm:$0xff] %v11640_v3 }
 0x8bd   : > { %v3584_v16 = vsel %vm600_vm8, %v3583_v6, %v3499_v46  ;;  %3666 = vrot.lane.b32.xlu1 %v11600_v60, %s10665_s27  ;;  %3663 = vrot.lane.b32.xlu0 %v11600_v60, %s10662_s24 }
 0x8be   : > { %v11628_v23 = vperm.slane %v3584_v16, %v10804_v33  ;;  %3678 = vrot.lane.b32.xlu2 %v11600_v60, %s10666_s28 }
 0x8c0   : > { %13472 = vst [vmem:[#allocation18_spill] sm:$0xff] %v11628_v23  ;;  %v3608_v63 = vsel %vm600_vm8, %v3607_v48, %v11628_v23 }
 0x8c1   : > { %v11637_v46 = vperm.slane %v3608_v63, %v10817_v58 }
 0x8c3   : > { %13473 = vst [vmem:[#allocation19_spill] sm:$0xff] %v11637_v46  ;;  %v3619_v35 = vrot.slane %v11637_v46, 4 }
 0x8c5   : > { %v11645_v61 = vsel %vm600_vm8, %v3619_v35, %v11640_v3 }
 0x8c6   : > { %13475 = vst [vmem:[#allocation21_spill] sm:$0xff] %v11645_v61  ;;  %3672 = vrot.lane.b32.xlu2 %v11600_v60, %s10668_s30 }
 0x910   : > { %v3682_v18 = vpop.permute.xlu2 %3681 }
 0x911   : > { %v3720_v63 = vrot.slane %v3682_v18, 4 }
 0x918   : > { %v3679_v49 = vpop.permute.xlu2 %3678 }
 0x919   : > { %v3708_v9 = vrot.slane %v3679_v49, 4 }
 0x920   : > { %v3673_v6 = vpop.permute.xlu2 %3672 }
 0x921   : > { %v3710_v48 = vrot.slane %v3673_v6, 4  ;;  %v3709_v16 = vsel %vm600_vm8, %v3708_v9, %v3673_v6 }
 0x922   : > { %v3715_v12 = vperm.slane %v3709_v16, %v10804_v33 }
 0x923   : > { %v3711_v56 = vsel %vm600_vm8, %v3679_v49, %v3710_v48  ;;  %v3686_v49 = vrot.slane %v11600_v60, 4 }
 0x924   : > { %v3719_v62 = vperm.slane %v3711_v56, %v10804_v33  ;;  %v3758_v6 = vrot.slane %v3715_v12, 4 }
 0x926   : > { %v3770_v48 = vrot.slane %v3719_v62, 4 }
 0x927   : > { %v3676_v30 = vpop.permute.xlu1 %3675  ;;  %v3670_v1 = vpop.permute.xlu0 %3669 }
 0x928   : > { %v3721_v35 = vsel %vm600_vm8, %v3720_v63, %v3676_v30  ;;  %v3722_v61 = vrot.slane %v3676_v30, 4  ;;  %v3696_v31 = vrot.slane %v3670_v1, 4 }
 0x929   : > { %v3727_v46 = vperm.slane %v3721_v35, %v10804_v33 }
 0x92a   : > { %v3723_v3 = vsel %vm600_vm8, %v3682_v18, %v3722_v61 }
 0x92b   : > { %v3731_v37 = vperm.slane %v3723_v3, %v10804_v33  ;;  %v3756_v23 = vrot.slane %v3727_v46, 4  ;;  %v3759_v25 = vsel %vm600_vm8, %v3727_v46, %v3758_v6 }
 0x92c   : > { %v3767_v45 = vperm.slane %v3759_v25, %v10817_v58 }
 0x92d   : > { %v3768_v9 = vrot.slane %v3731_v37, 4  ;;  %v3757_v16 = vsel %vm600_vm8, %v3756_v23, %v3715_v12  ;;  %v3771_v46 = vsel %vm600_vm8, %v3731_v37, %v3770_v48 }
 0x92e   : > { %v3763_v12 = vperm.slane %v3757_v16, %v10817_v58  ;;  %v3779_v37 = vperm.slane %v3771_v46, %v10817_v58 }
 0x92f   : > { %v3667_v30 = vpop.permute.xlu1 %3666  ;;  %v3664_v63 = vpop.permute.xlu0 %3663  ;;  %v3769_v35 = vsel %vm600_vm8, %v3768_v9, %v3719_v62 }
 0x930   : > { %v3684_v61 = vrot.slane %v3667_v30, 4  ;;  %v3687_v56 = vsel %vm600_vm8, %v3667_v30, %v3686_v49  ;;  %v3697_v3 = vsel %vm600_vm8, %v3696_v31, %v3664_v63  ;;  %v3698_v18 = vrot.slane %v3664_v63, 4 }
 0x931   : > { %v3695_v6 = vperm.slane %v3687_v56, %v10804_v33  ;;  %v3703_v11 = vperm.slane %v3697_v3, %v10804_v33  ;;  %v3775_v9 = vperm.slane %v3769_v35, %v10817_v58  ;;  %v3784_v3 = vrot.slane %v3767_v45, 4 }
 0x932   : > { %v3685_v23 = vsel %vm600_vm8, %v3684_v61, %v11600_v60  ;;  %v3699_v62 = vsel %vm600_vm8, %v3670_v1, %v3698_v18  ;;  %v3780_v61 = vrot.slane %v3763_v12, 4 }
 0x933   : > { %v3691_v31 = vperm.slane %v3685_v23, %v10804_v33  ;;  %v3746_v49 = vrot.slane %v3695_v6, 4  ;;  %v3707_v25 = vperm.slane %v3699_v62, %v10804_v33  ;;  %v3732_v30 = vrot.slane %v3703_v11, 4 }
 0x934   : > { %v3788_v23 = vrot.slane %v3775_v9, 4 }
 0x935   : > { %v3734_v48 = vrot.slane %v3691_v31, 4  ;;  %v3733_v63 = vsel %vm600_vm8, %v3732_v30, %v3691_v31  ;;  %v3744_v56 = vrot.slane %v3707_v25, 4  ;;  %v3747_v16 = vsel %vm600_vm8, %v3707_v25, %v3746_v49 }
 0x936   : > { %v3739_v60 = vperm.slane %v3733_v63, %v10817_v58  ;;  %v3755_v1 = vperm.slane %v3747_v16, %v10817_v58  ;;  %v3792_v49 = vrot.slane %v3779_v37, 4 }
 0x937   : > { %v3735_v35 = vsel %vm600_vm8, %v3703_v11, %v3734_v48  ;;  %v3745_v18 = vsel %vm600_vm8, %v3744_v56, %v3695_v6 }
 0x938   : > { %v3743_v62 = vperm.slane %v3735_v35, %v10817_v58  ;;  %v3781_v46 = vsel %vm600_vm8, %v3780_v61, %v3739_v60  ;;  %v3782_v24 = vrot.slane %v3739_v60, 4  ;;  %v3751_v31 = vperm.slane %v3745_v18, %v10817_v58 }
 0x939   : > { %10211 = vmatpush.xpose.msk.msrb.mxu2 %vm554_vm7, %v3781_v46  ;;  %v3794_v25 = vrot.slane %v3755_v1, 4  ;;  %v3793_v6 = vsel %vm600_vm8, %v3792_v49, %v3755_v1 }
 0x93a   : > { %v3783_v30 = vsel %vm600_vm8, %v3763_v12, %v3782_v24  ;;  %v3785_v63 = vsel %vm600_vm8, %v3784_v3, %v3743_v62  ;;  %v3789_v11 = vsel %vm600_vm8, %v3788_v23, %v3751_v31  ;;  %v3786_v48 = vrot.slane %v3743_v62, 4 }
 0x93b   : > { %10213 = vmatpush.xpose.msk.msrb.mxu3 %vm554_vm7, %v3783_v30  ;;  %10215 = vmatpush.xpose.msk.msra.mxu0 %vm554_vm7, %v3785_v63  ;;  %v3790_v56 = vrot.slane %v3751_v31, 4  ;;  %v3795_v12 = vsel %vm600_vm8, %v3779_v37, %v3794_v25 }
 0x93c   : > { %v3787_v16 = vsel %vm600_vm8, %v3767_v45, %v3786_v48  ;;  %10212 = vmatmul.msk.f32.vlgmr.msrb.gmra.mxu2 %vm554_vm7, %v11370_v47 }
 0x93d   : > { %10219 = vmatpush.xpose.msk.msra.mxu2 %vm554_vm7, %v3789_v11  ;;  %10217 = vmatpush.xpose.msk.msra.mxu1 %vm554_vm7, %v3787_v16  ;;  %v3791_v24 = vsel %vm600_vm8, %v3775_v9, %v3790_v56 }
 0x93e   : > { %10214 = vmatmul.msk.f32.vlgmr.msrb.gmra.mxu3 %vm554_vm7, %v11363_v42  ;;  %10216 = vmatmul.msk.f32.vlgmr.msra.gmra.mxu0 %vm554_vm7, %v11529_v10 }
 0x93f   : > { %10223 = vmatpush.xpose.msk.msrb.mxu0 %vm554_vm7, %v3793_v6  ;;  %10221 = vmatpush.xpose.msk.msra.mxu3 %vm554_vm7, %v3791_v24 }
 0x940   : > { %10218 = vmatmul.msk.f32.vlgmr.msra.gmra.mxu1 %vm554_vm7, %v11375_v8 }
 0x941   : > { %10225 = vmatpush.xpose.msk.msrb.mxu1 %vm554_vm7, %v3795_v12  ;;  %10227 = vmatpush.xpose.msk.msrb.mxu2 %vm920_vm9, %v11382_v52 }
 0x943   : > { %10229 = vmatpush.xpose.msk.msrb.mxu3 %vm920_vm9, %v11534_v34  ;;  %10231 = vmatpush.xpose.msk.msra.mxu0 %vm920_vm9, %v11539_v29 }
 0x944   : > { %10220 = vmatmul.msk.f32.vlgmr.msra.gmra.mxu2 %vm554_vm7, %v11559_v44 }
 0x945   : > { %10233 = vmatpush.xpose.msk.msra.mxu1 %vm920_vm9, %v11544_v4  ;;  %10235 = vmatpush.xpose.msk.msra.mxu2 %vm920_vm9, %v11569_v39 }
 0x946   : > { %10222 = vmatmul.msk.f32.vlgmr.msra.gmra.mxu3 %vm554_vm7, %v11549_v38  ;;  %10224 = vmatmul.msk.f32.vlgmr.msrb.gmra.mxu0 %vm554_vm7, %v11579_v59 }
 0x947   : > { %10237 = vmatpush.xpose.msk.msra.mxu3 %vm920_vm9, %v11554_v43  ;;  %10239 = vmatpush.xpose.msk.msrb.mxu0 %vm920_vm9, %v11584_v41 }
 0x948   : > { %10226 = vmatmul.msk.f32.vlgmr.msrb.gmra.mxu1 %vm554_vm7, %v11564_v20 }
 0x949   : > { %10241 = vmatpush.xpose.msk.msrb.mxu1 %vm920_vm9, %v11574_v53 }
 0x9bb   : > { %v3862_v45 = vpop.f32.mrf.mxu0 }
 0x9bc   : > { %10232 = vmatmul.msk.f32.vlgmr.msra.gmra.mxu0 %vm920_vm9, %v3862_v45 }
 0x9bd   : > { %v3885_v9 = vpop.f32.mrf.mxu1 }
 0x9be   : > { %10234 = vmatmul.msk.f32.vlgmr.msra.gmra.mxu1 %vm920_vm9, %v3885_v9 }
 0x9bf   : > { %v3816_v37 = vpop.f32.mrf.mxu2 }
 0x9c0   : > { %10228 = vmatmul.msk.f32.vlgmr.msrb.gmra.mxu2 %vm920_vm9, %v3816_v37 }
 0x9c1   : > { %v3839_v60 = vpop.f32.mrf.mxu3  ;;  %4249 = vmatpush.msrb.mxu2 %v11413_v55 }
 0x9c2   : > { %10230 = vmatmul.msk.f32.vlgmr.msrb.gmra.mxu3 %vm920_vm9, %v3839_v60 }
 0x9c3   : > { %v3954_v61 = vpop.f32.mrf.mxu0  ;;  %4250 = vmatpush.msrb.mxu2 %v11420_v57 }
 0x9c4   : > { %10240 = vmatmul.msk.f32.vlgmr.msrb.gmra.mxu0 %vm920_vm9, %v3954_v61 }
 0x9c5   : > { %v3977_v1 = vpop.f32.mrf.mxu1 }
 0x9c6   : > { %10242 = vmatmul.msk.f32.vlgmr.msrb.gmra.mxu1 %vm920_vm9, %v3977_v1 }
 0x9c7   : > { %v3908_v35 = vpop.f32.mrf.mxu2 }
 0x9c8   : > { %10236 = vmatmul.msk.f32.vlgmr.msra.gmra.mxu2 %vm920_vm9, %v3908_v35 }
 0x9c9   : > { %v3931_v3 = vpop.f32.mrf.mxu3 }
 0x9ca   : > { %10238 = vmatmul.msk.f32.vlgmr.msra.gmra.mxu3 %vm920_vm9, %v3931_v3 }
 0x9d0   : > { %10243 = vmatmul.msk.f32.vlgmr.msrb.gmra.mxu2 %vm554_vm7, %v11121_v50 }
 0xa39   : > { %v4046_v18 = vpop.f32.mrf.mxu0 }
 0xa3a   : > { %v4164_v63 = vrot.slane %v4046_v18, 4 }
 0xa3b   : > { %v4069_v23 = vpop.f32.mrf.mxu1 }
 0xa3c   : > { %v4170_v46 = vrot.slane %v4069_v23, 4 }
 0xa41   : > { %v4138_v49 = vpop.f32.mrf.mxu0 }
 0xa42   : > { %v4176_v11 = vrot.slane %v4138_v49, 4 }
 0xa43   : > { %v4000_v62 = vpop.f32.mrf.mxu2  ;;  %v4161_v25 = vpop.f32.mrf.mxu1 }
 0xa44   : > { %v4182_v48 = vrot.slane %v4161_v25, 4  ;;  %v4165_v24 = vsel %vm600_vm8, %v4164_v63, %v4000_v62 }
 0xa45   : > { %v4023_v31 = vpop.f32.mrf.mxu3  ;;  %v11755_v37 = vperm.slane %v4165_v24, %v10804_v33 }
 0xa46   : > { %v4171_v30 = vsel %vm600_vm8, %v4170_v46, %v4023_v31 }
 0xa47   : > { %v11745_v6 = vperm.slane %v4171_v30, %v10804_v33  ;;  %13478 = vst [vmem:[#allocation24_spill] sm:$0xff] %v11755_v37 }
 0xa49   : > { %13476 = vst [vmem:[#allocation22_spill] sm:$0xff] %v11745_v6  ;;  %v4188_v45 = vrot.slane %v11745_v6, 4 }
 0xa4b   : > { %v4092_v56 = vpop.f32.mrf.mxu2  ;;  %v4189_v35 = vsel %vm600_vm8, %v4188_v45, %v11755_v37 }
 0xa4c   : > { %v4177_v50 = vsel %vm600_vm8, %v4176_v11, %v4092_v56  ;;  %v11772_v23 = vperm.slane %v4189_v35, %v10817_v58 }
 0xa4d   : > { %v4115_v16 = vpop.f32.mrf.mxu3  ;;  %v11758_v60 = vperm.slane %v4177_v50, %v10804_v33 }
 0xa4e   : > { %v4183_v12 = vsel %vm600_vm8, %v4182_v48, %v4115_v16  ;;  %13481 = vst [vmem:[#allocation27_spill] sm:$0xff] %v11772_v23 }
 0xa4f   : > { %v11752_v9 = vperm.slane %v4183_v12, %v10804_v33  ;;  %13479 = vst [vmem:[#allocation25_spill] sm:$0xff] %v11758_v60 }
 0xa51   : > { %13477 = vst [vmem:[#allocation23_spill] sm:$0xff] %v11752_v9  ;;  %v4200_v61 = vrot.slane %v11752_v9, 4 }
 0xa53   : > { %v4252_v1 = vpop.f32.mrf.mxu2  ;;  %v4201_v3 = vsel %vm600_vm8, %v4200_v61, %v11758_v60 }
 0xa54   : > { %4268 = vrot.lane.b32.xlu2 %v4252_v1, %s10663_s25  ;;  %4262 = vrot.lane.b32.xlu1 %v4252_v1, %s10667_s29  ;;  %v11768_v18 = vperm.slane %v4201_v3, %v10817_v58  ;;  %v4279_v56 = vrot.slane %v4252_v1, 4 }
 0xa55   : > { %4274 = vrot.lane.b32.xlu0 %v4252_v1, %s10664_s26 }
 0xa56   : > { %13480 = vst [vmem:[#allocation26_spill] sm:$0xff] %v11768_v18  ;;  %v4212_v62 = vrot.slane %v11768_v18, 4 }
 0xa58   : > { %v11777_v46 = vsel %vm600_vm8, %v4212_v62, %v11772_v23 }
 0xa59   : > { %13482 = vst [vmem:[#allocation28_spill] sm:$0xff] %v11777_v46 }
 0xa5c   : > { %4259 = vrot.lane.b32.xlu2 %v4252_v1, %s10665_s27  ;;  %4256 = vrot.lane.b32.xlu1 %v4252_v1, %s10662_s24 }
 0xa5d   : > { %4271 = vrot.lane.b32.xlu0 %v4252_v1, %s10666_s28 }
 0xa65   : > { %4265 = vrot.lane.b32.xlu0 %v4252_v1, %s10668_s30 }
 0xaae   : > { %v4269_v31 = vpop.permute.xlu2 %4268 }
 0xaaf   : > { %v4315_v46 = vrot.slane %v4269_v31, 4 }
 0xab6   : > { %v4260_v49 = vpop.permute.xlu2 %4259 }
 0xab7   : > { %v4277_v63 = vrot.slane %v4260_v49, 4  ;;  %v4280_v35 = vsel %vm600_vm8, %v4260_v49, %v4279_v56 }
 0xab8   : > { %v4288_v18 = vperm.slane %v4280_v35, %v10804_v33 }
 0xab9   : > { %v4278_v11 = vsel %vm600_vm8, %v4277_v63, %v4252_v1 }
 0xaba   : > { %v4284_v50 = vperm.slane %v4278_v11, %v10804_v33 }
 0xabc   : > { %v4327_v37 = vrot.slane %v4284_v50, 4 }
 0xac6   : > { %v4263_v25 = vpop.permute.xlu1 %4262 }
 0xac7   : > { %v4275_v30 = vpop.permute.xlu0 %4274  ;;  %v4289_v48 = vrot.slane %v4263_v25, 4 }
 0xac8   : > { %v4313_v16 = vrot.slane %v4275_v30, 4  ;;  %v4316_v11 = vsel %vm600_vm8, %v4275_v30, %v4315_v46 }
 0xaca   : > { %v4314_v6 = vsel %vm600_vm8, %v4313_v16, %v4269_v31  ;;  %v4324_v31 = vperm.slane %v4316_v11, %v10804_v33 }
 0xace   : > { %v4257_v24 = vpop.permute.xlu1 %4256 }
 0xacf   : > { %v4290_v12 = vsel %vm600_vm8, %v4289_v48, %v4257_v24  ;;  %v4291_v45 = vrot.slane %v4257_v24, 4  ;;  %v4272_v61 = vpop.permute.xlu0 %4271  ;;  %v4320_v24 = vperm.slane %v4314_v6, %v10804_v33 }
 0xad0   : > { %v4296_v3 = vperm.slane %v4290_v12, %v10804_v33  ;;  %v4301_v12 = vrot.slane %v4272_v61, 4 }
 0xad1   : > { %v4292_v62 = vsel %vm600_vm8, %v4263_v25, %v4291_v45  ;;  %v4339_v45 = vrot.slane %v4288_v18, 4  ;;  %v4349_v23 = vrot.slane %v4320_v24, 4 }
 0xad2   : > { %v4300_v63 = vperm.slane %v4292_v62, %v10804_v33  ;;  %v4325_v1 = vrot.slane %v4296_v3, 4  ;;  %v4328_v56 = vsel %vm600_vm8, %v4296_v3, %v4327_v37 }
 0xad3   : > { %v4336_v35 = vperm.slane %v4328_v56, %v10817_v58 }
 0xad4   : > { %v4337_v48 = vrot.slane %v4300_v63, 4  ;;  %v4326_v49 = vsel %vm600_vm8, %v4325_v1, %v4284_v50  ;;  %v4340_v6 = vsel %vm600_vm8, %v4300_v63, %v4339_v45 }
 0xad5   : > { %v4332_v62 = vperm.slane %v4326_v49, %v10817_v58 }
 0xad6   : > { %v4338_v25 = vsel %vm600_vm8, %v4337_v48, %v4288_v18  ;;  %v4361_v18 = vrot.slane %v4324_v31, 4 }
 0xad7   : > { %v4266_v16 = vpop.permute.xlu0 %4265  ;;  %v4344_v37 = vperm.slane %v4338_v25, %v10817_v58  ;;  %v4375_v56 = vrot.slane %v4332_v62, 4 }
 0xad8   : > { %v4302_v46 = vsel %vm600_vm8, %v4301_v12, %v4266_v16  ;;  %v4303_v30 = vrot.slane %v4266_v16, 4  ;;  %v4379_v12 = vrot.slane %v4336_v35, 4  ;;  %v4348_v16 = vperm.slane %v4340_v6, %v10817_v58 }
 0xad9   : > { %v4308_v50 = vperm.slane %v4302_v46, %v10804_v33  ;;  %v4383_v25 = vrot.slane %v4344_v37, 4 }
 0xada   : > { %v4304_v3 = vsel %vm600_vm8, %v4272_v61, %v4303_v30 }
 0xadb   : > { %v4312_v1 = vperm.slane %v4304_v3, %v10804_v33  ;;  %v4350_v11 = vsel %vm600_vm8, %v4349_v23, %v4308_v50  ;;  %v4351_v48 = vrot.slane %v4308_v50, 4 }
 0xadc   : > { %v4356_v49 = vperm.slane %v4350_v11, %v10817_v58 }
 0xadd   : > { %v4352_v63 = vsel %vm600_vm8, %v4320_v24, %v4351_v48  ;;  %v4363_v45 = vrot.slane %v4312_v1, 4  ;;  %v4362_v46 = vsel %vm600_vm8, %v4361_v18, %v4312_v1 }
 0xade   : > { %v4376_v61 = vsel %vm600_vm8, %v4356_v49, %v4375_v56  ;;  %v4373_v30 = vrot.slane %v4356_v49, 4  ;;  %v4360_v3 = vperm.slane %v4352_v63, %v10817_v58  ;;  %v4368_v23 = vperm.slane %v4362_v46, %v10817_v58 }
 0xadf   : > { %10246 = vmatpush.xpose.msk.msra.mxu0 %vm554_vm7, %v4376_v61  ;;  %v4364_v50 = vsel %vm600_vm8, %v4324_v31, %v4363_v45  ;;  %v4387_v49 = vrot.slane %v4348_v16, 4 }
 0xae0   : > { %v4374_v11 = vsel %vm600_vm8, %v4373_v30, %v4332_v62  ;;  %v4380_v6 = vsel %vm600_vm8, %v4360_v3, %v4379_v12  ;;  %v4384_v24 = vsel %vm600_vm8, %v4368_v23, %v4383_v25  ;;  %v4377_v48 = vrot.slane %v4360_v3, 4 }
 0xae1   : > { %10244 = vmatpush.xpose.msk.msrb.mxu3 %vm554_vm7, %v4374_v11  ;;  %10250 = vmatpush.xpose.msk.msra.mxu2 %vm554_vm7, %v4380_v6  ;;  %v4381_v18 = vrot.slane %v4368_v23, 4  ;;  %v4372_v1 = vperm.slane %v4364_v50, %v10817_v58 }
 0xae2   : > { %v4378_v56 = vsel %vm600_vm8, %v4377_v48, %v4336_v35  ;;  %10247 = vmatmul.msk.f32.vlgmr.msra.gmra.mxu0 %vm554_vm7, %v11363_v42 }
 0xae3   : > { %10254 = vmatpush.xpose.msk.msrb.mxu0 %vm554_vm7, %v4384_v24  ;;  %10248 = vmatpush.xpose.msk.msra.mxu1 %vm554_vm7, %v4378_v56  ;;  %v4382_v31 = vsel %vm600_vm8, %v4381_v18, %v4344_v37  ;;  %v4388_v62 = vsel %vm600_vm8, %v4372_v1, %v4387_v49  ;;  %v4385_v12 = vrot.slane %v4372_v1, 4 }
 0xae4   : > { %10245 = vmatmul.msk.f32.vlgmr.msrb.gmra.mxu3 %vm554_vm7, %v11370_v47  ;;  %10251 = vmatmul.msk.f32.vlgmr.msra.gmra.mxu2 %vm554_vm7, %v11375_v8 }
 0xae5   : > { %10252 = vmatpush.xpose.msk.msra.mxu3 %vm554_vm7, %v4382_v31  ;;  %10258 = vmatpush.xpose.msk.msrb.mxu2 %vm554_vm7, %v4388_v62  ;;  %v4386_v35 = vsel %vm600_vm8, %v4385_v12, %v4348_v16 }
 0xae6   : > { %10249 = vmatmul.msk.f32.vlgmr.msra.gmra.mxu1 %vm554_vm7, %v11529_v10 }
 0xae7   : > { %10256 = vmatpush.xpose.msk.msrb.mxu1 %vm554_vm7, %v4386_v35  ;;  %10262 = vmatpush.xpose.msk.msra.mxu0 %vm920_vm9, %v11534_v34 }
 0xae9   : > { %10260 = vmatpush.xpose.msk.msrb.mxu3 %vm920_vm9, %v11382_v52  ;;  %10266 = vmatpush.xpose.msk.msra.mxu2 %vm920_vm9, %v11544_v4 }
 0xaea   : > { %10255 = vmatmul.msk.f32.vlgmr.msrb.gmra.mxu0 %vm554_vm7, %v11549_v38 }
 0xaeb   : > { %10264 = vmatpush.xpose.msk.msra.mxu1 %vm920_vm9, %v11539_v29  ;;  %10270 = vmatpush.xpose.msk.msrb.mxu0 %vm920_vm9, %v11554_v43 }
 0xaec   : > { %10253 = vmatmul.msk.f32.vlgmr.msra.gmra.mxu3 %vm554_vm7, %v11559_v44  ;;  %10259 = vmatmul.msk.f32.vlgmr.msrb.gmra.mxu2 %vm554_vm7, %v11564_v20 }
 0xaed   : > { %10268 = vmatpush.xpose.msk.msra.mxu3 %vm920_vm9, %v11569_v39  ;;  %10274 = vmatpush.xpose.msk.msrb.mxu2 %vm920_vm9, %v11574_v53 }
 0xaee   : > { %10257 = vmatmul.msk.f32.vlgmr.msrb.gmra.mxu1 %vm554_vm7, %v11579_v59 }
 0xaef   : > { %10272 = vmatpush.xpose.msk.msrb.mxu1 %vm920_vm9, %v11584_v41 }
 0xb5f   : > { %v4432_v42 = vpop.f32.mrf.mxu0 }
 0xb60   : > { %10263 = vmatmul.msk.f32.vlgmr.msra.gmra.mxu0 %vm920_vm9, %v4432_v42 }
 0xb63   : > { %v4455_v47 = vpop.f32.mrf.mxu1 }
 0xb64   : > { %10265 = vmatmul.msk.f32.vlgmr.msra.gmra.mxu1 %vm920_vm9, %v4455_v47 }
 0xb67   : > { %v4409_v8 = vpop.f32.mrf.mxu3  ;;  %v4478_v52 = vpop.f32.mrf.mxu2 }
 0xb68   : > { %10261 = vmatmul.msk.f32.vlgmr.msrb.gmra.mxu3 %vm920_vm9, %v4409_v8  ;;  %10267 = vmatmul.msk.f32.vlgmr.msra.gmra.mxu2 %vm920_vm9, %v4478_v52  ;;  %v4524_v37 = vpop.f32.mrf.mxu0 }
 0xb69   : > { %4842 = vmatpush.msrb.mxu3 %v11413_v55  ;;  %10271 = vmatmul.msk.f32.vlgmr.msrb.gmra.mxu0 %vm920_vm9, %v4524_v37 }
 0xb6b   : > { %v4547_v16 = vpop.f32.mrf.mxu1  ;;  %4843 = vmatpush.msrb.mxu3 %v11420_v57 }
 0xb6c   : > { %10273 = vmatmul.msk.f32.vlgmr.msrb.gmra.mxu1 %vm920_vm9, %v4547_v16 }
 0xb6f   : > { %v4501_v63 = vpop.f32.mrf.mxu3  ;;  %v4570_v45 = vpop.f32.mrf.mxu2 }
 0xb70   : > { %10269 = vmatmul.msk.f32.vlgmr.msra.gmra.mxu3 %vm920_vm9, %v4501_v63  ;;  %10275 = vmatmul.msk.f32.vlgmr.msrb.gmra.mxu2 %vm920_vm9, %v4570_v45 }
 0xb78   : > { %10276 = vmatmul.msk.f32.vlgmr.msrb.gmra.mxu3 %vm554_vm7, %v11274_v7 }
 0xbdd   : > { %v4616_v25 = vpop.f32.mrf.mxu0 }
 0xbe1   : > { %v4639_v46 = vpop.f32.mrf.mxu1 }
 0xbe2   : > { %v4757_v57 = vrot.slane %v4639_v46, 4 }
 0xbe6   : > { %v4708_v11 = vpop.f32.mrf.mxu0 }
 0xbe9   : > { %v4731_v3 = vpop.f32.mrf.mxu1 }
 0xbea   : > { %v4769_v50 = vrot.slane %v4731_v3, 4 }
 0xbeb   : > { %v4593_v61 = vpop.f32.mrf.mxu3  ;;  %v4662_v55 = vpop.f32.mrf.mxu2 }
 0xbec   : > { %v4763_v30 = vrot.slane %v4662_v55, 4  ;;  %v4758_v1 = vsel %vm600_vm8, %v4757_v57, %v4593_v61 }
 0xbed   : > { %v11887_v62 = vperm.slane %v4758_v1, %v10804_v33 }
 0xbee   : > { %v4764_v23 = vsel %vm600_vm8, %v4763_v30, %v4616_v25 }
 0xbef   : > { %v11877_v6 = vperm.slane %v4764_v23, %v10804_v33  ;;  %13485 = vst [vmem:[#allocation31_spill] sm:$0xff] %v11887_v62 }
 0xbf1   : > { %13483 = vst [vmem:[#allocation29_spill] sm:$0xff] %v11877_v6  ;;  %v4781_v56 = vrot.slane %v11877_v6, 4 }
 0xbf3   : > { %v4685_v24 = vpop.f32.mrf.mxu3  ;;  %v4754_v48 = vpop.f32.mrf.mxu2  ;;  %v4782_v47 = vsel %vm600_vm8, %v4781_v56, %v11887_v62 }
 0xbf4   : > { %v4775_v18 = vrot.slane %v4754_v48, 4  ;;  %v4770_v7 = vsel %vm600_vm8, %v4769_v50, %v4685_v24  ;;  %v11904_v37 = vperm.slane %v4782_v47, %v10817_v58 }
 0xbf5   : > { %v11890_v12 = vperm.slane %v4770_v7, %v10804_v33 }
 0xbf6   : > { %v4776_v49 = vsel %vm600_vm8, %v4775_v18, %v4708_v11  ;;  %13488 = vst [vmem:[#allocation34_spill] sm:$0xff] %v11904_v37 }
 0xbf7   : > { %v11884_v31 = vperm.slane %v4776_v49, %v10804_v33  ;;  %13486 = vst [vmem:[#allocation32_spill] sm:$0xff] %v11890_v12 }
 0xbf9   : > { %13484 = vst [vmem:[#allocation30_spill] sm:$0xff] %v11884_v31  ;;  %v4793_v35 = vrot.slane %v11884_v31, 4 }
 0xbfb   : > { %v4845_v42 = vpop.f32.mrf.mxu3  ;;  %v4794_v8 = vsel %vm600_vm8, %v4793_v35, %v11890_v12 }
 0xbfc   : > { %4861 = vrot.lane.b32.xlu0 %v4845_v42, %s10663_s25  ;;  %4855 = vrot.lane.b32.xlu2 %v4845_v42, %s10667_s29  ;;  %v11900_v52 = vperm.slane %v4794_v8, %v10817_v58  ;;  %v4872_v57 = vrot.slane %v4845_v42, 4 }
 0xbfd   : > { %4867 = vrot.lane.b32.xlu1 %v4845_v42, %s10664_s26 }
 0xbfe   : > { %13487 = vst [vmem:[#allocation33_spill] sm:$0xff] %v11900_v52  ;;  %v4805_v16 = vrot.slane %v11900_v52, 4 }
 0xc00   : > { %v11909_v63 = vsel %vm600_vm8, %v4805_v16, %v11904_v37 }
 0xc01   : > { %13489 = vst [vmem:[#allocation35_spill] sm:$0xff] %v11909_v63 }
 0xc04   : > { %4852 = vrot.lane.b32.xlu0 %v4845_v42, %s10665_s27  ;;  %4849 = vrot.lane.b32.xlu2 %v4845_v42, %s10662_s24  ;;  %s12106_s27 = scalar_lea.vmem %s13406_s6, %s10755_s20 }
 0xc05   : > { %4864 = vrot.lane.b32.xlu1 %v4845_v42, %s10666_s28 }
 0xc0d   : > { %4858 = vrot.lane.b32.xlu1 %v4845_v42, %s10668_s30 }
 0xc56   : > { %v4856_v45 = vpop.permute.xlu2 %4855 }
 0xc57   : > { %v4882_v30 = vrot.slane %v4856_v45, 4 }
 0xc5e   : > { %v4850_v46 = vpop.permute.xlu2 %4849 }
 0xc5f   : > { %v4884_v55 = vrot.slane %v4850_v46, 4  ;;  %v4883_v3 = vsel %vm600_vm8, %v4882_v30, %v4850_v46 }
 0xc60   : > { %v4889_v24 = vperm.slane %v4883_v3, %v10804_v33 }
 0xc61   : > { %v4885_v23 = vsel %vm600_vm8, %v4856_v45, %v4884_v55 }
 0xc62   : > { %v4893_v48 = vperm.slane %v4885_v23, %v10804_v33  ;;  %v4918_v16 = vrot.slane %v4889_v24, 4 }
 0xc64   : > { %v4930_v45 = vrot.slane %v4893_v48, 4 }
 0xc6e   : > { %v4862_v25 = vpop.permute.xlu0 %4861 }
 0xc6f   : > { %v4868_v61 = vpop.permute.xlu1 %4867  ;;  %v4908_v49 = vrot.slane %v4862_v25, 4 }
 0xc70   : > { %v4906_v50 = vrot.slane %v4868_v61, 4 }
 0xc71   : > { %v4909_v46 = vsel %vm600_vm8, %v4868_v61, %v4908_v49 }
 0xc72   : > { %v4907_v47 = vsel %vm600_vm8, %v4906_v50, %v4862_v25 }
 0xc73   : > { %v4913_v30 = vperm.slane %v4907_v47, %v10804_v33 }
 0xc75   : > { %v4942_v49 = vrot.slane %v4913_v30, 4 }
 0xc76   : > { %v4853_v11 = vpop.permute.xlu0 %4852 }
 0xc77   : > { %v4870_v18 = vrot.slane %v4853_v11, 4  ;;  %v4873_v1 = vsel %vm600_vm8, %v4853_v11, %v4872_v57  ;;  %v4865_v7 = vpop.permute.xlu1 %4864 }
 0xc78   : > { %v4881_v35 = vperm.slane %v4873_v1, %v10804_v33  ;;  %v4894_v11 = vrot.slane %v4865_v7, 4 }
 0xc79   : > { %v4871_v56 = vsel %vm600_vm8, %v4870_v18, %v4845_v42  ;;  %v4917_v18 = vperm.slane %v4909_v46, %v10804_v33 }
 0xc7a   : > { %v4877_v8 = vperm.slane %v4871_v56, %v10804_v33  ;;  %v4931_v23 = vsel %vm600_vm8, %v4930_v45, %v4881_v35  ;;  %v4932_v57 = vrot.slane %v4881_v35, 4 }
 0xc7b   : > { %v4937_v50 = vperm.slane %v4931_v23, %v10817_v58 }
 0xc7c   : > { %v4920_v55 = vrot.slane %v4877_v8, 4  ;;  %v4919_v3 = vsel %vm600_vm8, %v4918_v16, %v4877_v8  ;;  %v4933_v47 = vsel %vm600_vm8, %v4893_v48, %v4932_v57 }
 0xc7d   : > { %v4925_v61 = vperm.slane %v4919_v3, %v10817_v58  ;;  %v4941_v23 = vperm.slane %v4933_v47, %v10817_v58 }
 0xc7e   : > { %v4921_v42 = vsel %vm600_vm8, %v4889_v24, %v4920_v55  ;;  %v4954_v24 = vrot.slane %v4917_v18, 4 }
 0xc7f   : > { %v4859_v25 = vpop.permute.xlu1 %4858  ;;  %v4929_v35 = vperm.slane %v4921_v42, %v10817_v58  ;;  %v4968_v3 = vrot.slane %v4925_v61, 4 }
 0xc80   : > { %v4895_v1 = vsel %vm600_vm8, %v4894_v11, %v4859_v25  ;;  %v4896_v56 = vrot.slane %v4859_v25, 4  ;;  %v4976_v25 = vrot.slane %v4937_v50, 4 }
 0xc81   : > { %v4901_v8 = vperm.slane %v4895_v1, %v10804_v33  ;;  %v4972_v1 = vrot.slane %v4929_v35, 4 }
 0xc82   : > { %v4897_v16 = vsel %vm600_vm8, %v4865_v7, %v4896_v56 }
 0xc83   : > { %v4905_v45 = vperm.slane %v4897_v16, %v10804_v33  ;;  %v4943_v46 = vsel %vm600_vm8, %v4942_v49, %v4901_v8  ;;  %v4944_v55 = vrot.slane %v4901_v8, 4 }
 0xc84   : > { %v4949_v11 = vperm.slane %v4943_v46, %v10817_v58 }
 0xc85   : > { %v4945_v48 = vsel %vm600_vm8, %v4913_v30, %v4944_v55  ;;  %v4956_v57 = vrot.slane %v4905_v45, 4  ;;  %v4955_v42 = vsel %vm600_vm8, %v4954_v24, %v4905_v45 }
 0xc86   : > { %v4969_v7 = vsel %vm600_vm8, %v4949_v11, %v4968_v3  ;;  %v4966_v56 = vrot.slane %v4949_v11, 4  ;;  %v4953_v16 = vperm.slane %v4945_v48, %v10817_v58  ;;  %v4961_v49 = vperm.slane %v4955_v42, %v10817_v58  ;;  %v10625_v48 = vld [vmem:[%s10844_s15 + $0x4] sm:$0xf] }
 0xc87   : > { %10279 = vmatpush.xpose.msk.msra.mxu1 %vm554_vm7, %v4969_v7  ;;  %v4957_v47 = vsel %vm600_vm8, %v4917_v18, %v4956_v57  ;;  %v4980_v11 = vrot.slane %v4941_v23, 4  ;;  %v10626_v57 = vld [vmem:[%s10844_s15] sm:$0xf] }
 0xc88   : > { %v4967_v8 = vsel %vm600_vm8, %v4966_v56, %v4925_v61  ;;  %v4973_v30 = vsel %vm600_vm8, %v4953_v16, %v4972_v1  ;;  %v4977_v46 = vsel %vm600_vm8, %v4961_v49, %v4976_v25  ;;  %v4970_v55 = vrot.slane %v4953_v16, 4  ;;  %v10627_v1 = vld [vmem:[%s10844_s15 + $0xc] sm:$0xf]  ;;  %s476_s15 = scalar_lea.vmem %s13404_s4, %s10755_s20 }
 0xc89   : > { %10277 = vmatpush.xpose.msk.msra.mxu0 %vm554_vm7, %v4967_v8  ;;  %10283 = vmatpush.xpose.msk.msra.mxu3 %vm554_vm7, %v4973_v30  ;;  %v4974_v24 = vrot.slane %v4961_v49, 4  ;;  %v4965_v45 = vperm.slane %v4957_v47, %v10817_v58  ;;  %v12022_v42 = vld [vmem:[%s476_s15 + $0x14] sm:$0xf]  ;;  %v12027_v16 = vld [vmem:[%s476_s15 + $0x18] sm:$0xf] }
 0xc8a   : > { %v4971_v18 = vsel %vm600_vm8, %v4970_v55, %v4929_v35  ;;  %10280 = vmatmul.msk.f32.vlgmr.msra.gmra.mxu1 %vm554_vm7, %v10625_v48  ;;  %v5477_v49 = vrot.slane %v12022_v42, 3  ;;  %v5479_v55 = vrot.slane %v12027_v16, 2  ;;  %v6066_v6 = vrot.slane %v12022_v42, 4 }
 0xc8b   : > { %10287 = vmatpush.xpose.msk.msrb.mxu1 %vm554_vm7, %v4977_v46  ;;  %10281 = vmatpush.xpose.msk.msra.mxu2 %vm554_vm7, %v4971_v18  ;;  %v4975_v61 = vsel %vm600_vm8, %v4974_v24, %v4937_v50  ;;  %v4981_v3 = vsel %vm600_vm8, %v4965_v45, %v4980_v11  ;;  %v4978_v25 = vrot.slane %v4965_v45, 4  ;;  %v10628_v50 = vld [vmem:[%s10856_s18] sm:$0xf]  ;;  %v12032_v46 = vld [vmem:[%s476_s15 + $0x1c] sm:$0xf]  ;;  %s10675_s18 = smov 4  }
 0xc8c   : > { %10278 = vmatmul.msk.f32.vlgmr.msra.gmra.mxu0 %vm554_vm7, %v10626_v57  ;;  %10284 = vmatmul.msk.f32.vlgmr.msra.gmra.mxu3 %vm554_vm7, %v10627_v1  ;;  %v5481_v18 = vrot.slane %v12032_v46, 1 }
 0xc8d   : > { %10285 = vmatpush.xpose.msk.msrb.mxu0 %vm554_vm7, %v4975_v61  ;;  %10291 = vmatpush.xpose.msk.msrb.mxu3 %vm554_vm7, %v4981_v3  ;;  %v4979_v35 = vsel %vm600_vm8, %v4978_v25, %v4941_v23 }
 0xc8e   : > { %10282 = vmatmul.msk.f32.vlgmr.msra.gmra.mxu2 %vm554_vm7, %v11529_v10  ;;  %v11999_v10 = vld [vmem:[%s476_s15 + $0x4] sm:$0xf] }
 0xc8f   : > { %10289 = vmatpush.xpose.msk.msrb.mxu2 %vm554_vm7, %v4979_v35  ;;  %10295 = vmatpush.xpose.msk.msra.mxu1 %vm920_vm9, %v11534_v34  ;;  %v12001_v34 = vld [vmem:[%s476_s15 + $0x8] sm:$0xf] }
 0xc91   : > { %10293 = vmatpush.xpose.msk.msra.mxu0 %vm920_vm9, %v10628_v50  ;;  %10299 = vmatpush.xpose.msk.msra.mxu3 %vm920_vm9, %v11544_v4  ;;  %v12004_v4 = vld [vmem:[%s476_s15] sm:$0xf] }
 0xc92   : > { %10288 = vmatmul.msk.f32.vlgmr.msrb.gmra.mxu1 %vm554_vm7, %v11549_v38  ;;  %v12006_v38 = vld [vmem:[%s476_s15 + $0xc] sm:$0xf] }
 0xc93   : > { %10297 = vmatpush.xpose.msk.msra.mxu2 %vm920_vm9, %v11539_v29  ;;  %10303 = vmatpush.xpose.msk.msrb.mxu1 %vm920_vm9, %v11554_v43  ;;  %v5469_v29 = vrot.slane %v11999_v10, 7  ;;  %v5471_v43 = vrot.slane %v12001_v34, 6  ;;  %v6062_v63 = vrot.slane %v12006_v38, 6 }
 0xc94   : > { %10286 = vmatmul.msk.f32.vlgmr.msrb.gmra.mxu0 %vm554_vm7, %v11559_v44  ;;  %10292 = vmatmul.msk.f32.vlgmr.msrb.gmra.mxu3 %vm554_vm7, %v11564_v20 }
 0xc95   : > { %10301 = vmatpush.xpose.msk.msrb.mxu0 %vm920_vm9, %v11569_v39  ;;  %10307 = vmatpush.xpose.msk.msrb.mxu3 %vm920_vm9, %v11574_v53  ;;  %v5470_v44 = vsel %vm534_vm0, %v5469_v29, %v12004_v4  ;;  %v12011_v39 = vld [vmem:[%s476_s15 + $0x10] sm:$0xf]  ;;  %v5473_v53 = vrot.slane %v12006_v38, 5  ;;  %s10674_s15 = smov 8  }
 0xc96   : > { %10290 = vmatmul.msk.f32.vlgmr.msrb.gmra.mxu2 %vm554_vm7, %v11579_v59  ;;  %v12017_v59 = vld [vmem:[%s13408_s8] sm:$0xff]  ;;  %v5475_v7 = vrot.slane %v12011_v39, 4 }
 0xc97   : > { %10305 = vmatpush.xpose.msk.msrb.mxu2 %vm920_vm9, %v11584_v41  ;;  %v5472_v41 = vsel %vm537_vm1, %v5471_v43, %v5470_v44 }
 0xc98   : > { %v5474_v56 = vsel %vm540_vm2, %v5473_v53, %v5472_v41 }
 0xc99   : > { %v5476_v47 = vsel %vm543_vm3, %v5475_v7, %v5474_v56 }
 0xc9a   : > { %v5478_v11 = vsel %vm546_vm4, %v5477_v49, %v5476_v47 }
 0xc9b   : > { %v5480_v61 = vsel %vm549_vm5, %v5479_v55, %v5478_v11 }
 0xc9c   : > { %v12042_v25 = vsel %vm552_vm6, %v5481_v18, %v5480_v61 }
 0xd07   : > { %v5025_v20 = vpop.f32.mrf.mxu1 }
 0xd08   : > { %10296 = vmatmul.msk.f32.vlgmr.msra.gmra.mxu1 %vm920_vm9, %v5025_v20 }
 0xd09   : > { %v5002_v23 = vpop.f32.mrf.mxu0 }
 0xd0a   : > { %10294 = vmatmul.msk.f32.vlgmr.msra.gmra.mxu0 %vm920_vm9, %v5002_v23 }
 0xd0b   : > { %5500 = vmatpush.msra.mxu0 %v12017_v59 }
 0xd0f   : > { %v5071_v8 = vpop.f32.mrf.mxu3  ;;  %v5117_v30 = vpop.f32.mrf.mxu1 }
 0xd10   : > { %10300 = vmatmul.msk.f32.vlgmr.msra.gmra.mxu3 %vm920_vm9, %v5071_v8  ;;  %10304 = vmatmul.msk.f32.vlgmr.msrb.gmra.mxu1 %vm920_vm9, %v5117_v30 }
 0xd11   : > { %v5048_v24 = vpop.f32.mrf.mxu2  ;;  %v5094_v45 = vpop.f32.mrf.mxu0 }
 0xd12   : > { %10298 = vmatmul.msk.f32.vlgmr.msra.gmra.mxu2 %vm920_vm9, %v5048_v24  ;;  %10302 = vmatmul.msk.f32.vlgmr.msrb.gmra.mxu0 %vm920_vm9, %v5094_v45 }
 0xd17   : > { %v5163_v3 = vpop.f32.mrf.mxu3 }
 0xd18   : > { %10308 = vmatmul.msk.f32.vlgmr.msrb.gmra.mxu3 %vm920_vm9, %v5163_v3 }
 0xd19   : > { %v5140_v48 = vpop.f32.mrf.mxu2 }
 0xd1a   : > { %10306 = vmatmul.msk.f32.vlgmr.msrb.gmra.mxu2 %vm920_vm9, %v5140_v48  ;;  %10309 = vmatmul.msk.f32.vlgmr.msra.gmra.mxu0 %vm920_vm9, %v12042_v25 }
 0xd85   : > { %v5209_v35 = vpop.f32.mrf.mxu1 }
 0xd87   : > { %v5186_v57 = vpop.f32.mrf.mxu0 }
 0xd8d   : > { %v5301_v7 = vpop.f32.mrf.mxu1 }
 0xd8f   : > { %v5278_v1 = vpop.f32.mrf.mxu0 }
 0xd93   : > { %v5255_v50 = vpop.f32.mrf.mxu3 }
 0xd94   : > { %v5356_v29 = vrot.slane %v5255_v50, 4 }
 0xd95   : > { %v5232_v43 = vpop.f32.mrf.mxu2 }
 0xd96   : > { %v5357_v20 = vsel %vm600_vm8, %v5356_v29, %v5209_v35  ;;  %v5350_v53 = vrot.slane %v5232_v43, 4 }
 0xd97   : > { %v5502_v44 = vpop.f32.mrf.mxu0  ;;  %v12053_v41 = vperm.slane %v5357_v20, %v10804_v33 }
 0xd98   : > { %5509 = vrot.lane.b32.xlu1 %v5502_v44, %s10662_s24  ;;  %5506 = vrot.lane.b32.xlu0 %v5502_v44, %s10671_s21  ;;  %v5351_v56 = vsel %vm600_vm8, %v5350_v53, %v5186_v57  ;;  %v5517_v20 = vrot.slane %v5502_v44, 4 }
 0xd99   : > { %5512 = vrot.lane.b32.xlu2 %v5502_v44, %s10672_s22  ;;  %13490 = vst [vmem:[#allocation36_spill] sm:$0xff] %v12053_v41  ;;  %v5374_v55 = vrot.slane %v12053_v41, 4  ;;  %v12059_v24 = vperm.slane %v5351_v56, %v10804_v33 }
 0xd9b   : > { %v5347_v23 = vpop.f32.mrf.mxu3  ;;  %13491 = vst [vmem:[#allocation37_spill] sm:$0xff] %v12059_v24  ;;  %v5375_v3 = vsel %vm600_vm8, %v5374_v55, %v12059_v24 }
 0xd9c   : > { %v5368_v49 = vrot.slane %v5347_v23, 4  ;;  %v12077_v35 = vperm.slane %v5375_v3, %v10817_v58 }
 0xd9d   : > { %v5324_v47 = vpop.f32.mrf.mxu2 }
 0xd9e   : > { %v5369_v8 = vsel %vm600_vm8, %v5368_v49, %v5301_v7  ;;  %v5362_v30 = vrot.slane %v5324_v47, 4  ;;  %13495 = vst [vmem:[#allocation41_spill] sm:$0xff] %v12077_v35 }
 0xd9f   : > { %v12062_v45 = vperm.slane %v5369_v8, %v10804_v33 }
 0xda0   : > { %v5363_v11 = vsel %vm600_vm8, %v5362_v30, %v5278_v1 }
 0xda1   : > { %13492 = vst [vmem:[#allocation38_spill] sm:$0xff] %v12062_v45  ;;  %v5386_v18 = vrot.slane %v12062_v45, 4  ;;  %v12067_v61 = vperm.slane %v5363_v11, %v10804_v33  ;;  %v6064_v45 = vrot.slane %v12011_v39, 5 }
 0xda3   : > { %13493 = vst [vmem:[#allocation39_spill] sm:$0xff] %v12067_v61  ;;  %v5387_v48 = vsel %vm600_vm8, %v5386_v18, %v12067_v61 }
 0xda4   : > { %v12074_v57 = vperm.slane %v5387_v48, %v10817_v58 }
 0xda6   : > { %13494 = vst [vmem:[#allocation40_spill] sm:$0xff] %v12074_v57  ;;  %v5398_v50 = vrot.slane %v12074_v57, 4 }
 0xda8   : > { %v12082_v1 = vsel %vm600_vm8, %v5398_v50, %v12077_v35 }
 0xda9   : > { %13496 = vst [vmem:[#allocation42_spill] sm:$0xff] %v12082_v1 }
 0xdf3   : > { %v5513_v29 = vpop.permute.xlu2 %5512 }
 0xdf4   : > { %v5527_v43 = vrot.slane %v5513_v29, 4 }
 0xe0a   : > { %v5510_v53 = vpop.permute.xlu1 %5509  ;;  %v5507_v23 = vpop.permute.xlu0 %5506 }
 0xe0b   : > { %v5515_v7 = vrot.slane %v5510_v53, 4  ;;  %v5518_v56 = vsel %vm600_vm8, %v5510_v53, %v5517_v20  ;;  %v5528_v49 = vsel %vm600_vm8, %v5527_v43, %v5507_v23  ;;  %v5529_v47 = vrot.slane %v5507_v23, 4 }
 0xe0c   : > { %v5526_v8 = vperm.slane %v5518_v56, %v10804_v33  ;;  %v5534_v30 = vperm.slane %v5528_v49, %v10804_v33 }
 0xe0d   : > { %v5516_v55 = vsel %vm600_vm8, %v5515_v7, %v5502_v44  ;;  %v5530_v11 = vsel %vm600_vm8, %v5513_v29, %v5529_v47  ;;  %v12114_v47 = vld [vmem:[%s12098_s12] sm:$0xf] }
 0xe0e   : > { %v5522_v18 = vperm.slane %v5516_v55, %v10804_v33  ;;  %v5553_v3 = vrot.slane %v5526_v8, 4  ;;  %v5538_v48 = vperm.slane %v5530_v11, %v10804_v33  ;;  %v5539_v50 = vrot.slane %v5534_v30, 4 }
 0xe10   : > { %v5541_v1 = vrot.slane %v5522_v18, 4  ;;  %v5540_v20 = vsel %vm600_vm8, %v5539_v50, %v5522_v18  ;;  %v5551_v43 = vrot.slane %v5538_v48, 4  ;;  %v5554_v53 = vsel %vm600_vm8, %v5538_v48, %v5553_v3  ;;  %v12117_v18 = vld [vmem:[%s12106_s27] sm:$0xf] }
 0xe11   : > { %v5546_v44 = vperm.slane %v5540_v20, %v10817_v58  ;;  %v5562_v29 = vperm.slane %v5554_v53, %v10817_v58  ;;  %v12132_v20 = vld [vmem:[%s12098_s12 + $0x4] sm:$0xf]  ;;  %v12141_v53 = vld [vmem:[%s12098_s12 + $0xc] sm:$0xf] }
 0xe12   : > { %v5542_v23 = vsel %vm600_vm8, %v5534_v30, %v5541_v1  ;;  %v5552_v7 = vsel %vm600_vm8, %v5551_v43, %v5526_v8  ;;  %v12123_v8 = vld [vmem:[%s12098_s12 + $0x8] sm:$0xf] }
 0xe13   : > { %v5550_v56 = vperm.slane %v5542_v23, %v10817_v58  ;;  %10310 = vmatpush.xpose.msk.msra.mxu1 %vm920_vm9, %v5546_v44  ;;  %v5558_v49 = vperm.slane %v5552_v7, %v10817_v58  ;;  %v5563_v55 = vrot.slane %v5546_v44, 4  ;;  %v5569_v11 = vrot.slane %v5562_v29, 4  ;;  %v12148_v44 = vld [vmem:[%s12098_s12 + $0x10] sm:$0xf]  ;;  %v12158_v23 = vld [vmem:[%s12098_s12 + $0x14] sm:$0xf] }
 0xe14   : > { %v12163_v7 = vld [vmem:[%s12098_s12 + $0x1c] sm:$0xf] }
 0xe15   : > { %10314 = vmatpush.xpose.msk.msra.mxu3 %vm920_vm9, %v5550_v56  ;;  %v5564_v1 = vsel %vm600_vm8, 0.0, %v5563_v55  ;;  %v5565_v30 = vrot.slane %v5550_v56, 4  ;;  %v5567_v3 = vrot.slane %v5558_v49, 4  ;;  %v5570_v43 = vsel %vm600_vm8, 0.0, %v5569_v11  ;;  %v12170_v56 = vld [vmem:[%s12106_s27 + $0x8] sm:$0xf] }
 0xe16   : > { %10311 = vmatmul.msk.f32.vlgmr.msra.gmra.mxu1 %vm920_vm9, %v12114_v47  ;;  %10312 = vmatpush.xpose.msk.msra.mxu2 %vm920_vm9, %v5564_v1  ;;  %v12176_v55 = vld [vmem:[%s12106_s27 + $0x4] sm:$0xf]  ;;  %v12185_v11 = vld [vmem:[%s12106_s27 + $0xc] sm:$0xf]  ;;  %v12188_v1 = vld [vmem:[%s12106_s27 + $0x18] sm:$0xf] }
 0xe17   : > { %10318 = vmatpush.xpose.msk.msrb.mxu1 %vm920_vm9, %v5558_v49  ;;  %v5566_v48 = vsel %vm600_vm8, 0.0, %v5565_v30  ;;  %v5568_v50 = vsel %vm600_vm8, 0.0, %v5567_v3  ;;  %v12173_v49 = vld [vmem:[%s12106_s27 + $0x10] sm:$0xf]  ;;  %v12191_v30 = vld [vmem:[%s12106_s27 + $0x14] sm:$0xf] }
 0xe18   : > { %10315 = vmatmul.msk.f32.vlgmr.msra.gmra.mxu3 %vm920_vm9, %v12123_v8  ;;  %10316 = vmatpush.xpose.msk.msrb.mxu0 %vm920_vm9, %v5566_v48  ;;  %v12200_v3 = vld [vmem:[%s12106_s27 + $0x1c] sm:$0xf]  ;;  %v6058_v48 = vrot.slane %v12004_v4, 1 }
 0xe19   : > { %10322 = vmatpush.xpose.msk.msrb.mxu3 %vm920_vm9, %v5562_v29  ;;  %10313 = vmatmul.msk.f32.vlgmr.msra.gmra.mxu2 %vm920_vm9, %v12132_v20  ;;  %v12153_v29 = vld [vmem:[%s12098_s12 + $0x18] sm:$0xf] }
 0xe1a   : > { %10320 = vmatpush.xpose.msk.msrb.mxu2 %vm920_vm9, %v5568_v50  ;;  %v6060_v50 = vrot.slane %v12001_v34, 7 }
 0xe1b   : > { %10326 = vmatpush.xpose.msk.msra.mxu1 %vm1197_vm10, %v12117_v18  ;;  %10317 = vmatmul.msk.f32.vlgmr.msrb.gmra.mxu0 %vm920_vm9, %v12141_v53 }
 0xe1c   : > { %10324 = vmatpush.xpose.msk.msra.mxu0 %vm920_vm9, %v5570_v43  ;;  %v6059_v43 = vsel %vm534_vm0, %v11999_v10, %v6058_v48  ;;  %v6068_v48 = vrot.slane %v12027_v16, 3 }
 0xe1d   : > { %10330 = vmatpush.xpose.msk.msra.mxu3 %vm1197_vm10, %v12170_v56  ;;  %v6061_v41 = vsel %vm537_vm1, %v6060_v50, %v6059_v43 }
 0xe1e   : > { %10319 = vmatmul.msk.f32.vlgmr.msrb.gmra.mxu1 %vm920_vm9, %v12148_v44  ;;  %10328 = vmatpush.xpose.msk.msra.mxu2 %vm1197_vm10, %v12176_v55  ;;  %v6063_v61 = vsel %vm540_vm2, %v6062_v63, %v6061_v41  ;;  %v6070_v63 = vrot.slane %v12032_v46, 2 }
 0xe1f   : > { %10334 = vmatpush.xpose.msk.msrb.mxu1 %vm1197_vm10, %v12173_v49  ;;  %v6065_v62 = vsel %vm543_vm3, %v6064_v45, %v6063_v61 }
 0xe20   : > { %10323 = vmatmul.msk.f32.vlgmr.msrb.gmra.mxu3 %vm920_vm9, %v12153_v29  ;;  %10332 = vmatpush.xpose.msk.msrb.mxu0 %vm1197_vm10, %v12185_v11  ;;  %v6067_v43 = vsel %vm546_vm4, %v6066_v6, %v6065_v62 }
 0xe21   : > { %10321 = vmatmul.msk.f32.vlgmr.msrb.gmra.mxu2 %vm920_vm9, %v12158_v23  ;;  %10338 = vmatpush.xpose.msk.msrb.mxu3 %vm1197_vm10, %v12188_v1  ;;  %v6069_v41 = vsel %vm549_vm5, %v6068_v48, %v6067_v43 }
 0xe22   : > { %10336 = vmatpush.xpose.msk.msrb.mxu2 %vm1197_vm10, %v12191_v30  ;;  %v12225_v61 = vsel %vm552_vm6, %v6070_v63, %v6069_v41 }
 0xe23   : > { %10325 = vmatmul.msk.f32.vlgmr.msra.gmra.mxu0 %vm920_vm9, %v12163_v7 }
 0xe24   : > { %10340 = vmatpush.xpose.msk.msra.mxu0 %vm1197_vm10, %v12200_v3 }
 0xe93   : > { %v5594_v24 = vpop.f32.mrf.mxu1 }
 0xe94   : > { %10327 = vmatmul.msk.f32.vlgmr.msra.gmra.mxu1 %vm1197_vm10, %v5594_v24 }
 0xe95   : > { %6089 = vmatpush.msra.mxu1 %v12017_v59 }
 0xe98   : > { %v5672_v57 = vpop.f32.mrf.mxu0 }
 0xe99   : > { %10333 = vmatmul.msk.f32.vlgmr.msrb.gmra.mxu0 %vm1197_vm10, %v5672_v57 }
 0xe9b   : > { %v5646_v35 = vpop.f32.mrf.mxu3  ;;  %v5698_v50 = vpop.f32.mrf.mxu1 }
 0xe9c   : > { %10331 = vmatmul.msk.f32.vlgmr.msra.gmra.mxu3 %vm1197_vm10, %v5646_v35  ;;  %10335 = vmatmul.msk.f32.vlgmr.msrb.gmra.mxu1 %vm1197_vm10, %v5698_v50  ;;  %v5620_v24 = vpop.f32.mrf.mxu2 }
 0xe9d   : > { %10329 = vmatmul.msk.f32.vlgmr.msra.gmra.mxu2 %vm1197_vm10, %v5620_v24 }
 0xea0   : > { %v5776_v45 = vpop.f32.mrf.mxu0 }
 0xea1   : > { %10341 = vmatmul.msk.f32.vlgmr.msra.gmra.mxu0 %vm1197_vm10, %v5776_v45 }
 0xea3   : > { %v5750_v57 = vpop.f32.mrf.mxu3 }
 0xea4   : > { %10339 = vmatmul.msk.f32.vlgmr.msrb.gmra.mxu3 %vm1197_vm10, %v5750_v57  ;;  %10342 = vmatmul.msk.f32.vlgmr.msra.gmra.mxu1 %vm920_vm9, %v12225_v61  ;;  %v5724_v6 = vpop.f32.mrf.mxu2 }
 0xea5   : > { %10337 = vmatmul.msk.f32.vlgmr.msrb.gmra.mxu2 %vm1197_vm10, %v5724_v6 }
 0xf11   : > { %v5802_v62 = vpop.f32.mrf.mxu1 }
 0xf16   : > { %v5880_v50 = vpop.f32.mrf.mxu0 }
 0xf17   : > { %v5993_v48 = vrot.slane %v5880_v50, 4 }
 0xf19   : > { %v5906_v35 = vpop.f32.mrf.mxu1 }
 0xf1e   : > { %v5984_v63 = vpop.f32.mrf.mxu0 }
 0xf1f   : > { %v5854_v24 = vpop.f32.mrf.mxu3  ;;  %v6005_v57 = vrot.slane %v5984_v63, 4 }
 0xf20   : > { %v5828_v43 = vpop.f32.mrf.mxu2  ;;  %v5987_v41 = vrot.slane %v5854_v24, 4 }
 0xf21   : > { %v6091_v31 = vpop.f32.mrf.mxu1  ;;  %v5994_v45 = vsel %vm600_vm8, %v5993_v48, %v5828_v43 }
 0xf22   : > { %6098 = vrot.lane.b32.xlu1 %v6091_v31, %s10662_s24  ;;  %6095 = vrot.lane.b32.xlu0 %v6091_v31, %s10671_s21  ;;  %v12237_v6 = vperm.slane %v5994_v45, %v10804_v33  ;;  %v5988_v52 = vsel %vm600_vm8, %v5987_v41, %v5802_v62  ;;  %v6106_v45 = vrot.slane %v6091_v31, 4 }
 0xf23   : > { %6101 = vrot.lane.b32.xlu2 %v6091_v31, %s10672_s22  ;;  %v12243_v17 = vperm.slane %v5988_v52, %v10804_v33 }
 0xf24   : > { %13497 = vst [vmem:[#allocation43_spill] sm:$0xff] %v12237_v6  ;;  %v6011_v24 = vrot.slane %v12237_v6, 4 }
 0xf25   : > { %13498 = vst [vmem:[#allocation44_spill] sm:$0xff] %v12243_v17 }
 0xf27   : > { %v5958_v12 = vpop.f32.mrf.mxu3 }
 0xf28   : > { %v5999_v50 = vrot.slane %v5958_v12, 4  ;;  %v5932_v37 = vpop.f32.mrf.mxu2  ;;  %v6012_v12 = vsel %vm600_vm8, %v6011_v24, %v12243_v17 }
 0xf29   : > { %v6006_v60 = vsel %vm600_vm8, %v6005_v57, %v5932_v37  ;;  %v12261_v52 = vperm.slane %v6012_v12, %v10817_v58 }
 0xf2a   : > { %v6000_v9 = vsel %vm600_vm8, %v5999_v50, %v5906_v35  ;;  %v12250_v43 = vperm.slane %v6006_v60, %v10804_v33 }
 0xf2b   : > { %v12247_v48 = vperm.slane %v6000_v9, %v10804_v33  ;;  %13502 = vst [vmem:[#allocation48_spill] sm:$0xff] %v12261_v52 }
 0xf2c   : > { %13500 = vst [vmem:[#allocation46_spill] sm:$0xff] %v12250_v43  ;;  %v6023_v63 = vrot.slane %v12250_v43, 4 }
 0xf2d   : > { %13499 = vst [vmem:[#allocation45_spill] sm:$0xff] %v12247_v48 }
 0xf2e   : > { %v6024_v62 = vsel %vm600_vm8, %v6023_v63, %v12247_v48 }
 0xf2f   : > { %v12258_v37 = vperm.slane %v6024_v62, %v10817_v58 }
 0xf31   : > { %13501 = vst [vmem:[#allocation47_spill] sm:$0xff] %v12258_v37  ;;  %v6035_v9 = vrot.slane %v12258_v37, 4 }
 0xf33   : > { %v12266_v60 = vsel %vm600_vm8, %v6035_v9, %v12261_v52 }
 0xf34   : > { %13503 = vst [vmem:[#allocation49_spill] sm:$0xff] %v12266_v60 }
 0xf7d   : > { %v6102_v35 = vpop.permute.xlu2 %6101 }
 0xf7e   : > { %v6116_v41 = vrot.slane %v6102_v35, 4 }
 0xf94   : > { %v6099_v57 = vpop.permute.xlu1 %6098  ;;  %v6096_v50 = vpop.permute.xlu0 %6095 }
 0xf95   : > { %v6104_v24 = vrot.slane %v6099_v57, 4  ;;  %v6107_v63 = vsel %vm600_vm8, %v6099_v57, %v6106_v45  ;;  %v6117_v62 = vsel %vm600_vm8, %v6116_v41, %v6096_v50  ;;  %v6118_v6 = vrot.slane %v6096_v50, 4 }
 0xf96   : > { %v6115_v12 = vperm.slane %v6107_v63, %v10804_v33  ;;  %v6123_v17 = vperm.slane %v6117_v62, %v10804_v33 }
 0xf97   : > { %v6105_v37 = vsel %vm600_vm8, %v6104_v24, %v6091_v31  ;;  %v6119_v9 = vsel %vm600_vm8, %v6102_v35, %v6118_v6 }
 0xf98   : > { %v6111_v60 = vperm.slane %v6105_v37, %v10804_v33  ;;  %v6142_v52 = vrot.slane %v6115_v12, 4  ;;  %v6127_v43 = vperm.slane %v6119_v9, %v10804_v33  ;;  %v6128_v48 = vrot.slane %v6123_v17, 4 }
 0xf99   : > { %v6600_v9 = vrot.slane %v11999_v10, 1 }
 0xf9a   : > { %v6130_v54 = vrot.slane %v6111_v60, 4  ;;  %v6129_v45 = vsel %vm600_vm8, %v6128_v48, %v6111_v60  ;;  %v6140_v57 = vrot.slane %v6127_v43, 4  ;;  %v6143_v41 = vsel %vm600_vm8, %v6127_v43, %v6142_v52 }
 0xf9b   : > { %v6135_v50 = vperm.slane %v6129_v45, %v10817_v58  ;;  %v6151_v63 = vperm.slane %v6143_v41, %v10817_v58  ;;  %v6603_v41 = vrot.slane %v12006_v38, 7 }
 0xf9c   : > { %v6131_v31 = vsel %vm600_vm8, %v6123_v17, %v6130_v54  ;;  %v6141_v6 = vsel %vm600_vm8, %v6140_v57, %v6115_v12  ;;  %v6599_v12 = vrot.slane %v12004_v4, 2 }
 0xf9d   : > { %v6139_v37 = vperm.slane %v6131_v31, %v10817_v58  ;;  %10343 = vmatpush.xpose.msk.msra.mxu2 %vm920_vm9, %v6135_v50  ;;  %v6147_v35 = vperm.slane %v6141_v6, %v10817_v58  ;;  %v6152_v24 = vrot.slane %v6135_v50, 4  ;;  %v6158_v62 = vrot.slane %v6151_v63, 4 }
 0xf9e   : > { %v6601_v45 = vsel %vm534_vm0, %v6600_v9, %v6599_v12  ;;  %v6605_v6 = vrot.slane %v12011_v39, 6 }
 0xf9f   : > { %10347 = vmatpush.xpose.msk.msrb.mxu0 %vm920_vm9, %v6139_v37  ;;  %v6153_v48 = vsel %vm600_vm8, 0.0, %v6152_v24  ;;  %v6154_v43 = vrot.slane %v6139_v37, 4  ;;  %v6156_v52 = vrot.slane %v6147_v35, 4  ;;  %v6159_v60 = vsel %vm600_vm8, 0.0, %v6158_v62 }
 0xfa0   : > { %10344 = vmatmul.msk.f32.vlgmr.msra.gmra.mxu2 %vm920_vm9, %v12114_v47  ;;  %10345 = vmatpush.xpose.msk.msra.mxu3 %vm920_vm9, %v6153_v48  ;;  %v6607_v24 = vrot.slane %v12022_v42, 5 }
 0xfa1   : > { %10351 = vmatpush.xpose.msk.msrb.mxu2 %vm920_vm9, %v6147_v35  ;;  %v6155_v54 = vsel %vm600_vm8, 0.0, %v6154_v43  ;;  %v6157_v17 = vsel %vm600_vm8, 0.0, %v6156_v52  ;;  %v6609_v52 = vrot.slane %v12027_v16, 4 }
 0xfa2   : > { %10349 = vmatpush.xpose.msk.msrb.mxu1 %vm920_vm9, %v6155_v54  ;;  %10348 = vmatmul.msk.f32.vlgmr.msrb.gmra.mxu0 %vm920_vm9, %v12123_v8 }
 0xfa3   : > { %10355 = vmatpush.xpose.msk.msra.mxu0 %vm920_vm9, %v6151_v63  ;;  %10346 = vmatmul.msk.f32.vlgmr.msra.gmra.mxu3 %vm920_vm9, %v12132_v20  ;;  %v6602_v63 = vsel %vm537_vm1, %v12001_v34, %v6601_v45 }
 0xfa4   : > { %10353 = vmatpush.xpose.msk.msrb.mxu3 %vm920_vm9, %v6157_v17  ;;  %v6604_v37 = vsel %vm540_vm2, %v6603_v41, %v6602_v63 }
 0xfa5   : > { %10359 = vmatpush.xpose.msk.msra.mxu2 %vm1197_vm10, %v12117_v18  ;;  %10350 = vmatmul.msk.f32.vlgmr.msrb.gmra.mxu1 %vm920_vm9, %v12141_v53  ;;  %v6606_v62 = vsel %vm543_vm3, %v6605_v6, %v6604_v37 }
 0xfa6   : > { %10357 = vmatpush.xpose.msk.msra.mxu1 %vm920_vm9, %v6159_v60  ;;  %v6608_v17 = vsel %vm546_vm4, %v6607_v24, %v6606_v62  ;;  %v6611_v60 = vrot.slane %v12032_v46, 3 }
 0xfa7   : > { %10363 = vmatpush.xpose.msk.msrb.mxu0 %vm1197_vm10, %v12170_v56  ;;  %v6610_v9 = vsel %vm549_vm5, %v6609_v52, %v6608_v17 }
 0xfa8   : > { %10361 = vmatpush.xpose.msk.msra.mxu3 %vm1197_vm10, %v12176_v55  ;;  %10352 = vmatmul.msk.f32.vlgmr.msrb.gmra.mxu2 %vm920_vm9, %v12148_v44  ;;  %v12352_v45 = vsel %vm552_vm6, %v6611_v60, %v6610_v9 }
 0xfa9   : > { %10367 = vmatpush.xpose.msk.msrb.mxu2 %vm1197_vm10, %v12173_v49 }
 0xfaa   : > { %10365 = vmatpush.xpose.msk.msrb.mxu1 %vm1197_vm10, %v12185_v11  ;;  %10356 = vmatmul.msk.f32.vlgmr.msra.gmra.mxu0 %vm920_vm9, %v12153_v29 }
 0xfab   : > { %10354 = vmatmul.msk.f32.vlgmr.msrb.gmra.mxu3 %vm920_vm9, %v12158_v23  ;;  %10371 = vmatpush.xpose.msk.msra.mxu0 %vm1197_vm10, %v12188_v1 }
 0xfac   : > { %10369 = vmatpush.xpose.msk.msrb.mxu3 %vm1197_vm10, %v12191_v30 }
 0xfad   : > { %10358 = vmatmul.msk.f32.vlgmr.msra.gmra.mxu1 %vm920_vm9, %v12163_v7 }
 0xfae   : > { %10373 = vmatpush.xpose.msk.msra.mxu1 %vm1197_vm10, %v12200_v3 }
0x101f   : > { %v6226_v57 = vpop.f32.mrf.mxu0 }
0x1020   : > { %10364 = vmatmul.msk.f32.vlgmr.msrb.gmra.mxu0 %vm1197_vm10, %v6226_v57 }
0x1022   : > { %v6249_v50 = vpop.f32.mrf.mxu1 }
0x1023   : > { %v6180_v31 = vpop.f32.mrf.mxu2  ;;  %10366 = vmatmul.msk.f32.vlgmr.msrb.gmra.mxu1 %vm1197_vm10, %v6249_v50 }
0x1024   : > { %10360 = vmatmul.msk.f32.vlgmr.msra.gmra.mxu2 %vm1197_vm10, %v6180_v31 }
0x1025   : > { %6630 = vmatpush.msra.mxu2 %v12017_v59 }
0x1026   : > { %v6203_v35 = vpop.f32.mrf.mxu3 }
0x1027   : > { %10362 = vmatmul.msk.f32.vlgmr.msra.gmra.mxu3 %vm1197_vm10, %v6203_v35  ;;  %v6318_v48 = vpop.f32.mrf.mxu0 }
0x1028   : > { %10372 = vmatmul.msk.f32.vlgmr.msra.gmra.mxu0 %vm1197_vm10, %v6318_v48 }
0x102a   : > { %v6341_v43 = vpop.f32.mrf.mxu1 }
0x102b   : > { %v6272_v54 = vpop.f32.mrf.mxu2  ;;  %10374 = vmatmul.msk.f32.vlgmr.msra.gmra.mxu1 %vm1197_vm10, %v6341_v43 }
0x102c   : > { %10368 = vmatmul.msk.f32.vlgmr.msrb.gmra.mxu2 %vm1197_vm10, %v6272_v54 }
0x102e   : > { %v6295_v12 = vpop.f32.mrf.mxu3 }
0x102f   : > { %10370 = vmatmul.msk.f32.vlgmr.msrb.gmra.mxu3 %vm1197_vm10, %v6295_v12 }
0x1034   : > { %10375 = vmatmul.msk.f32.vlgmr.msra.gmra.mxu2 %vm920_vm9, %v12352_v45 }
0x109d   : > { %v6410_v57 = vpop.f32.mrf.mxu0 }
0x109e   : > { %v6528_v24 = vrot.slane %v6410_v57, 4 }
0x10a0   : > { %v6433_v41 = vpop.f32.mrf.mxu1 }
0x10a1   : > { %v6534_v63 = vrot.slane %v6433_v41, 4 }
0x10a5   : > { %v6502_v6 = vpop.f32.mrf.mxu0 }
0x10a6   : > { %v6540_v62 = vrot.slane %v6502_v6, 4 }
0x10a7   : > { %v6364_v50 = vpop.f32.mrf.mxu2 }
0x10a8   : > { %v6525_v37 = vpop.f32.mrf.mxu1  ;;  %v6529_v17 = vsel %vm600_vm8, %v6528_v24, %v6364_v50 }
0x10a9   : > { %v6546_v43 = vrot.slane %v6525_v37, 4  ;;  %v12368_v57 = vperm.slane %v6529_v17, %v10804_v33 }
0x10aa   : > { %v6387_v31 = vpop.f32.mrf.mxu3 }
0x10ab   : > { %v6535_v35 = vsel %vm600_vm8, %v6534_v63, %v6387_v31  ;;  %13506 = vst [vmem:[#allocation52_spill] sm:$0xff] %v12368_v57 }
0x10ac   : > { %v12358_v52 = vperm.slane %v6535_v35, %v10804_v33 }
0x10ae   : > { %13504 = vst [vmem:[#allocation50_spill] sm:$0xff] %v12358_v52  ;;  %v6552_v9 = vrot.slane %v12358_v52, 4 }
0x10af   : > { %v6456_v48 = vpop.f32.mrf.mxu2 }
0x10b0   : > { %v6541_v60 = vsel %vm600_vm8, %v6540_v62, %v6456_v48  ;;  %v6553_v50 = vsel %vm600_vm8, %v6552_v9, %v12368_v57 }
0x10b1   : > { %v12371_v63 = vperm.slane %v6541_v60, %v10804_v33  ;;  %v12385_v24 = vperm.slane %v6553_v50, %v10817_v58 }
0x10b2   : > { %v6479_v54 = vpop.f32.mrf.mxu3 }
0x10b3   : > { %v6547_v12 = vsel %vm600_vm8, %v6546_v43, %v6479_v54  ;;  %13507 = vst [vmem:[#allocation53_spill] sm:$0xff] %v12371_v63 }
0x10b4   : > { %v12365_v41 = vperm.slane %v6547_v12, %v10804_v33  ;;  %13509 = vst [vmem:[#allocation55_spill] sm:$0xff] %v12385_v24 }
0x10b6   : > { %13505 = vst [vmem:[#allocation51_spill] sm:$0xff] %v12365_v41  ;;  %v6564_v31 = vrot.slane %v12365_v41, 4 }
0x10b7   : > { %v6632_v6 = vpop.f32.mrf.mxu2 }
0x10b8   : > { %6639 = vrot.lane.b32.xlu1 %v6632_v6, %s10662_s24  ;;  %6636 = vrot.lane.b32.xlu0 %v6632_v6, %s10671_s21  ;;  %v6565_v37 = vsel %vm600_vm8, %v6564_v31, %v12371_v63  ;;  %v6647_v17 = vrot.slane %v6632_v6, 4 }
0x10b9   : > { %6642 = vrot.lane.b32.xlu2 %v6632_v6, %s10672_s22  ;;  %v12382_v35 = vperm.slane %v6565_v37, %v10817_v58 }
0x10bb   : > { %13508 = vst [vmem:[#allocation54_spill] sm:$0xff] %v12382_v35  ;;  %v6576_v62 = vrot.slane %v12382_v35, 4 }
0x10bd   : > { %v12390_v48 = vsel %vm600_vm8, %v6576_v62, %v12385_v24 }
0x10be   : > { %13510 = vst [vmem:[#allocation56_spill] sm:$0xff] %v12390_v48 }
0x1113   : > { %v6643_v43 = vpop.permute.xlu2 %6642 }
0x1114   : > { %v6657_v54 = vrot.slane %v6643_v43, 4 }
0x112a   : > { %v6640_v60 = vpop.permute.xlu1 %6639  ;;  %v6637_v12 = vpop.permute.xlu0 %6636 }
0x112b   : > { %v6645_v9 = vrot.slane %v6640_v60, 4  ;;  %v6648_v31 = vsel %vm600_vm8, %v6640_v60, %v6647_v17  ;;  %v6658_v37 = vsel %vm600_vm8, %v6657_v54, %v6637_v12  ;;  %v6659_v52 = vrot.slane %v6637_v12, 4 }
0x112c   : > { %v6656_v50 = vperm.slane %v6648_v31, %v10804_v33  ;;  %v6664_v57 = vperm.slane %v6658_v37, %v10804_v33 }
0x112d   : > { %v6646_v35 = vsel %vm600_vm8, %v6645_v9, %v6632_v6  ;;  %v6660_v62 = vsel %vm600_vm8, %v6643_v43, %v6659_v52 }
0x112e   : > { %v6652_v48 = vperm.slane %v6646_v35, %v10804_v33  ;;  %v6683_v24 = vrot.slane %v6656_v50, 4  ;;  %v6668_v41 = vperm.slane %v6660_v62, %v10804_v33  ;;  %v6669_v63 = vrot.slane %v6664_v57, 4 }
0x112f   : > { %v7141_v62 = vrot.slane %v11999_v10, 2 }
0x1130   : > { %v6671_v5 = vrot.slane %v6652_v48, 4  ;;  %v6670_v17 = vsel %vm600_vm8, %v6669_v63, %v6652_v48  ;;  %v6681_v60 = vrot.slane %v6668_v41, 4  ;;  %v6684_v54 = vsel %vm600_vm8, %v6668_v41, %v6683_v24 }
0x1131   : > { %v6676_v12 = vperm.slane %v6670_v17, %v10817_v58  ;;  %v6692_v31 = vperm.slane %v6684_v54, %v10817_v58  ;;  %v7143_v17 = vrot.slane %v12001_v34, 1  ;;  %v7148_v34 = vrot.slane %v12022_v42, 6 }
0x1132   : > { %v6672_v6 = vsel %vm600_vm8, %v6664_v57, %v6671_v5  ;;  %v6682_v52 = vsel %vm600_vm8, %v6681_v60, %v6656_v50  ;;  %v7140_v50 = vrot.slane %v12004_v4, 3 }
0x1133   : > { %v6680_v35 = vperm.slane %v6672_v6, %v10817_v58  ;;  %10376 = vmatpush.xpose.msk.msra.mxu3 %vm920_vm9, %v6676_v12  ;;  %v6688_v43 = vperm.slane %v6682_v52, %v10817_v58  ;;  %v6693_v9 = vrot.slane %v6676_v12, 4  ;;  %v6699_v37 = vrot.slane %v6692_v31, 4 }
0x1134   : > { %v7142_v60 = vsel %vm534_vm0, %v7141_v62, %v7140_v50  ;;  %v7146_v52 = vrot.slane %v12011_v39, 7 }
0x1135   : > { %10380 = vmatpush.xpose.msk.msrb.mxu1 %vm920_vm9, %v6680_v35  ;;  %v6694_v41 = vsel %vm600_vm8, 0.0, %v6693_v9  ;;  %v6695_v63 = vrot.slane %v6680_v35, 4  ;;  %v6697_v24 = vrot.slane %v6688_v43, 4  ;;  %v6700_v48 = vsel %vm600_vm8, 0.0, %v6699_v37 }
0x1136   : > { %10377 = vmatmul.msk.f32.vlgmr.msra.gmra.mxu3 %vm920_vm9, %v12114_v47  ;;  %10378 = vmatpush.xpose.msk.msrb.mxu0 %vm920_vm9, %v6694_v41  ;;  %v7150_v37 = vrot.slane %v12027_v16, 5 }
0x1137   : > { %10384 = vmatpush.xpose.msk.msrb.mxu3 %vm920_vm9, %v6688_v43  ;;  %v6696_v5 = vsel %vm600_vm8, 0.0, %v6695_v63  ;;  %v6698_v57 = vsel %vm600_vm8, 0.0, %v6697_v24 }
0x1138   : > { %10382 = vmatpush.xpose.msk.msrb.mxu2 %vm920_vm9, %v6696_v5  ;;  %10381 = vmatmul.msk.f32.vlgmr.msrb.gmra.mxu1 %vm920_vm9, %v12123_v8 }
0x1139   : > { %10388 = vmatpush.xpose.msk.msra.mxu1 %vm920_vm9, %v6692_v31  ;;  %10379 = vmatmul.msk.f32.vlgmr.msrb.gmra.mxu0 %vm920_vm9, %v12132_v20  ;;  %v7144_v31 = vsel %vm537_vm1, %v7143_v17, %v7142_v60 }
0x113a   : > { %10386 = vmatpush.xpose.msk.msra.mxu0 %vm920_vm9, %v6698_v57  ;;  %v7145_v10 = vsel %vm540_vm2, %v12006_v38, %v7144_v31  ;;  %v7152_v38 = vrot.slane %v12032_v46, 4  ;;  %vm9856_vm2 = vcmask 523264  }
0x113b   : > { %10392 = vmatpush.xpose.msk.msra.mxu3 %vm1197_vm10, %v12117_v18  ;;  %10383 = vmatmul.msk.f32.vlgmr.msrb.gmra.mxu2 %vm920_vm9, %v12141_v53  ;;  %v7147_v43 = vsel %vm543_vm3, %v7146_v52, %v7145_v10 }
0x113c   : > { %10390 = vmatpush.xpose.msk.msra.mxu2 %vm920_vm9, %v6700_v48 }
0x113d   : > { %10396 = vmatpush.xpose.msk.msrb.mxu1 %vm1197_vm10, %v12170_v56 }
0x113e   : > { %10394 = vmatpush.xpose.msk.msrb.mxu0 %vm1197_vm10, %v12176_v55  ;;  %10385 = vmatmul.msk.f32.vlgmr.msrb.gmra.mxu3 %vm920_vm9, %v12148_v44 }
0x113f   : > { %10400 = vmatpush.xpose.msk.msrb.mxu3 %vm1197_vm10, %v12173_v49 }
0x1140   : > { %10398 = vmatpush.xpose.msk.msrb.mxu2 %vm1197_vm10, %v12185_v11  ;;  %10389 = vmatmul.msk.f32.vlgmr.msra.gmra.mxu1 %vm920_vm9, %v12153_v29 }
0x1141   : > { %10387 = vmatmul.msk.f32.vlgmr.msra.gmra.mxu0 %vm920_vm9, %v12158_v23  ;;  %10404 = vmatpush.xpose.msk.msra.mxu1 %vm1197_vm10, %v12188_v1 }
0x1142   : > { %10402 = vmatpush.xpose.msk.msra.mxu0 %vm1197_vm10, %v12191_v30 }
0x1143   : > { %10391 = vmatmul.msk.f32.vlgmr.msra.gmra.mxu2 %vm920_vm9, %v12163_v7 }
0x1144   : > { %10406 = vmatpush.xpose.msk.msra.mxu2 %vm1197_vm10, %v12200_v3 }
0x11b5   : > { %v6767_v54 = vpop.f32.mrf.mxu1 }
0x11b6   : > { %10397 = vmatmul.msk.f32.vlgmr.msrb.gmra.mxu1 %vm1197_vm10, %v6767_v54  ;;  %v6744_v12 = vpop.f32.mrf.mxu0 }
0x11b7   : > { %10395 = vmatmul.msk.f32.vlgmr.msrb.gmra.mxu0 %vm1197_vm10, %v6744_v12 }
0x11b9   : > { %v6721_v6 = vpop.f32.mrf.mxu3 }
0x11ba   : > { %10393 = vmatmul.msk.f32.vlgmr.msra.gmra.mxu3 %vm1197_vm10, %v6721_v6 }
0x11bb   : > { %7171 = vmatpush.msra.mxu3 %v12017_v59  ;;  %v7149_v59 = vsel %vm546_vm4, %v7148_v34, %v7147_v43 }
0x11bc   : > { %v7151_v42 = vsel %vm549_vm5, %v7150_v37, %v7149_v59 }
0x11bd   : > { %v6859_v35 = vpop.f32.mrf.mxu1  ;;  %v12476_v63 = vsel %vm552_vm6, %v7152_v38, %v7151_v42 }
0x11be   : > { %v6790_v4 = vpop.f32.mrf.mxu2  ;;  %10405 = vmatmul.msk.f32.vlgmr.msra.gmra.mxu1 %vm1197_vm10, %v6859_v35  ;;  %v6836_v9 = vpop.f32.mrf.mxu0 }
0x11bf   : > { %10399 = vmatmul.msk.f32.vlgmr.msrb.gmra.mxu2 %vm1197_vm10, %v6790_v4  ;;  %10403 = vmatmul.msk.f32.vlgmr.msra.gmra.mxu0 %vm1197_vm10, %v6836_v9 }
0x11c1   : > { %v6813_v39 = vpop.f32.mrf.mxu3 }
0x11c2   : > { %10401 = vmatmul.msk.f32.vlgmr.msrb.gmra.mxu3 %vm1197_vm10, %v6813_v39 }
0x11c6   : > { %v6882_v41 = vpop.f32.mrf.mxu2 }
0x11c7   : > { %10407 = vmatmul.msk.f32.vlgmr.msra.gmra.mxu2 %vm1197_vm10, %v6882_v41 }
0x11ca   : > { %10408 = vmatmul.msk.f32.vlgmr.msra.gmra.mxu3 %vm920_vm9, %v12476_v63 }
0x1233   : > { %v6951_v16 = vpop.f32.mrf.mxu1 }
0x1234   : > { %v7069_v24 = vrot.slane %v6951_v16, 4  ;;  %v6928_v50 = vpop.f32.mrf.mxu0 }
0x123b   : > { %v7043_v48 = vpop.f32.mrf.mxu1 }
0x123c   : > { %v7081_v60 = vrot.slane %v7043_v48, 4  ;;  %v7020_v43 = vpop.f32.mrf.mxu0 }
0x123d   : > { %v6905_v5 = vpop.f32.mrf.mxu3 }
0x123e   : > { %v7070_v57 = vsel %vm600_vm8, %v7069_v24, %v6905_v5 }
0x123f   : > { %v7074_v46 = vperm.slane %v7070_v57, %v10804_v33 }
0x1241   : > { %v7095_v31 = vrot.slane %v7074_v46, 4 }
0x1242   : > { %v6974_v62 = vpop.f32.mrf.mxu2 }
0x1243   : > { %v7075_v17 = vrot.slane %v6974_v62, 4 }
0x1245   : > { %v7076_v54 = vsel %vm600_vm8, %v7075_v17, %v6928_v50  ;;  %v6997_v12 = vpop.f32.mrf.mxu3 }
0x1246   : > { %v7080_v6 = vperm.slane %v7076_v54, %v10804_v33  ;;  %v7082_v52 = vsel %vm600_vm8, %v7081_v60, %v6997_v12 }
0x1247   : > { %v7086_v4 = vperm.slane %v7082_v52, %v10804_v33 }
0x1248   : > { %v7093_v10 = vrot.slane %v7080_v6, 4  ;;  %v7096_v34 = vsel %vm600_vm8, %v7080_v6, %v7095_v31 }
0x1249   : > { %v7104_v38 = vperm.slane %v7096_v34, %v10817_v58  ;;  %v7107_v42 = vrot.slane %v7086_v4, 4 }
0x124a   : > { %v7066_v35 = vpop.f32.mrf.mxu2  ;;  %v7094_v9 = vsel %vm600_vm8, %v7093_v10, %v7074_v46 }
0x124b   : > { %v7087_v37 = vrot.slane %v7066_v35, 4  ;;  %v7100_v16 = vperm.slane %v7094_v9, %v10817_v58  ;;  %v7123_v48 = vrot.slane %v7104_v38, 4 }
0x124d   : > { %v7088_v39 = vsel %vm600_vm8, %v7087_v37, %v7020_v43  ;;  %v7173_v59 = vpop.f32.mrf.mxu3  ;;  %v7119_v62 = vrot.slane %v7100_v16, 4 }
0x124e   : > { %v7092_v41 = vperm.slane %v7088_v39, %v10804_v33  ;;  %7180 = vrot.lane.b32.xlu1 %v7173_v59, %s10662_s24  ;;  %7177 = vrot.lane.b32.xlu0 %v7173_v59, %s10671_s21  ;;  %v7188_v34 = vrot.slane %v7173_v59, 4 }
0x124f   : > { %7183 = vrot.lane.b32.xlu2 %v7173_v59, %s10672_s22 }
0x1250   : > { %v7105_v24 = vrot.slane %v7092_v41, 4  ;;  %v7108_v5 = vsel %vm600_vm8, %v7092_v41, %v7107_v42 }
0x1251   : > { %v7116_v57 = vperm.slane %v7108_v5, %v10817_v58 }
0x1252   : > { %v7106_v50 = vsel %vm600_vm8, %v7105_v24, %v7086_v4 }
0x1253   : > { %v7112_v46 = vperm.slane %v7106_v50, %v10817_v58  ;;  %v12500_v17 = vsel %vm600_vm8, %v7116_v57, %v7123_v48  ;;  %v7121_v60 = vrot.slane %v7116_v57, 4 }
0x1255   : > { %v7117_v54 = vrot.slane %v7112_v46, 4  ;;  %v12503_v12 = vsel %vm600_vm8, %v7112_v46, %v7119_v62  ;;  %v12506_v31 = vsel %vm600_vm8, %v7121_v60, %v7104_v38 }
0x1257   : > { %v12509_v6 = vsel %vm600_vm8, %v7117_v54, %v7100_v16 }
0x1258   : > { %13511 = vst [vmem:[#allocation57_spill] sm:$0xff] %v12509_v6 }
0x12a9   : > { %v7184_v52 = vpop.permute.xlu2 %7183 }
0x12aa   : > { %v7198_v10 = vrot.slane %v7184_v52, 4 }
0x12c0   : > { %v7181_v4 = vpop.permute.xlu1 %7180  ;;  %v7178_v35 = vpop.permute.xlu0 %7177 }
0x12c1   : > { %v7186_v43 = vrot.slane %v7181_v4, 4  ;;  %v7189_v9 = vsel %vm600_vm8, %v7181_v4, %v7188_v34  ;;  %v7199_v37 = vsel %vm600_vm8, %v7198_v10, %v7178_v35  ;;  %v7200_v39 = vrot.slane %v7178_v35, 4 }
0x12c2   : > { %v7197_v42 = vperm.slane %v7189_v9, %v10804_v33  ;;  %v7205_v41 = vperm.slane %v7199_v37, %v10804_v33 }
0x12c3   : > { %v7187_v38 = vsel %vm600_vm8, %v7186_v43, %v7173_v59  ;;  %v7201_v16 = vsel %vm600_vm8, %v7184_v52, %v7200_v39 }
0x12c4   : > { %v7193_v24 = vperm.slane %v7187_v38, %v10804_v33  ;;  %v7224_v5 = vrot.slane %v7197_v42, 4  ;;  %v7209_v57 = vperm.slane %v7201_v16, %v10804_v33  ;;  %v7210_v48 = vrot.slane %v7205_v41, 4 }
0x12c6   : > { %v7212_v50 = vrot.slane %v7193_v24, 4  ;;  %v7211_v46 = vsel %vm600_vm8, %v7210_v48, %v7193_v24  ;;  %v7222_v62 = vrot.slane %v7209_v57, 4  ;;  %v7225_v60 = vsel %vm600_vm8, %v7209_v57, %v7224_v5 }
0x12c7   : > { %v7217_v54 = vperm.slane %v7211_v46, %v10817_v58  ;;  %v7233_v10 = vperm.slane %v7225_v60, %v10817_v58 }
0x12c8   : > { %v7213_v59 = vsel %vm600_vm8, %v7205_v41, %v7212_v50  ;;  %v7223_v52 = vsel %vm600_vm8, %v7222_v62, %v7197_v42 }
0x12c9   : > { %v7221_v34 = vperm.slane %v7213_v59, %v10817_v58  ;;  %10409 = vmatpush.xpose.msk.msrb.mxu0 %vm920_vm9, %v7217_v54  ;;  %v7229_v4 = vperm.slane %v7223_v52, %v10817_v58  ;;  %v7234_v35 = vrot.slane %v7217_v54, 4  ;;  %v7240_v43 = vrot.slane %v7233_v10, 4 }
0x12cb   : > { %10413 = vmatpush.xpose.msk.msrb.mxu2 %vm920_vm9, %v7221_v34  ;;  %v7235_v9 = vsel %vm600_vm8, 0.0, %v7234_v35  ;;  %v7236_v37 = vrot.slane %v7221_v34, 4  ;;  %v7238_v39 = vrot.slane %v7229_v4, 4  ;;  %v7241_v38 = vsel %vm600_vm8, 0.0, %v7240_v43 }
0x12cc   : > { %10410 = vmatmul.msk.f32.vlgmr.msrb.gmra.mxu0 %vm920_vm9, %v12114_v47  ;;  %10411 = vmatpush.xpose.msk.msrb.mxu1 %vm920_vm9, %v7235_v9  ;;  %v12574_v47 = vld [vmem:[%s13408_s8 + $0x8] sm:$0xff] }
0x12cd   : > { %10417 = vmatpush.xpose.msk.msra.mxu0 %vm920_vm9, %v7229_v4  ;;  %v7237_v42 = vsel %vm600_vm8, 0.0, %v7236_v37  ;;  %v7239_v41 = vsel %vm600_vm8, 0.0, %v7238_v39 }
0x12ce   : > { %10414 = vmatmul.msk.f32.vlgmr.msrb.gmra.mxu2 %vm920_vm9, %v12123_v8  ;;  %10415 = vmatpush.xpose.msk.msrb.mxu3 %vm920_vm9, %v7237_v42 }
0x12cf   : > { %10421 = vmatpush.xpose.msk.msra.mxu2 %vm920_vm9, %v7233_v10  ;;  %10412 = vmatmul.msk.f32.vlgmr.msrb.gmra.mxu1 %vm920_vm9, %v12132_v20 }
0x12d0   : > { %10419 = vmatpush.xpose.msk.msra.mxu1 %vm920_vm9, %v7239_v41 }
0x12d1   : > { %10425 = vmatpush.xpose.msk.msrb.mxu0 %vm1197_vm10, %v12117_v18  ;;  %10416 = vmatmul.msk.f32.vlgmr.msrb.gmra.mxu3 %vm920_vm9, %v12141_v53 }
0x12d2   : > { %10423 = vmatpush.xpose.msk.msra.mxu3 %vm920_vm9, %v7241_v38 }
0x12d3   : > { %10429 = vmatpush.xpose.msk.msrb.mxu2 %vm1197_vm10, %v12170_v56 }
0x12d4   : > { %10427 = vmatpush.xpose.msk.msrb.mxu1 %vm1197_vm10, %v12176_v55  ;;  %10418 = vmatmul.msk.f32.vlgmr.msra.gmra.mxu0 %vm920_vm9, %v12148_v44 }
0x12d5   : > { %10433 = vmatpush.xpose.msk.msra.mxu0 %vm1197_vm10, %v12173_v49 }
0x12d6   : > { %10431 = vmatpush.xpose.msk.msrb.mxu3 %vm1197_vm10, %v12185_v11  ;;  %10422 = vmatmul.msk.f32.vlgmr.msra.gmra.mxu2 %vm920_vm9, %v12153_v29 }
0x12d7   : > { %10437 = vmatpush.xpose.msk.msra.mxu2 %vm1197_vm10, %v12188_v1  ;;  %10420 = vmatmul.msk.f32.vlgmr.msra.gmra.mxu1 %vm920_vm9, %v12158_v23 }
0x12d8   : > { %10435 = vmatpush.xpose.msk.msra.mxu1 %vm1197_vm10, %v12191_v30 }
0x12d9   : > { %10424 = vmatmul.msk.f32.vlgmr.msra.gmra.mxu3 %vm920_vm9, %v12163_v7 }
0x12da   : > { %10439 = vmatpush.xpose.msk.msra.mxu3 %vm1197_vm10, %v12200_v3 }
0x1349   : > { %v7262_v18 = vpop.f32.mrf.mxu0 }
0x134a   : > { %10426 = vmatmul.msk.f32.vlgmr.msrb.gmra.mxu0 %vm1197_vm10, %v7262_v18 }
0x134b   : > { %7713 = vmatpush.msrb.mxu0 %v12574_v47 }
0x134c   : > { %v7285_v8 = vpop.f32.mrf.mxu1 }
0x134d   : > { %10428 = vmatmul.msk.f32.vlgmr.msrb.gmra.mxu1 %vm1197_vm10, %v7285_v8 }
0x1351   : > { %v7308_v20 = vpop.f32.mrf.mxu2  ;;  %v7354_v53 = vpop.f32.mrf.mxu0 }
0x1352   : > { %10430 = vmatmul.msk.f32.vlgmr.msrb.gmra.mxu2 %vm1197_vm10, %v7308_v20  ;;  %10434 = vmatmul.msk.f32.vlgmr.msra.gmra.mxu0 %vm1197_vm10, %v7354_v53 }
0x1354   : > { %v7331_v44 = vpop.f32.mrf.mxu3  ;;  %v7377_v29 = vpop.f32.mrf.mxu1 }
0x1355   : > { %10432 = vmatmul.msk.f32.vlgmr.msrb.gmra.mxu3 %vm1197_vm10, %v7331_v44  ;;  %10436 = vmatmul.msk.f32.vlgmr.msra.gmra.mxu1 %vm1197_vm10, %v7377_v29 }
0x1359   : > { %v7400_v23 = vpop.f32.mrf.mxu2 }
0x135a   : > { %10438 = vmatmul.msk.f32.vlgmr.msra.gmra.mxu2 %vm1197_vm10, %v7400_v23  ;;  %10442 = vmatmul.msk.f32.vlgmr.msrb.gmra.mxu0 %vm920_vm9, %v12042_v25 }
0x135c   : > { %v7423_v7 = vpop.f32.mrf.mxu3 }
0x135d   : > { %10440 = vmatmul.msk.f32.vlgmr.msra.gmra.mxu3 %vm1197_vm10, %v7423_v7 }
0x13c7   : > { %v7446_v16 = vpop.f32.mrf.mxu0 }
0x13ca   : > { %v7469_v48 = vpop.f32.mrf.mxu1 }
0x13cf   : > { %v7538_v24 = vpop.f32.mrf.mxu0 }
0x13d2   : > { %v7561_v37 = vpop.f32.mrf.mxu1 }
0x13d5   : > { %v7492_v5 = vpop.f32.mrf.mxu2 }
0x13d6   : > { %v7610_v57 = vrot.slane %v7492_v5, 4 }
0x13d7   : > { %v7715_v50 = vpop.f32.mrf.mxu0 }
0x13d8   : > { %v7611_v46 = vsel %vm600_vm8, %v7610_v57, %v7446_v16  ;;  %v7515_v62 = vpop.f32.mrf.mxu3  ;;  %7722 = vrot.lane.b32.xlu1 %v7715_v50, %s10662_s24  ;;  %7719 = vrot.lane.b32.xlu0 %v7715_v50, %s10671_s21 }
0x13d9   : > { %v7615_v60 = vperm.slane %v7611_v46, %v10804_v33  ;;  %v7616_v54 = vrot.slane %v7515_v62, 4  ;;  %7725 = vrot.lane.b32.xlu2 %v7715_v50, %s10672_s22 }
0x13db   : > { %v7636_v25 = vrot.slane %v7615_v60, 4  ;;  %v7617_v10 = vsel %vm600_vm8, %v7616_v54, %v7469_v48 }
0x13dc   : > { %v7621_v59 = vperm.slane %v7617_v10, %v10804_v33 }
0x13dd   : > { %v7584_v52 = vpop.f32.mrf.mxu2 }
0x13de   : > { %v7634_v34 = vrot.slane %v7621_v59, 4  ;;  %v7637_v4 = vsel %vm600_vm8, %v7621_v59, %v7636_v25  ;;  %v7622_v35 = vrot.slane %v7584_v52, 4  ;;  %v7730_v59 = vrot.slane %v7715_v50, 4 }
0x13df   : > { %v7645_v8 = vperm.slane %v7637_v4, %v10817_v58 }
0x13e0   : > { %v7623_v43 = vsel %vm600_vm8, %v7622_v35, %v7538_v24  ;;  %v7607_v9 = vpop.f32.mrf.mxu3  ;;  %v7635_v39 = vsel %vm600_vm8, %v7634_v34, %v7615_v60 }
0x13e1   : > { %v7627_v42 = vperm.slane %v7623_v43, %v10804_v33  ;;  %v7628_v41 = vrot.slane %v7607_v9, 4  ;;  %v7641_v53 = vperm.slane %v7635_v39, %v10817_v58  ;;  %v7664_v7 = vrot.slane %v7645_v8, 4 }
0x13e3   : > { %v7648_v38 = vrot.slane %v7627_v42, 4  ;;  %v7629_v18 = vsel %vm600_vm8, %v7628_v41, %v7561_v37  ;;  %v7660_v5 = vrot.slane %v7641_v53, 4 }
0x13e4   : > { %v7633_v20 = vperm.slane %v7629_v18, %v10804_v33 }
0x13e6   : > { %v7646_v44 = vrot.slane %v7633_v20, 4  ;;  %v7649_v29 = vsel %vm600_vm8, %v7633_v20, %v7648_v38 }
0x13e7   : > { %v7657_v23 = vperm.slane %v7649_v29, %v10817_v58 }
0x13e8   : > { %v7647_v16 = vsel %vm600_vm8, %v7646_v44, %v7627_v42 }
0x13e9   : > { %v7653_v24 = vperm.slane %v7647_v16, %v10817_v58  ;;  %v12607_v57 = vsel %vm600_vm8, %v7657_v23, %v7664_v7  ;;  %v7662_v48 = vrot.slane %v7657_v23, 4 }
0x13eb   : > { %v7658_v46 = vrot.slane %v7653_v24, 4  ;;  %v12610_v62 = vsel %vm600_vm8, %v7653_v24, %v7660_v5  ;;  %v12613_v60 = vsel %vm600_vm8, %v7662_v48, %v7645_v8 }
0x13ed   : > { %v12616_v54 = vsel %vm600_vm8, %v7658_v46, %v7641_v53 }
0x13ee   : > { %13512 = vst [vmem:[#allocation58_spill] sm:$0xff] %v12616_v54 }
0x1433   : > { %v7726_v25 = vpop.permute.xlu2 %7725 }
0x1434   : > { %v7740_v10 = vrot.slane %v7726_v25, 4 }
0x144a   : > { %v7723_v52 = vpop.permute.xlu1 %7722  ;;  %v7720_v34 = vpop.permute.xlu0 %7719 }
0x144b   : > { %v7728_v4 = vrot.slane %v7723_v52, 4  ;;  %v7731_v35 = vsel %vm600_vm8, %v7723_v52, %v7730_v59  ;;  %v7741_v43 = vsel %vm600_vm8, %v7740_v10, %v7720_v34  ;;  %v7742_v9 = vrot.slane %v7720_v34, 4  ;;  %v12639_v34 = vld [vmem:[%s12098_s12] sm:$0xf] }
0x144c   : > { %v7739_v37 = vperm.slane %v7731_v35, %v10804_v33  ;;  %v7747_v39 = vperm.slane %v7741_v43, %v10804_v33  ;;  %v12648_v43 = vld [vmem:[%s12106_s27] sm:$0xf] }
0x144d   : > { %v7729_v42 = vsel %vm600_vm8, %v7728_v4, %v7715_v50  ;;  %v7743_v41 = vsel %vm600_vm8, %v7726_v25, %v7742_v9  ;;  %v12653_v9 = vld [vmem:[%s12098_s12 + $0x8] sm:$0xf] }
0x144e   : > { %v7735_v38 = vperm.slane %v7729_v42, %v10804_v33  ;;  %v7766_v18 = vrot.slane %v7739_v37, 4  ;;  %v7751_v8 = vperm.slane %v7743_v41, %v10804_v33  ;;  %v7752_v20 = vrot.slane %v7747_v39, 4  ;;  %v12669_v42 = vld [vmem:[%s12098_s12 + $0xc] sm:$0xf]  ;;  %v12678_v41 = vld [vmem:[%s12098_s12 + $0x10] sm:$0xf] }
0x1450   : > { %v7754_v53 = vrot.slane %v7735_v38, 4  ;;  %v7753_v44 = vsel %vm600_vm8, %v7752_v20, %v7735_v38  ;;  %v7764_v29 = vrot.slane %v7751_v8, 4  ;;  %v7767_v23 = vsel %vm600_vm8, %v7751_v8, %v7766_v18 }
0x1451   : > { %v7759_v7 = vperm.slane %v7753_v44, %v10817_v58  ;;  %v7775_v16 = vperm.slane %v7767_v23, %v10817_v58 }
0x1452   : > { %v7755_v50 = vsel %vm600_vm8, %v7747_v39, %v7754_v53  ;;  %v7765_v24 = vsel %vm600_vm8, %v7764_v29, %v7739_v37  ;;  %v12662_v39 = vld [vmem:[%s12098_s12 + $0x4] sm:$0xf] }
0x1453   : > { %v7763_v5 = vperm.slane %v7755_v50, %v10817_v58  ;;  %10443 = vmatpush.xpose.msk.msrb.mxu1 %vm920_vm9, %v7759_v7  ;;  %v7771_v48 = vperm.slane %v7765_v24, %v10817_v58  ;;  %v7776_v46 = vrot.slane %v7759_v7, 4  ;;  %v7782_v25 = vrot.slane %v7775_v16, 4 }
0x1455   : > { %10447 = vmatpush.xpose.msk.msrb.mxu3 %vm920_vm9, %v7763_v5  ;;  %v7777_v10 = vsel %vm600_vm8, 0.0, %v7776_v46  ;;  %v7778_v59 = vrot.slane %v7763_v5, 4  ;;  %v7780_v52 = vrot.slane %v7771_v48, 4  ;;  %v7783_v37 = vsel %vm600_vm8, 0.0, %v7782_v25 }
0x1456   : > { %10444 = vmatmul.msk.f32.vlgmr.msrb.gmra.mxu1 %vm920_vm9, %v12639_v34  ;;  %10445 = vmatpush.xpose.msk.msrb.mxu2 %vm920_vm9, %v7777_v10 }
0x1457   : > { %10451 = vmatpush.xpose.msk.msra.mxu1 %vm920_vm9, %v7771_v48  ;;  %v7779_v4 = vsel %vm600_vm8, 0.0, %v7778_v59  ;;  %v7781_v35 = vsel %vm600_vm8, 0.0, %v7780_v52 }
0x1458   : > { %10448 = vmatmul.msk.f32.vlgmr.msrb.gmra.mxu3 %vm920_vm9, %v12653_v9  ;;  %10449 = vmatpush.xpose.msk.msra.mxu0 %vm920_vm9, %v7779_v4 }
0x1459   : > { %10455 = vmatpush.xpose.msk.msra.mxu3 %vm920_vm9, %v7775_v16  ;;  %10446 = vmatmul.msk.f32.vlgmr.msrb.gmra.mxu2 %vm920_vm9, %v12662_v39 }
0x145a   : > { %10453 = vmatpush.xpose.msk.msra.mxu2 %vm920_vm9, %v7781_v35 }
0x145b   : > { %10459 = vmatpush.xpose.msk.msrb.mxu1 %vm1197_vm10, %v12648_v43  ;;  %10450 = vmatmul.msk.f32.vlgmr.msra.gmra.mxu0 %vm920_vm9, %v12669_v42 }
0x145c   : > { %10457 = vmatpush.xpose.msk.msrb.mxu0 %vm920_vm9, %v7783_v37 }
0x145d   : > { %10463 = vmatpush.xpose.msk.msrb.mxu3 %vm1197_vm10, %v12170_v56  ;;  %v12685_v56 = vld [vmem:[%s12098_s12 + $0x18] sm:$0xf] }
0x145e   : > { %10461 = vmatpush.xpose.msk.msrb.mxu2 %vm1197_vm10, %v12176_v55  ;;  %10452 = vmatmul.msk.f32.vlgmr.msra.gmra.mxu1 %vm920_vm9, %v12678_v41  ;;  %v12692_v55 = vld [vmem:[%s12098_s12 + $0x14] sm:$0xf] }
0x145f   : > { %10467 = vmatpush.xpose.msk.msra.mxu1 %vm1197_vm10, %v12173_v49 }
0x1460   : > { %10465 = vmatpush.xpose.msk.msra.mxu0 %vm1197_vm10, %v12185_v11  ;;  %10456 = vmatmul.msk.f32.vlgmr.msra.gmra.mxu3 %vm920_vm9, %v12685_v56  ;;  %v12697_v11 = vld [vmem:[%s12098_s12 + $0x1c] sm:$0xf] }
0x1461   : > { %10471 = vmatpush.xpose.msk.msra.mxu3 %vm1197_vm10, %v12188_v1  ;;  %10454 = vmatmul.msk.f32.vlgmr.msra.gmra.mxu2 %vm920_vm9, %v12692_v55 }
0x1462   : > { %10469 = vmatpush.xpose.msk.msra.mxu2 %vm1197_vm10, %v12191_v30 }
0x1463   : > { %10458 = vmatmul.msk.f32.vlgmr.msrb.gmra.mxu0 %vm920_vm9, %v12697_v11 }
0x1464   : > { %10473 = vmatpush.xpose.msk.msrb.mxu0 %vm1197_vm10, %v12200_v3 }
0x14d3   : > { %v7804_v49 = vpop.f32.mrf.mxu1 }
0x14d4   : > { %10460 = vmatmul.msk.f32.vlgmr.msrb.gmra.mxu1 %vm1197_vm10, %v7804_v49 }
0x14d5   : > { %8238 = vmatpush.msrb.mxu1 %v12574_v47 }
0x14d8   : > { %v7873_v1 = vpop.f32.mrf.mxu0 }
0x14d9   : > { %10466 = vmatmul.msk.f32.vlgmr.msra.gmra.mxu0 %vm1197_vm10, %v7873_v1 }
0x14db   : > { %v7850_v38 = vpop.f32.mrf.mxu3  ;;  %v7896_v18 = vpop.f32.mrf.mxu1 }
0x14dc   : > { %10464 = vmatmul.msk.f32.vlgmr.msrb.gmra.mxu3 %vm1197_vm10, %v7850_v38  ;;  %10468 = vmatmul.msk.f32.vlgmr.msra.gmra.mxu1 %vm1197_vm10, %v7896_v18  ;;  %v7827_v8 = vpop.f32.mrf.mxu2 }
0x14dd   : > { %10462 = vmatmul.msk.f32.vlgmr.msrb.gmra.mxu2 %vm1197_vm10, %v7827_v8 }
0x14e0   : > { %v7965_v30 = vpop.f32.mrf.mxu0 }
0x14e1   : > { %10474 = vmatmul.msk.f32.vlgmr.msrb.gmra.mxu0 %vm1197_vm10, %v7965_v30 }
0x14e3   : > { %v7942_v3 = vpop.f32.mrf.mxu3 }
0x14e4   : > { %10472 = vmatmul.msk.f32.vlgmr.msra.gmra.mxu3 %vm1197_vm10, %v7942_v3  ;;  %10475 = vmatmul.msk.f32.vlgmr.msrb.gmra.mxu1 %vm920_vm9, %v12225_v61  ;;  %v7919_v20 = vpop.f32.mrf.mxu2 }
0x14e5   : > { %10470 = vmatmul.msk.f32.vlgmr.msra.gmra.mxu2 %vm1197_vm10, %v7919_v20 }
0x1551   : > { %v7988_v53 = vpop.f32.mrf.mxu1 }
0x1556   : > { %v8057_v29 = vpop.f32.mrf.mxu0 }
0x1557   : > { %v8158_v23 = vrot.slane %v8057_v29, 4 }
0x1559   : > { %v8080_v44 = vpop.f32.mrf.mxu1 }
0x155e   : > { %v8149_v25 = vpop.f32.mrf.mxu0 }
0x155f   : > { %v8034_v7 = vpop.f32.mrf.mxu3  ;;  %v8170_v52 = vrot.slane %v8149_v25, 4 }
0x1560   : > { %v8152_v16 = vrot.slane %v8034_v7, 4  ;;  %v8011_v50 = vpop.f32.mrf.mxu2 }
0x1561   : > { %v8240_v24 = vpop.f32.mrf.mxu1  ;;  %v8159_v48 = vsel %vm600_vm8, %v8158_v23, %v8011_v50 }
0x1562   : > { %v8153_v5 = vsel %vm600_vm8, %v8152_v16, %v7988_v53  ;;  %8247 = vrot.lane.b32.xlu1 %v8240_v24, %s10662_s24  ;;  %8244 = vrot.lane.b32.xlu0 %v8240_v24, %s10671_s21  ;;  %v8163_v46 = vperm.slane %v8159_v48, %v10804_v33 }
0x1563   : > { %v8157_v61 = vperm.slane %v8153_v5, %v10804_v33  ;;  %8250 = vrot.lane.b32.xlu2 %v8240_v24, %s10672_s22 }
0x1564   : > { %v8176_v59 = vrot.slane %v8163_v46, 4 }
0x1565   : > { %v8178_v10 = vrot.slane %v8157_v61, 4 }
0x1566   : > { %v8177_v35 = vsel %vm600_vm8, %v8176_v59, %v8157_v61 }
0x1567   : > { %v8126_v4 = vpop.f32.mrf.mxu3  ;;  %v8179_v37 = vsel %vm600_vm8, %v8163_v46, %v8178_v10  ;;  %v8183_v3 = vperm.slane %v8177_v35, %v10817_v58  ;;  %v8255_v35 = vrot.slane %v8240_v24, 4 }
0x1568   : > { %v8164_v49 = vrot.slane %v8126_v4, 4  ;;  %v8103_v1 = vpop.f32.mrf.mxu2  ;;  %v8187_v20 = vperm.slane %v8179_v37, %v10817_v58 }
0x1569   : > { %v8171_v18 = vsel %vm600_vm8, %v8170_v52, %v8103_v1  ;;  %v8202_v50 = vrot.slane %v8183_v3, 4 }
0x156a   : > { %v8165_v38 = vsel %vm600_vm8, %v8164_v49, %v8080_v44  ;;  %v8175_v30 = vperm.slane %v8171_v18, %v10804_v33  ;;  %v8206_v5 = vrot.slane %v8187_v20, 4 }
0x156b   : > { %v8169_v8 = vperm.slane %v8165_v38, %v10804_v33 }
0x156c   : > { %v8188_v29 = vrot.slane %v8175_v30, 4 }
0x156d   : > { %v8190_v53 = vrot.slane %v8169_v8, 4 }
0x156e   : > { %v8189_v7 = vsel %vm600_vm8, %v8188_v29, %v8169_v8 }
0x156f   : > { %v8191_v23 = vsel %vm600_vm8, %v8175_v30, %v8190_v53  ;;  %v8195_v16 = vperm.slane %v8189_v7, %v10817_v58 }
0x1570   : > { %v8199_v44 = vperm.slane %v8191_v23, %v10817_v58 }
0x1571   : > { %v8200_v48 = vrot.slane %v8195_v16, 4  ;;  %v12736_v61 = vsel %vm600_vm8, %v8195_v16, %v8202_v50 }
0x1572   : > { %v8204_v46 = vrot.slane %v8199_v44, 4  ;;  %v12739_v25 = vsel %vm600_vm8, %v8199_v44, %v8206_v5 }
0x1573   : > { %13513 = vst [vmem:[#allocation59_spill] sm:$0xff] %v12739_v25  ;;  %v12742_v10 = vsel %vm600_vm8, %v8200_v48, %v8183_v3 }
0x1574   : > { %13514 = vst [vmem:[#allocation60_spill] sm:$0xff] %v12742_v10  ;;  %v12745_v59 = vsel %vm600_vm8, %v8204_v46, %v8187_v20 }
0x1575   : > { %13515 = vst [vmem:[#allocation61_spill] sm:$0xff] %v12745_v59 }
0x15bd   : > { %v8251_v52 = vpop.permute.xlu2 %8250 }
0x15be   : > { %v8265_v4 = vrot.slane %v8251_v52, 4 }
0x15d4   : > { %v8248_v37 = vpop.permute.xlu1 %8247  ;;  %v8245_v49 = vpop.permute.xlu0 %8244 }
0x15d5   : > { %v8253_v1 = vrot.slane %v8248_v37, 4  ;;  %v8256_v38 = vsel %vm600_vm8, %v8248_v37, %v8255_v35  ;;  %v8266_v18 = vsel %vm600_vm8, %v8265_v4, %v8245_v49  ;;  %v8267_v8 = vrot.slane %v8245_v49, 4 }
0x15d6   : > { %v8264_v30 = vperm.slane %v8256_v38, %v10804_v33  ;;  %v8272_v53 = vperm.slane %v8266_v18, %v10804_v33 }
0x15d7   : > { %v8254_v3 = vsel %vm600_vm8, %v8253_v1, %v8240_v24  ;;  %v8268_v20 = vsel %vm600_vm8, %v8251_v52, %v8267_v8 }
0x15d8   : > { %v8260_v29 = vperm.slane %v8254_v3, %v10804_v33  ;;  %v8291_v23 = vrot.slane %v8264_v30, 4  ;;  %v8276_v7 = vperm.slane %v8268_v20, %v10804_v33  ;;  %v8277_v16 = vrot.slane %v8272_v53, 4  ;;  %v12784_v20 = vld [vmem:[%s12106_s27 + $0x4] sm:$0xf] }
0x15da   : > { %v8279_v50 = vrot.slane %v8260_v29, 4  ;;  %v8278_v44 = vsel %vm600_vm8, %v8277_v16, %v8260_v29  ;;  %v8289_v5 = vrot.slane %v8276_v7, 4  ;;  %v8292_v48 = vsel %vm600_vm8, %v8276_v7, %v8291_v23  ;;  %v12791_v29 = vld [vmem:[%s12106_s27 + $0x8] sm:$0xf]  ;;  %v12796_v23 = vld [vmem:[%s12106_s27 + $0xc] sm:$0xf] }
0x15db   : > { %v8284_v46 = vperm.slane %v8278_v44, %v10817_v58  ;;  %v8300_v4 = vperm.slane %v8292_v48, %v10817_v58  ;;  %v12803_v7 = vld [vmem:[%s12106_s27 + $0x10] sm:$0xf]  ;;  %v12812_v16 = vld [vmem:[%s12106_s27 + $0x14] sm:$0xf]  ;;  %v12824_v44 = vld [vmem:[%s12106_s27 + $0x1c] sm:$0xf] }
0x15dc   : > { %v8280_v24 = vsel %vm600_vm8, %v8272_v53, %v8279_v50  ;;  %v8290_v52 = vsel %vm600_vm8, %v8289_v5, %v8264_v30  ;;  %v12819_v50 = vld [vmem:[%s12106_s27 + $0x18] sm:$0xf] }
0x15dd   : > { %v8288_v35 = vperm.slane %v8280_v24, %v10817_v58  ;;  %10476 = vmatpush.xpose.msk.msrb.mxu2 %vm920_vm9, %v8284_v46  ;;  %v8296_v37 = vperm.slane %v8290_v52, %v10817_v58  ;;  %v8301_v49 = vrot.slane %v8284_v46, 4  ;;  %v8307_v1 = vrot.slane %v8300_v4, 4 }
0x15df   : > { %10480 = vmatpush.xpose.msk.msra.mxu0 %vm920_vm9, %v8288_v35  ;;  %v8302_v38 = vsel %vm600_vm8, 0.0, %v8301_v49  ;;  %v8303_v18 = vrot.slane %v8288_v35, 4  ;;  %v8305_v8 = vrot.slane %v8296_v37, 4  ;;  %v8308_v3 = vsel %vm600_vm8, 0.0, %v8307_v1 }
0x15e0   : > { %10477 = vmatmul.msk.f32.vlgmr.msrb.gmra.mxu2 %vm920_vm9, %v12639_v34  ;;  %10478 = vmatpush.xpose.msk.msrb.mxu3 %vm920_vm9, %v8302_v38 }
0x15e1   : > { %10484 = vmatpush.xpose.msk.msra.mxu2 %vm920_vm9, %v8296_v37  ;;  %v8304_v30 = vsel %vm600_vm8, 0.0, %v8303_v18  ;;  %v8306_v53 = vsel %vm600_vm8, 0.0, %v8305_v8 }
0x15e2   : > { %10482 = vmatpush.xpose.msk.msra.mxu1 %vm920_vm9, %v8304_v30  ;;  %10481 = vmatmul.msk.f32.vlgmr.msra.gmra.mxu0 %vm920_vm9, %v12653_v9 }
0x15e3   : > { %10488 = vmatpush.xpose.msk.msrb.mxu0 %vm920_vm9, %v8300_v4  ;;  %10479 = vmatmul.msk.f32.vlgmr.msrb.gmra.mxu3 %vm920_vm9, %v12662_v39 }
0x15e4   : > { %10486 = vmatpush.xpose.msk.msra.mxu3 %vm920_vm9, %v8306_v53 }
0x15e5   : > { %10492 = vmatpush.xpose.msk.msrb.mxu2 %vm1197_vm10, %v12648_v43  ;;  %10483 = vmatmul.msk.f32.vlgmr.msra.gmra.mxu1 %vm920_vm9, %v12669_v42 }
0x15e6   : > { %10490 = vmatpush.xpose.msk.msrb.mxu1 %vm920_vm9, %v8308_v3 }
0x15e7   : > { %10496 = vmatpush.xpose.msk.msra.mxu0 %vm1197_vm10, %v12791_v29 }
0x15e8   : > { %10494 = vmatpush.xpose.msk.msrb.mxu3 %vm1197_vm10, %v12784_v20  ;;  %10485 = vmatmul.msk.f32.vlgmr.msra.gmra.mxu2 %vm920_vm9, %v12678_v41 }
0x15e9   : > { %10500 = vmatpush.xpose.msk.msra.mxu2 %vm1197_vm10, %v12803_v7 }
0x15ea   : > { %10498 = vmatpush.xpose.msk.msra.mxu1 %vm1197_vm10, %v12796_v23  ;;  %10489 = vmatmul.msk.f32.vlgmr.msrb.gmra.mxu0 %vm920_vm9, %v12685_v56 }
0x15eb   : > { %10487 = vmatmul.msk.f32.vlgmr.msra.gmra.mxu3 %vm920_vm9, %v12692_v55  ;;  %10504 = vmatpush.xpose.msk.msrb.mxu0 %vm1197_vm10, %v12819_v50 }
0x15ec   : > { %10502 = vmatpush.xpose.msk.msra.mxu3 %vm1197_vm10, %v12812_v16 }
0x15ed   : > { %10491 = vmatmul.msk.f32.vlgmr.msrb.gmra.mxu1 %vm920_vm9, %v12697_v11 }
0x15ee   : > { %10506 = vmatpush.xpose.msk.msrb.mxu1 %vm1197_vm10, %v12824_v44 }
0x165f   : > { %v8375_v5 = vpop.f32.mrf.mxu0 }
0x1660   : > { %10497 = vmatmul.msk.f32.vlgmr.msra.gmra.mxu0 %vm1197_vm10, %v8375_v5 }
0x1662   : > { %v8398_v48 = vpop.f32.mrf.mxu1 }
0x1663   : > { %v8329_v46 = vpop.f32.mrf.mxu2  ;;  %10499 = vmatmul.msk.f32.vlgmr.msra.gmra.mxu1 %vm1197_vm10, %v8398_v48 }
0x1664   : > { %10493 = vmatmul.msk.f32.vlgmr.msrb.gmra.mxu2 %vm1197_vm10, %v8329_v46 }
0x1665   : > { %8763 = vmatpush.msrb.mxu2 %v12574_v47 }
0x1666   : > { %v8352_v4 = vpop.f32.mrf.mxu3 }
0x1667   : > { %10495 = vmatmul.msk.f32.vlgmr.msrb.gmra.mxu3 %vm1197_vm10, %v8352_v4  ;;  %v8467_v24 = vpop.f32.mrf.mxu0 }
0x1668   : > { %10505 = vmatmul.msk.f32.vlgmr.msrb.gmra.mxu0 %vm1197_vm10, %v8467_v24 }
0x166a   : > { %v8490_v52 = vpop.f32.mrf.mxu1 }
0x166b   : > { %v8421_v35 = vpop.f32.mrf.mxu2  ;;  %10507 = vmatmul.msk.f32.vlgmr.msrb.gmra.mxu1 %vm1197_vm10, %v8490_v52 }
0x166c   : > { %10501 = vmatmul.msk.f32.vlgmr.msra.gmra.mxu2 %vm1197_vm10, %v8421_v35 }
0x166e   : > { %v8444_v37 = vpop.f32.mrf.mxu3 }
0x166f   : > { %10503 = vmatmul.msk.f32.vlgmr.msra.gmra.mxu3 %vm1197_vm10, %v8444_v37 }
0x1674   : > { %10508 = vmatmul.msk.f32.vlgmr.msrb.gmra.mxu2 %vm920_vm9, %v12352_v45 }
0x16dd   : > { %v8559_v49 = vpop.f32.mrf.mxu0 }
0x16de   : > { %v8677_v38 = vrot.slane %v8559_v49, 4 }
0x16e0   : > { %v8582_v1 = vpop.f32.mrf.mxu1 }
0x16e1   : > { %v8683_v8 = vrot.slane %v8582_v1, 4 }
0x16e5   : > { %v8651_v3 = vpop.f32.mrf.mxu0 }
0x16e6   : > { %v8689_v24 = vrot.slane %v8651_v3, 4 }
0x16e7   : > { %v8513_v18 = vpop.f32.mrf.mxu2 }
0x16e8   : > { %v8678_v30 = vsel %vm600_vm8, %v8677_v38, %v8513_v18  ;;  %v8674_v52 = vpop.f32.mrf.mxu1 }
0x16e9   : > { %v8682_v53 = vperm.slane %v8678_v30, %v10804_v33  ;;  %v8695_v49 = vrot.slane %v8674_v52, 4 }
0x16ea   : > { %v8536_v5 = vpop.f32.mrf.mxu3 }
0x16eb   : > { %v8703_v48 = vrot.slane %v8682_v53, 4  ;;  %v8684_v46 = vsel %vm600_vm8, %v8683_v8, %v8536_v5 }
0x16ec   : > { %v8688_v4 = vperm.slane %v8684_v46, %v10804_v33 }
0x16ee   : > { %v8701_v35 = vrot.slane %v8688_v4, 4  ;;  %v8704_v45 = vsel %vm600_vm8, %v8688_v4, %v8703_v48 }
0x16ef   : > { %v8605_v37 = vpop.f32.mrf.mxu2  ;;  %v8712_v8 = vperm.slane %v8704_v45, %v10817_v58 }
0x16f0   : > { %v8690_v1 = vsel %vm600_vm8, %v8689_v24, %v8605_v37  ;;  %v8702_v38 = vsel %vm600_vm8, %v8701_v35, %v8682_v53 }
0x16f1   : > { %v8694_v18 = vperm.slane %v8690_v1, %v10804_v33  ;;  %v8708_v5 = vperm.slane %v8702_v38, %v10817_v58  ;;  %v8731_v52 = vrot.slane %v8712_v8, 4 }
0x16f2   : > { %v8628_v30 = vpop.f32.mrf.mxu3 }
0x16f3   : > { %v8715_v25 = vrot.slane %v8694_v18, 4  ;;  %v8696_v59 = vsel %vm600_vm8, %v8695_v49, %v8628_v30 }
0x16f4   : > { %v8700_v3 = vperm.slane %v8696_v59, %v10804_v33  ;;  %v8727_v59 = vrot.slane %v8708_v5, 4 }
0x16f6   : > { %v8713_v46 = vrot.slane %v8700_v3, 4  ;;  %v8716_v48 = vsel %vm600_vm8, %v8700_v3, %v8715_v25 }
0x16f7   : > { %v8765_v4 = vpop.f32.mrf.mxu2  ;;  %v8724_v24 = vperm.slane %v8716_v48, %v10817_v58 }
0x16f8   : > { %8772 = vrot.lane.b32.xlu1 %v8765_v4, %s10662_s24  ;;  %8769 = vrot.lane.b32.xlu0 %v8765_v4, %s10671_s21  ;;  %v8714_v53 = vsel %vm600_vm8, %v8713_v46, %v8694_v18  ;;  %v8780_v3 = vrot.slane %v8765_v4, 4 }
0x16f9   : > { %8775 = vrot.lane.b32.xlu2 %v8765_v4, %s10672_s22  ;;  %v8720_v35 = vperm.slane %v8714_v53, %v10817_v58  ;;  %v8729_v45 = vrot.slane %v8724_v24, 4  ;;  %v12859_v37 = vsel %vm600_vm8, %v8724_v24, %v8731_v52 }
0x16fb   : > { %v8725_v25 = vrot.slane %v8720_v35, 4  ;;  %v12862_v49 = vsel %vm600_vm8, %v8720_v35, %v8727_v59  ;;  %v12865_v1 = vsel %vm600_vm8, %v8729_v45, %v8712_v8 }
0x16fd   : > { %v12868_v38 = vsel %vm600_vm8, %v8725_v25, %v8708_v5 }
0x16fe   : > { %13516 = vst [vmem:[#allocation62_spill] sm:$0xff] %v12868_v38 }
0x1753   : > { %v8776_v18 = vpop.permute.xlu2 %8775 }
0x1754   : > { %v8790_v30 = vrot.slane %v8776_v18, 4 }
0x176a   : > { %v8773_v46 = vpop.permute.xlu1 %8772  ;;  %v8770_v48 = vpop.permute.xlu0 %8769 }
0x176b   : > { %v8778_v53 = vrot.slane %v8773_v46, 4  ;;  %v8781_v54 = vsel %vm600_vm8, %v8773_v46, %v8780_v3  ;;  %v8791_v24 = vsel %vm600_vm8, %v8790_v30, %v8770_v48  ;;  %v8792_v52 = vrot.slane %v8770_v48, 4 }
0x176c   : > { %v8789_v35 = vperm.slane %v8781_v54, %v10804_v33  ;;  %v8797_v59 = vperm.slane %v8791_v24, %v10804_v33 }
0x176d   : > { %v8779_v8 = vsel %vm600_vm8, %v8778_v53, %v8765_v4  ;;  %v8793_v5 = vsel %vm600_vm8, %v8776_v18, %v8792_v52 }
0x176e   : > { %v8785_v45 = vperm.slane %v8779_v8, %v10804_v33  ;;  %v8816_v25 = vrot.slane %v8789_v35, 4  ;;  %v8801_v10 = vperm.slane %v8793_v5, %v10804_v33  ;;  %v8802_v6 = vrot.slane %v8797_v59, 4 }
0x1770   : > { %v8804_v38 = vrot.slane %v8785_v45, 4  ;;  %v8803_v3 = vsel %vm600_vm8, %v8802_v6, %v8785_v45  ;;  %v8814_v46 = vrot.slane %v8801_v10, 4  ;;  %v8817_v30 = vsel %vm600_vm8, %v8801_v10, %v8816_v25 }
0x1771   : > { %v8809_v54 = vperm.slane %v8803_v3, %v10817_v58  ;;  %v8825_v48 = vperm.slane %v8817_v30, %v10817_v58 }
0x1772   : > { %v8805_v4 = vsel %vm600_vm8, %v8797_v59, %v8804_v38  ;;  %v8815_v18 = vsel %vm600_vm8, %v8814_v46, %v8789_v35 }
0x1773   : > { %v8813_v53 = vperm.slane %v8805_v4, %v10817_v58  ;;  %10509 = vmatpush.xpose.msk.msrb.mxu3 %vm920_vm9, %v8809_v54  ;;  %v8821_v24 = vperm.slane %v8815_v18, %v10817_v58  ;;  %v8826_v52 = vrot.slane %v8809_v54, 4  ;;  %v8832_v8 = vrot.slane %v8825_v48, 4 }
0x1774   : > { %v1167_v18 = vrot.slane %v10997_v22, 4 }
0x1775   : > { %10513 = vmatpush.xpose.msk.msra.mxu1 %vm920_vm9, %v8813_v53  ;;  %v8827_v6 = vsel %vm600_vm8, 0.0, %v8826_v52  ;;  %v8828_v10 = vrot.slane %v8813_v53, 4  ;;  %v8830_v5 = vrot.slane %v8821_v24, 4  ;;  %v8833_v59 = vsel %vm600_vm8, 0.0, %v8832_v8 }
0x1776   : > { %10510 = vmatmul.msk.f32.vlgmr.msrb.gmra.mxu3 %vm920_vm9, %v12639_v34  ;;  %10511 = vmatpush.xpose.msk.msra.mxu0 %vm920_vm9, %v8827_v6 }
0x1777   : > { %10517 = vmatpush.xpose.msk.msra.mxu3 %vm920_vm9, %v8821_v24  ;;  %v8829_v38 = vsel %vm600_vm8, 0.0, %v8828_v10  ;;  %v8831_v35 = vsel %vm600_vm8, 0.0, %v8830_v5  ;;  %v1168_v5 = vsel %vm600_vm8, %v10985_v14, %v1167_v18 }
0x1778   : > { %10515 = vmatpush.xpose.msk.msra.mxu2 %vm920_vm9, %v8829_v38  ;;  %10514 = vmatmul.msk.f32.vlgmr.msra.gmra.mxu1 %vm920_vm9, %v12653_v9 }
0x1779   : > { %10521 = vmatpush.xpose.msk.msrb.mxu1 %vm920_vm9, %v8825_v48  ;;  %10512 = vmatmul.msk.f32.vlgmr.msra.gmra.mxu0 %vm920_vm9, %v12662_v39 }
0x177a   : > { %10519 = vmatpush.xpose.msk.msrb.mxu0 %vm920_vm9, %v8831_v35 }
0x177b   : > { %10525 = vmatpush.xpose.msk.msrb.mxu3 %vm1197_vm10, %v12648_v43  ;;  %10516 = vmatmul.msk.f32.vlgmr.msra.gmra.mxu2 %vm920_vm9, %v12669_v42 }
0x177c   : > { %10523 = vmatpush.xpose.msk.msrb.mxu2 %vm920_vm9, %v8833_v59 }
0x177d   : > { %10529 = vmatpush.xpose.msk.msra.mxu1 %vm1197_vm10, %v12791_v29 }
0x177e   : > { %10527 = vmatpush.xpose.msk.msra.mxu0 %vm1197_vm10, %v12784_v20  ;;  %10518 = vmatmul.msk.f32.vlgmr.msra.gmra.mxu3 %vm920_vm9, %v12678_v41 }
0x177f   : > { %10533 = vmatpush.xpose.msk.msra.mxu3 %vm1197_vm10, %v12803_v7 }
0x1780   : > { %10531 = vmatpush.xpose.msk.msra.mxu2 %vm1197_vm10, %v12796_v23  ;;  %10522 = vmatmul.msk.f32.vlgmr.msrb.gmra.mxu1 %vm920_vm9, %v12685_v56 }
0x1781   : > { %10520 = vmatmul.msk.f32.vlgmr.msrb.gmra.mxu0 %vm920_vm9, %v12692_v55  ;;  %10537 = vmatpush.xpose.msk.msrb.mxu1 %vm1197_vm10, %v12819_v50 }
0x1782   : > { %10535 = vmatpush.xpose.msk.msrb.mxu0 %vm1197_vm10, %v12812_v16 }
0x1783   : > { %10524 = vmatmul.msk.f32.vlgmr.msrb.gmra.mxu2 %vm920_vm9, %v12697_v11 }
0x1784   : > { %10539 = vmatpush.xpose.msk.msrb.mxu2 %vm1197_vm10, %v12824_v44 }
0x17f5   : > { %v8900_v34 = vpop.f32.mrf.mxu1 }
0x17f6   : > { %10530 = vmatmul.msk.f32.vlgmr.msra.gmra.mxu1 %vm1197_vm10, %v8900_v34  ;;  %v8877_v43 = vpop.f32.mrf.mxu0 }
0x17f7   : > { %10528 = vmatmul.msk.f32.vlgmr.msra.gmra.mxu0 %vm1197_vm10, %v8877_v43 }
0x17f9   : > { %v8854_v9 = vpop.f32.mrf.mxu3 }
0x17fa   : > { %10526 = vmatmul.msk.f32.vlgmr.msrb.gmra.mxu3 %vm1197_vm10, %v8854_v9  ;;  %v1176_v9 = vperm.slane %v1168_v5, %v10817_v58 }
0x17fb   : > { %9288 = vmatpush.msrb.mxu3 %v12574_v47 }
0x17fd   : > { %v8992_v42 = vpop.f32.mrf.mxu1 }
0x17fe   : > { %v8923_v39 = vpop.f32.mrf.mxu2  ;;  %10538 = vmatmul.msk.f32.vlgmr.msrb.gmra.mxu1 %vm1197_vm10, %v8992_v42  ;;  %v8969_v41 = vpop.f32.mrf.mxu0 }
0x17ff   : > { %10532 = vmatmul.msk.f32.vlgmr.msra.gmra.mxu2 %vm1197_vm10, %v8923_v39  ;;  %10536 = vmatmul.msk.f32.vlgmr.msrb.gmra.mxu0 %vm1197_vm10, %v8969_v41  ;;  %v1778_v41 = vrot.slane %v11141_v40, 4  ;;  %v1181_v40 = vrot.slane %v1176_v9, 4 }
0x1801   : > { %v8946_v56 = vpop.f32.mrf.mxu3 }
0x1802   : > { %10534 = vmatmul.msk.f32.vlgmr.msra.gmra.mxu3 %vm1197_vm10, %v8946_v56 }
0x1806   : > { %v9015_v55 = vpop.f32.mrf.mxu2 }
0x1807   : > { %10540 = vmatmul.msk.f32.vlgmr.msrb.gmra.mxu2 %vm1197_vm10, %v9015_v55 }
0x180a   : > { %10541 = vmatmul.msk.f32.vlgmr.msrb.gmra.mxu3 %vm920_vm9, %v12476_v63  ;;  %v1155_v63 = vrot.slane %v10990_v19, 4 }
0x180c   : > { %v1156_v43 = vsel %vm600_vm8, %v10982_v13, %v1155_v63  ;;  %v1179_v63 = vrot.slane %v11008_v27, 4 }
0x180d   : > { %v1164_v13 = vperm.slane %v1156_v43, %v10817_v58 }
0x180e   : > { %v1180_v27 = vsel %vm600_vm8, %v11005_v26, %v1179_v63 }
0x1873   : > { %v9084_v11 = vpop.f32.mrf.mxu1 }
0x1874   : > { %v9202_v47 = vrot.slane %v9084_v11, 4  ;;  %v9061_v3 = vpop.f32.mrf.mxu0 }
0x187b   : > { %v9176_v25 = vpop.f32.mrf.mxu1 }
0x187c   : > { %v9214_v48 = vrot.slane %v9176_v25, 4  ;;  %v9153_v22 = vpop.f32.mrf.mxu0 }
0x187d   : > { %v9038_v45 = vpop.f32.mrf.mxu3 }
0x187e   : > { %v9203_v46 = vsel %vm600_vm8, %v9202_v47, %v9038_v45  ;;  %v1766_v47 = vrot.slane %v11133_v36, 4 }
0x187f   : > { %v9207_v4 = vperm.slane %v9203_v46, %v10804_v33 }
0x1881   : > { %v9228_v6 = vrot.slane %v9207_v4, 4 }
0x1882   : > { %v9107_v30 = vpop.f32.mrf.mxu2 }
0x1883   : > { %v9208_v54 = vrot.slane %v9107_v30, 4  ;;  %v1183_v30 = vrot.slane %v1164_v13, 4 }
0x1885   : > { %v9209_v53 = vsel %vm600_vm8, %v9208_v54, %v9061_v3  ;;  %v9130_v24 = vpop.f32.mrf.mxu3  ;;  %v1779_v54 = vsel %vm600_vm8, %v11136_v51, %v1778_v41  ;;  %v13517_v41 = vld [vmem:[#allocation11_spill] sm:$0xff] }
0x1886   : > { %v9213_v52 = vperm.slane %v9209_v53, %v10804_v33  ;;  %v9215_v8 = vsel %vm600_vm8, %v9214_v48, %v9130_v24  ;;  %v1184_v24 = vsel %vm600_vm8, %v1176_v9, %v1183_v30  ;;  %v1787_v51 = vperm.slane %v1779_v54, %v10817_v58 }
0x1887   : > { %v9219_v35 = vperm.slane %v9215_v8, %v10804_v33  ;;  %v1767_v8 = vsel %vm600_vm8, %v11127_v21, %v1766_v47  ;;  %v1790_v9 = vrot.slane %v11151_v0, 4  ;;  %v13519_v0 = vld [vmem:[#allocation9_spill] sm:$0xff] }
0x1888   : > { %v9226_v10 = vrot.slane %v9213_v52, 4  ;;  %v9229_v38 = vsel %vm600_vm8, %v9213_v52, %v9228_v6  ;;  %v1182_v52 = vsel %vm600_vm8, %v1181_v40, %v1164_v13  ;;  %v1775_v21 = vperm.slane %v1767_v8, %v10817_v58  ;;  %v13520_v13 = vld [vmem:[#allocation10_spill] sm:$0xff] }
0x1889   : > { %v9237_v14 = vperm.slane %v9229_v38, %v10817_v58  ;;  %v9240_v56 = vrot.slane %v9219_v35, 4 }
0x188a   : > { %v9199_v59 = vpop.f32.mrf.mxu2  ;;  %v9227_v19 = vsel %vm600_vm8, %v9226_v10, %v9207_v4  ;;  %v1794_v43 = vrot.slane %v1775_v21, 4 }
0x188b   : > { %v9220_v34 = vrot.slane %v9199_v59, 4  ;;  %v9233_v11 = vperm.slane %v9227_v19, %v10817_v58  ;;  %v9256_v46 = vrot.slane %v9237_v14, 4  ;;  %v1792_v59 = vrot.slane %v1787_v51, 4 }
0x188c   : > { %v1795_v19 = vsel %vm600_vm8, %v1787_v51, %v1794_v43 }
0x188d   : > { %v9221_v39 = vsel %vm600_vm8, %v9220_v34, %v9153_v22  ;;  %v12957_v42 = vpop.f32.mrf.mxu3  ;;  %v9252_v18 = vrot.slane %v9233_v11, 4  ;;  %v2375_v22 = vrot.slane %v11290_v15, 4  ;;  %v13518_v15 = vld [vmem:[#allocation3_spill] sm:$0xff] }
0x188e   : > { %v9225_v55 = vperm.slane %v9221_v39, %v10804_v33  ;;  %9294 = vrot.lane.b32.xlu1 %v12957_v42, %s10671_s21  ;;  %9300 = vrot.lane.b32.xlu0 %v12957_v42, %s10672_s22  ;;  %v1793_v39 = vsel %vm600_vm8, %v1792_v59, %v1775_v21  ;;  %v13526_v21 = vld [vmem:[#allocation12_spill] sm:$0xff]  ;;  %v13527_v59 = vld [vmem:[#allocation25_spill] sm:$0xff] }
0x188f   : > { %9297 = vrot.lane.b32.xlu2 %v12957_v42, %s10662_s24  ;;  %s10673_s24 = smov 12   ;;  %v2376_v26 = vsel %vm600_vm8, %v11280_v28, %v2375_v22  ;;  %v4202_v22 = vrot.slane %v13527_v59, 4 }
0x1890   : > { %v9238_v45 = vrot.slane %v9225_v55, 4  ;;  %v9241_v25 = vsel %vm600_vm8, %v9225_v55, %v9240_v56  ;;  %v2384_v28 = vperm.slane %v2376_v26, %v10817_v58  ;;  %v2984_v56 = vrot.slane %v13519_v0, 4  ;;  %v13529_v26 = vld [vmem:[#allocation23_spill] sm:$0xff]  ;;  %v13534_v0 = vld [vmem:[#allocation54_spill] sm:$0xff] }
0x1891   : > { %v9249_v3 = vperm.slane %v9241_v25, %v10817_v58  ;;  %v13522_v25 = vld [vmem:[#allocation8_spill] sm:$0xff] }
0x1892   : > { %v9239_v48 = vsel %vm600_vm8, %v9238_v45, %v9219_v35  ;;  %v2387_v35 = vrot.slane %v11293_v2, 4  ;;  %v2996_v2 = vrot.slane %v13517_v41, 4  ;;  %v2403_v47 = vrot.slane %v2384_v28, 4  ;;  %v13521_v45 = vld [vmem:[#allocation6_spill] sm:$0xff] }
0x1893   : > { %v9245_v4 = vperm.slane %v9239_v48, %v10817_v58  ;;  %v12978_v53 = vsel %vm600_vm8, %v9249_v3, %v9256_v46  ;;  %v9254_v36 = vrot.slane %v9249_v3, 4  ;;  %v2399_v40 = vrot.slane %v13521_v45, 4  ;;  %v13523_v48 = vld [vmem:[#allocation5_spill] sm:$0xff]  ;;  %v13536_v45 = vld [vmem:[#allocation50_spill] sm:$0xff] }
0x1894   : > { %v2388_v34 = vsel %vm600_vm8, %v11287_v32, %v2387_v35  ;;  %v1791_v32 = vsel %vm600_vm8, %v13518_v15, %v1790_v9  ;;  %v2985_v3 = vsel %vm600_vm8, %v13522_v25, %v2984_v56  ;;  %v4203_v9 = vsel %vm600_vm8, %v13529_v26, %v4202_v22  ;;  %v13544_v22 = vld [vmem:[#allocation40_spill] sm:$0xff]  ;;  %v13545_v26 = vld [vmem:[#allocation29_spill] sm:$0xff] }
0x1895   : > { %v9250_v6 = vrot.slane %v9245_v4, 4  ;;  %v12987_v10 = vsel %vm600_vm8, %v9245_v4, %v9252_v18  ;;  %v12990_v5 = vsel %vm600_vm8, %v9254_v36, %v9237_v14  ;;  %v2396_v14 = vperm.slane %v2388_v34, %v10817_v58  ;;  %v13528_v34 = vld [vmem:[#allocation51_spill] sm:$0xff] }
0x1896   : > { %1194 = vrot.lane.b32.xlu1 %v1184_v24, %s10673_s24  ;;  %1190 = vrot.lane.b32.xlu0 %v1182_v52, %s10674_s15  ;;  %v2400_v4 = vsel %vm600_vm8, %v13523_v48, %v2399_v40  ;;  %v2993_v18 = vperm.slane %v2985_v3, %v10817_v58  ;;  %v13524_v52 = vld [vmem:[#allocation13_spill] sm:$0xff]  ;;  %v13537_v3 = vld [vmem:[#allocation22_spill] sm:$0xff] }
0x1897   : > { %1186 = vrot.lane.b32.xlu2 %v1180_v27, %s10675_s18  ;;  %v12999_v38 = vsel %vm600_vm8, %v9250_v6, %v9233_v11  ;;  %v2401_v55 = vrot.slane %v2396_v14, 4  ;;  %v2997_v11 = vsel %vm600_vm8, %v13520_v13, %v2996_v2  ;;  %v2404_v46 = vsel %vm600_vm8, %v2396_v14, %v2403_v47  ;;  %v13525_v6 = vld [vmem:[#allocation53_spill] sm:$0xff]  ;;  %v13531_v14 = vld [vmem:[#allocation52_spill] sm:$0xff]  ;;  %v13532_v2 = vld [vmem:[#allocation27_spill] sm:$0xff] }
0x1898   : > { %v3005_v54 = vperm.slane %v2997_v11, %v10817_v58  ;;  %v3012_v24 = vrot.slane %v2993_v18, 4  ;;  %v3008_v63 = vrot.slane %v13524_v52, 4  ;;  %v6566_v27 = vrot.slane %v13525_v6, 4  ;;  %v13535_v13 = vld [vmem:[#allocation26_spill] sm:$0xff]  ;;  %v13540_v52 = vld [vmem:[#allocation32_spill] sm:$0xff] }
0x1899   : > { %v2402_v30 = vsel %vm600_vm8, %v2401_v55, %v2384_v28  ;;  %v6554_v41 = vrot.slane %v13531_v14, 4  ;;  %v4214_v15 = vrot.slane %v13532_v2, 4  ;;  %v4211_v47 = vperm.slane %v4203_v9, %v10817_v58  ;;  %v13546_v2 = vld [vmem:[#allocation39_spill] sm:$0xff] }
0x189a   : > { %v3010_v36 = vrot.slane %v3005_v54, 4  ;;  %v3013_v8 = vsel %vm600_vm8, %v3005_v54, %v3012_v24  ;;  %v3009_v35 = vsel %vm600_vm8, %v13526_v21, %v3008_v63  ;;  %v6567_v43 = vsel %vm600_vm8, %v13528_v34, %v6566_v27  ;;  %v13542_v27 = vld [vmem:[#allocation41_spill] sm:$0xff] }
0x189b   : > { %v6575_v55 = vperm.slane %v6567_v43, %v10817_v58  ;;  %v4215_v11 = vsel %vm600_vm8, %v13535_v13, %v4214_v15  ;;  %v6555_v40 = vsel %vm600_vm8, %v13536_v45, %v6554_v41  ;;  %v4795_v63 = vrot.slane %v13540_v52, 4 }
0x189c   : > { %v3011_v51 = vsel %vm600_vm8, %v3010_v36, %v2993_v18  ;;  %v6563_v54 = vperm.slane %v6555_v40, %v10817_v58  ;;  %v13539_v36 = vld [vmem:[#allocation33_spill] sm:$0xff]  ;;  %v5400_v21 = vrot.slane %v13542_v27, 4  ;;  %v5388_v15 = vrot.slane %v13546_v2, 4 }
0x189d   : > { %v6580_v25 = vrot.slane %v6575_v55, 4 }
0x189e   : > { %1805 = vrot.lane.b32.xlu1 %v1795_v19, %s10673_s24  ;;  %1801 = vrot.lane.b32.xlu0 %v1793_v39, %s10674_s15  ;;  %v13530_v19 = vld [vmem:[#allocation55_spill] sm:$0xff]  ;;  %v5401_v34 = vsel %vm600_vm8, %v13544_v22, %v5400_v21  ;;  %v13557_v21 = vld [vmem:[#allocation18_spill] sm:$0xff] }
0x189f   : > { %1797 = vrot.lane.b32.xlu2 %v1791_v32, %s10675_s18  ;;  %v6578_v39 = vrot.slane %v13530_v19, 4  ;;  %v13533_v32 = vld [vmem:[#allocation24_spill] sm:$0xff]  ;;  %v6581_v18 = vsel %vm600_vm8, %v6580_v25, %v6563_v54 }
0x18a0   : > { %v4190_v28 = vrot.slane %v13533_v32, 4 }
0x18a1   : > { %v6579_v56 = vsel %vm600_vm8, %v13534_v0, %v6578_v39 }
0x18a6   : > { %2414 = vrot.lane.b32.xlu1 %v2404_v46, %s10673_s24  ;;  %2410 = vrot.lane.b32.xlu0 %v2402_v30, %s10674_s15  ;;  %v4191_v46 = vsel %vm600_vm8, %v13537_v3, %v4190_v28  ;;  %v4216_v30 = vrot.slane %v4211_v47, 4  ;;  %v13548_v28 = vld [vmem:[#allocation37_spill] sm:$0xff] }
0x18a7   : > { %2406 = vrot.lane.b32.xlu2 %v2400_v4, %s10675_s18  ;;  %v4199_v4 = vperm.slane %v4191_v46, %v10817_v58  ;;  %v5376_v0 = vrot.slane %v13548_v28, 4 }
0x18a9   : > { %v4218_v14 = vrot.slane %v4199_v4, 4 }
0x18ae   : > { %3023 = vrot.lane.b32.xlu1 %v3013_v8, %s10673_s24  ;;  %3019 = vrot.lane.b32.xlu0 %v3011_v51, %s10674_s15  ;;  %v4217_v8 = vsel %vm600_vm8, %v4216_v30, %v4199_v4  ;;  %v13541_v51 = vld [vmem:[#allocation30_spill] sm:$0xff]  ;;  %v13554_v4 = vld [vmem:[#allocation47_spill] sm:$0xff] }
0x18af   : > { %3015 = vrot.lane.b32.xlu2 %v3009_v35, %s10675_s18  ;;  %v4796_v6 = vsel %vm600_vm8, %v13541_v51, %v4795_v63  ;;  %v13543_v35 = vld [vmem:[#allocation31_spill] sm:$0xff]  ;;  %v13556_v63 = vld [vmem:[#allocation2_spill] sm:$0xff] }
0x18b0   : > { %v4783_v59 = vrot.slane %v13543_v35, 4  ;;  %v4804_v43 = vperm.slane %v4796_v6, %v10817_v58  ;;  %v3609_v35 = vrot.slane %v13557_v21, 4 }
0x18b2   : > { %v4784_v9 = vsel %vm600_vm8, %v13545_v26, %v4783_v59  ;;  %v4809_v19 = vrot.slane %v4804_v43, 4  ;;  %v9305_v26 = vrot.slane %v12957_v42, 4 }
0x18b3   : > { %v4792_v39 = vperm.slane %v4784_v9, %v10817_v58  ;;  %v13559_v9 = vld [vmem:[#allocation17_spill] sm:$0xff] }
0x18b5   : > { %v4810_v41 = vsel %vm600_vm8, %v4809_v19, %v4792_v39  ;;  %v3597_v19 = vrot.slane %v13559_v9, 4 }
0x18b6   : > { %8734 = vrot.lane.b32.xlu1 %v12862_v49, %s10675_s18  ;;  %6585 = vrot.lane.b32.xlu0 %v6579_v56, %s10675_s18  ;;  %v13538_v49 = vld [vmem:[#allocation34_spill] sm:$0xff]  ;;  %v6582_v56 = vrot.slane %v6563_v54, 4  ;;  %v13552_v54 = vld [vmem:[#allocation48_spill] sm:$0xff] }
0x18b7   : > { %4221 = vrot.lane.b32.xlu2 %v4215_v11, %s10675_s18  ;;  %v4807_v48 = vrot.slane %v13538_v49, 4  ;;  %v13549_v11 = vld [vmem:[#allocation36_spill] sm:$0xff]  ;;  %v6037_v49 = vrot.slane %v13552_v54, 4 }
0x18b9   : > { %v4808_v24 = vsel %vm600_vm8, %v13539_v36, %v4807_v48 }
0x18be   : > { %6589 = vrot.lane.b32.xlu1 %v6581_v18, %s10674_s15  ;;  %4814 = vrot.lane.b32.xlu0 %v4808_v24, %s10675_s18  ;;  %v6038_v18 = vsel %vm600_vm8, %v13554_v4, %v6037_v49 }
0x18bf   : > { %4225 = vrot.lane.b32.xlu2 %v4217_v8, %s10674_s15 }
0x18c6   : > { %5407 = vrot.lane.b32.xlu1 %v5401_v34, %s10675_s18  ;;  %8738 = vrot.lane.b32.xlu0 %v12865_v1, %s10674_s15  ;;  %v4219_v1 = vsel %vm600_vm8, %v4211_v47, %v4218_v14  ;;  %v5377_v47 = vsel %vm600_vm8, %v13549_v11, %v5376_v0  ;;  %v13558_v34 = vld [vmem:[#allocation16_spill] sm:$0xff] }
0x18c7   : > { %7126 = vrot.lane.b32.xlu2 %v12503_v12, %s10675_s18  ;;  %v13547_v12 = vld [vmem:[#allocation38_spill] sm:$0xff]  ;;  %v5385_v40 = vperm.slane %v5377_v47, %v10817_v58 }
0x18c8   : > { %v5389_v32 = vsel %vm600_vm8, %v13547_v12, %v5388_v15 }
0x18c9   : > { %v5397_v13 = vperm.slane %v5389_v32, %v10817_v58  ;;  %v5404_v6 = vrot.slane %v5385_v40, 4 }
0x18cb   : > { %v5402_v45 = vrot.slane %v5397_v13, 4 }
0x18cd   : > { %v5403_v25 = vsel %vm600_vm8, %v5402_v45, %v5385_v40 }
0x18ce   : > { %7667 = vrot.lane.b32.xlu1 %v12610_v62, %s10675_s18  ;;  %4818 = vrot.lane.b32.xlu0 %v4810_v41, %s10674_s15  ;;  %v6583_v62 = vsel %vm600_vm8, %v6575_v55, %v6582_v56 }
0x18cf   : > { %4229 = vrot.lane.b32.xlu2 %v4219_v1, %s10673_s24  ;;  %v13561_v1 = vld [vmem:[#allocation19_spill] sm:$0xff] }
0x18d6   : > { %7134 = vrot.lane.b32.xlu1 %v12500_v17, %s10673_s24  ;;  %7130 = vrot.lane.b32.xlu0 %v12506_v31, %s10674_s15  ;;  %v4811_v17 = vrot.slane %v4792_v39, 4  ;;  %v13550_v31 = vld [vmem:[#allocation45_spill] sm:$0xff]  ;;  %v13560_v39 = vld [vmem:[#allocation20_spill] sm:$0xff] }
0x18d7   : > { %6593 = vrot.lane.b32.xlu2 %v6583_v62, %s10673_s24  ;;  %v6025_v55 = vrot.slane %v13550_v31, 4  ;;  %v3621_v14 = vrot.slane %v13560_v39, 4 }
0x18d8   : > { %v4812_v3 = vsel %vm600_vm8, %v4804_v43, %v4811_v17  ;;  %v3610_v43 = vsel %vm600_vm8, %v13558_v34, %v3609_v35 }
0x18d9   : > { %v3618_v15 = vperm.slane %v3610_v43, %v10817_v58  ;;  %v3622_v12 = vsel %vm600_vm8, %v13561_v1, %v3621_v14 }
0x18db   : > { %v3623_v45 = vrot.slane %v3618_v15, 4 }
0x18de   : > { %8209 = vrot.lane.b32.xlu1 %v12736_v61, %s10675_s18  ;;  %5411 = vrot.lane.b32.xlu0 %v5403_v25, %s10674_s15  ;;  %v13551_v61 = vld [vmem:[#allocation46_spill] sm:$0xff] }
0x18df   : > { %8742 = vrot.lane.b32.xlu2 %v12859_v37, %s10673_s24  ;;  %v6026_v30 = vsel %vm600_vm8, %v13551_v61, %v6025_v55  ;;  %v13553_v37 = vld [vmem:[#allocation44_spill] sm:$0xff] }
0x18e0   : > { %v6013_v48 = vrot.slane %v13553_v37, 4 }
0x18e6   : > { %9259 = vrot.lane.b32.xlu1 %v12987_v10, %s10675_s18  ;;  %7675 = vrot.lane.b32.xlu0 %v12607_v57, %s10673_s24  ;;  %v13131_v10 = vperm.slane %v6026_v30, %v10817_v58  ;;  %v13555_v57 = vld [vmem:[#allocation43_spill] sm:$0xff] }
0x18e7   : > { %4822 = vrot.lane.b32.xlu2 %v4812_v3, %s10673_s24  ;;  %v6014_v36 = vsel %vm600_vm8, %v13555_v57, %v6013_v48 }
0x18e8   : > { %v6039_v52 = vrot.slane %v13131_v10, 4  ;;  %v13142_v51 = vperm.slane %v6014_v36, %v10817_v58 }
0x18e9   : > { %v9298_v46 = vpop.permute.xlu2 %9297 }
0x18ea   : > { %v6040_v27 = vsel %vm600_vm8, %v6039_v52, %v13142_v51  ;;  %v9303_v59 = vrot.slane %v9298_v46, 4  ;;  %v9306_v2 = vsel %vm600_vm8, %v9298_v46, %v9305_v26  ;;  %v6041_v34 = vrot.slane %v13142_v51, 4 }
0x18eb   : > { %v9314_v28 = vperm.slane %v9306_v2, %v10804_v33  ;;  %v10646_v2 = vld [vmem:[%s12098_s12 + $0xc] sm:$0xf] }
0x18ec   : > { %v9304_v41 = vsel %vm600_vm8, %v9303_v59, %v12957_v42  ;;  %v6042_v51 = vsel %vm600_vm8, %v13131_v10, %v6041_v34  ;;  %v10647_v10 = vld [vmem:[%s12098_s12] sm:$0xf] }
0x18ed   : > { %v9310_v32 = vperm.slane %v9304_v41, %v10804_v33  ;;  %v9341_v31 = vrot.slane %v9314_v28, 4 }
0x18ee   : > { %6044 = vrot.lane.b32.xlu0 %v6038_v18, %s10675_s18 }
0x18ef   : > { %7671 = vrot.lane.b32.xlu2 %v12613_v60, %s10674_s15  ;;  %v5405_v60 = vsel %vm600_vm8, %v5397_v13, %v5404_v6  ;;  %v13562_v13 = vld [vmem:[#allocation15_spill] sm:$0xff]  ;;  %v9329_v17 = vrot.slane %v9310_v32, 4 }
0x18f0   : > { %v3598_v42 = vsel %vm600_vm8, %v13562_v13, %v3597_v19  ;;  %v10645_v19 = vld [vmem:[%s12098_s12 + $0x8] sm:$0xf] }
0x18f1   : > { %v1187_v24 = vpop.permute.xlu2 %1186  ;;  %v3606_v25 = vperm.slane %v3598_v42, %v10817_v58  ;;  %v10650_v42 = vld [vmem:[%s12098_s12 + $0x18] sm:$0xf] }
0x18f2   : > { %v1198_v8 = vsel %vm1197_vm10, %v13556_v63, %v1187_v24 }
0x18f3   : > { %v3624_v46 = vsel %vm600_vm8, %v3623_v45, %v3606_v25  ;;  %v3625_v9 = vrot.slane %v3606_v25, 4  ;;  %v10653_v45 = vld [vmem:[%s12098_s12 + $0x14] sm:$0xf] }
0x18f5   : > { %v3626_v41 = vsel %vm600_vm8, %v3618_v15, %v3625_v9  ;;  %v13564_v15 = vld [vmem:[#allocation4_spill] sm:$0xff] }
0x18f6   : > { %6048 = vrot.lane.b32.xlu0 %v6040_v27, %s10674_s15  ;;  %v13563_v27 = vld [vmem:[#allocation14_spill] sm:$0xff] }
0x18f7   : > { %5415 = vrot.lane.b32.xlu2 %v5405_v60, %s10673_s24 }
0x18f9   : > { %v13150_v22 = vpop.permute.xlu2 %1797 }
0x18fe   : > { %9267 = vrot.lane.b32.xlu0 %v12978_v53, %s10673_s24 }
0x18ff   : > { %3628 = vrot.lane.b32.xlu2 %v3622_v12, %s10675_s18 }
0x1900   : > { %v9295_v0 = vpop.permute.xlu1 %9294  ;;  %v9301_v56 = vpop.permute.xlu0 %9300 }
0x1901   : > { %v9317_v62 = vrot.slane %v9295_v0, 4  ;;  %v9315_v11 = vrot.slane %v9301_v56, 4  ;;  %v13170_v47 = vpop.permute.xlu2 %2406 }
0x1903   : > { %v9316_v53 = vsel %vm600_vm8, %v9315_v11, %v9295_v0  ;;  %v9318_v40 = vsel %vm600_vm8, %v9301_v56, %v9317_v62  ;;  %v1808_v0 = vsel %vm1197_vm10, %v13564_v15, %v13150_v22  ;;  %v10649_v56 = vld [vmem:[%s12106_s27] sm:$0xf]  ;;  %v10652_v11 = vld [vmem:[%s12098_s12 + $0x10] sm:$0xf] }
0x1904   : > { %v9322_v55 = vperm.slane %v9316_v53, %v10804_v33  ;;  %v9326_v3 = vperm.slane %v9318_v40, %v10804_v33  ;;  %v13572_v15 = vld [vmem:[#allocation60_spill] sm:$0xff] }
0x1906   : > { %v9327_v61 = vrot.slane %v9322_v55, 4  ;;  %v9330_v30 = vsel %vm600_vm8, %v9322_v55, %v9329_v17  ;;  %v9339_v54 = vrot.slane %v9326_v3, 4  ;;  %v9342_v49 = vsel %vm600_vm8, %v9326_v3, %v9341_v31  ;;  %9263 = vrot.lane.b32.xlu0 %v12990_v5, %s10674_s15  ;;  %v13565_v31 = vld [vmem:[#allocation28_spill] sm:$0xff] }
0x1907   : > { %v9350_v37 = vperm.slane %v9342_v49, %v10817_v58  ;;  %3632 = vrot.lane.b32.xlu2 %v3624_v46, %s10674_s15  ;;  %v9338_v48 = vperm.slane %v9330_v30, %v10817_v58 }
0x1908   : > { %v9340_v4 = vsel %vm600_vm8, %v9339_v54, %v9314_v28  ;;  %v1195_v18 = vpop.permute.xlu1 %1194  ;;  %v1191_v57 = vpop.permute.xlu0 %1190  ;;  %v9328_v36 = vsel %vm600_vm8, %v9327_v61, %v9310_v32  ;;  %v10648_v28 = vld [vmem:[%s12098_s12 + $0x4] sm:$0xf]  ;;  %v13566_v61 = vld [vmem:[#allocation56_spill] sm:$0xff]  ;;  %v13567_v54 = vld [vmem:[#allocation7_spill] sm:$0xff] }
0x1909   : > { %v9346_v24 = vperm.slane %v9340_v4, %v10817_v58  ;;  %v1199_v52 = vsel %vm920_vm9, %v1198_v8, %v1191_v57  ;;  %v3016_v63 = vpop.permute.xlu2 %3015  ;;  %10546 = vmatpush.xpose.msk.msra.mxu2 %vm920_vm9, %v9338_v48  ;;  %v9334_v5 = vperm.slane %v9328_v36, %v10817_v58  ;;  %v9353_v6 = vrot.slane %v9338_v48, 4  ;;  %v13568_v57 = vld [vmem:[#allocation35_spill] sm:$0xff] }
0x190a   : > { %v3026_v21 = vsel %vm1197_vm10, %v13563_v27, %v3016_v63  ;;  %v9357_v35 = vrot.slane %v9350_v37, 4  ;;  %v13195_v60 = vsel %vm1200_vm11, %v1199_v52, %v1195_v18  ;;  %v2417_v49 = vsel %vm1197_vm10, %v13567_v54, %v13170_v47 }
0x190b   : > { %10542 = vmatpush.xpose.msk.msra.mxu0 %vm920_vm9, %v9334_v5  ;;  %v9354_v8 = vsel %vm600_vm8, 0.0, %v9353_v6  ;;  %v9351_v59 = vrot.slane %v9334_v5, 4  ;;  %v9355_v43 = vrot.slane %v9346_v24, 4  ;;  %v13569_v5 = vld [vmem:[#allocation62_spill] sm:$0xff] }
0x190c   : > { %10548 = vmatpush.xpose.msk.msra.mxu3 %vm920_vm9, %v9354_v8  ;;  %v9358_v26 = vsel %vm600_vm8, 0.0, %v9357_v35  ;;  %10547 = vmatmul.msk.f32.vlgmr.msra.gmra.mxu2 %vm920_vm9, %v10645_v19  ;;  %v13570_v19 = vld [vmem:[#allocation57_spill] sm:$0xff] }
0x190d   : > { %10554 = vmatpush.xpose.msk.msrb.mxu2 %vm920_vm9, %v9350_v37  ;;  %v9352_v39 = vsel %vm600_vm8, 0.0, %v9351_v59  ;;  %v9356_v14 = vsel %vm600_vm8, 0.0, %v9355_v43 }
0x190e   : > { %10544 = vmatpush.xpose.msk.msra.mxu1 %vm920_vm9, %v9352_v39  ;;  %6052 = vrot.lane.b32.xlu0 %v6042_v51, %s10673_s24 }
0x190f   : > { %10550 = vmatpush.xpose.msk.msrb.mxu0 %vm920_vm9, %v9346_v24  ;;  %3636 = vrot.lane.b32.xlu2 %v3626_v41, %s10673_s24 }
0x1910   : > { %10556 = vmatpush.xpose.msk.msrb.mxu3 %vm920_vm9, %v9358_v26  ;;  %v1806_v1 = vpop.permute.xlu1 %1805  ;;  %v1802_v12 = vpop.permute.xlu0 %1801  ;;  %10543 = vmatmul.msk.f32.vlgmr.msra.gmra.mxu0 %vm920_vm9, %v10647_v10 }
0x1911   : > { %10549 = vmatmul.msk.f32.vlgmr.msra.gmra.mxu3 %vm920_vm9, %v10646_v2  ;;  %v4222_v32 = vpop.permute.xlu2 %4221  ;;  %10545 = vmatmul.msk.f32.vlgmr.msra.gmra.mxu1 %vm920_vm9, %v10648_v28  ;;  %v1809_v13 = vsel %vm920_vm9, %v1808_v0, %v1802_v12  ;;  %v13571_v12 = vld [vmem:[#allocation42_spill] sm:$0xff] }
0x1912   : > { %10552 = vmatpush.xpose.msk.msrb.mxu1 %vm920_vm9, %v9356_v14  ;;  %10562 = vmatpush.xpose.msk.msra.mxu2 %vm1197_vm10, %v12791_v29  ;;  %v1810_v29 = vsel %vm1200_vm11, %v1809_v13, %v1806_v1 }
0x1913   : > { %10558 = vmatpush.xpose.msk.msra.mxu0 %vm1197_vm10, %v10649_v56 }
0x1914   : > { %10564 = vmatpush.xpose.msk.msra.mxu3 %vm1197_vm10, %v12796_v23  ;;  %10555 = vmatmul.msk.f32.vlgmr.msrb.gmra.mxu2 %vm920_vm9, %v10650_v42  ;;  %v10651_v23 = vld [vmem:[%s12098_s12 + $0x1c] sm:$0xf]  ;;  %s497_s12 = scalar_lea.vmem %s13410_s10, %s13340_s19 }
0x1916   : > { %10560 = vmatpush.xpose.msk.msra.mxu1 %vm1197_vm10, %v12784_v20  ;;  %10570 = vmatpush.xpose.msk.msrb.mxu2 %vm1197_vm10, %v12819_v50 }
0x1917   : > { %3030 = vrot.lane.b32.xlu2 %v1810_v29, %s10664_s26 }
0x1918   : > { %v2415_v22 = vpop.permute.xlu1 %2414  ;;  %v2411_v62 = vpop.permute.xlu0 %2410  ;;  %10551 = vmatmul.msk.f32.vlgmr.msrb.gmra.mxu0 %vm920_vm9, %v10652_v11 }
0x1919   : > { %10557 = vmatmul.msk.f32.vlgmr.msrb.gmra.mxu3 %vm920_vm9, %v10651_v23  ;;  %v4226_v20 = vpop.permute.xlu2 %4225  ;;  %10553 = vmatmul.msk.f32.vlgmr.msrb.gmra.mxu1 %vm920_vm9, %v10653_v45  ;;  %v2418_v37 = vsel %vm920_vm9, %v2417_v49, %v2411_v62 }
0x191a   : > { %10572 = vmatpush.xpose.msk.msrb.mxu3 %vm1197_vm10, %v12824_v44  ;;  %10566 = vmatpush.xpose.msk.msrb.mxu0 %vm1197_vm10, %v12803_v7  ;;  %v4232_v44 = vsel %vm1197_vm10, %v13565_v31, %v4222_v32  ;;  %v2419_v52 = vsel %vm1200_vm11, %v2418_v37, %v2415_v22  ;;  %v13573_v22 = vld [vmem:[#allocation49_spill] sm:$0xff] }
0x191b   : > { %10568 = vmatpush.xpose.msk.msrb.mxu1 %vm1197_vm10, %v12812_v16  ;;  %v4233_v46 = vsel %vm920_vm9, %v4232_v44, %v4226_v20  ;;  %v13574_v44 = vld [vmem:[#allocation58_spill] sm:$0xff] }
0x1920   : > { %v3024_v50 = vpop.permute.xlu1 %3023  ;;  %v3020_v53 = vpop.permute.xlu0 %3019 }
0x1921   : > { %v3027_v40 = vsel %vm920_vm9, %v3026_v21, %v3020_v53  ;;  %v7127_v25 = vpop.permute.xlu2 %7126 }
0x1922   : > { %v13253_v17 = vsel %vm1200_vm11, %v3027_v40, %v3024_v50  ;;  %v7137_v39 = vsel %vm1197_vm10, %v13570_v19, %v7127_v25 }
0x1928   : > { %v8735_v55 = vpop.permute.xlu1 %8734  ;;  %v6586_v3 = vpop.permute.xlu0 %6585 }
0x1929   : > { %v6596_v7 = vsel %vm1197_vm10, %v13566_v61, %v6586_v3  ;;  %v4230_v30 = vpop.permute.xlu2 %4229  ;;  %v8745_v47 = vsel %vm1197_vm10, %v13569_v5, %v8735_v55 }
0x192a   : > { %v4234_v16 = vsel %vm1200_vm11, %v4233_v46, %v4230_v30 }
0x192b   : > { %5422 = vrot.lane.b32.xlu0 %v4234_v16, %s10664_s26 }
0x1930   : > { %v6590_v48 = vpop.permute.xlu1 %6589  ;;  %v4815_v4 = vpop.permute.xlu0 %4814 }
0x1931   : > { %v6597_v18 = vsel %vm920_vm9, %v6596_v7, %v6590_v48  ;;  %v4825_v36 = vsel %vm1197_vm10, %v13568_v57, %v4815_v4  ;;  %v6594_v24 = vpop.permute.xlu2 %6593 }
0x1932   : > { %v13271_v63 = vsel %vm1200_vm11, %v6597_v18, %v6594_v24 }
0x1933   : > { %3034 = vrot.lane.b32.xlu0 %v2419_v52, %s10666_s28 }
0x1938   : > { %v5408_v6 = vpop.permute.xlu1 %5407  ;;  %v8739_v27 = vpop.permute.xlu0 %8738 }
0x1939   : > { %v8746_v21 = vsel %vm920_vm9, %v8745_v47, %v8739_v27  ;;  %v8743_v35 = vpop.permute.xlu2 %8742  ;;  %v5418_v10 = vsel %vm1197_vm10, %v13571_v12, %v5408_v6 }
0x193a   : > { %v8747_v8 = vsel %vm1200_vm11, %v8746_v21, %v8743_v35 }
0x193b   : > { %9799 = vrot.lane.b32.xlu2 %v8747_v8, %s10664_s26 }
0x1940   : > { %v7668_v59 = vpop.permute.xlu1 %7667  ;;  %v4819_v34 = vpop.permute.xlu0 %4818 }
0x1941   : > { %v4826_v43 = vsel %vm920_vm9, %v4825_v36, %v4819_v34  ;;  %v4823_v26 = vpop.permute.xlu2 %4822  ;;  %v7678_v55 = vsel %vm1197_vm10, %v13574_v44, %v7668_v59 }
0x1942   : > { %v13281_v9 = vsel %vm1200_vm11, %v4826_v43, %v4823_v26 }
0x1948   : > { %v7135_v51 = vpop.permute.xlu1 %7134  ;;  %v7131_v14 = vpop.permute.xlu0 %7130 }
0x1949   : > { %v7138_v41 = vsel %vm920_vm9, %v7137_v39, %v7131_v14  ;;  %v7672_v2 = vpop.permute.xlu2 %7671 }
0x194a   : > { %v7139_v1 = vsel %vm1200_vm11, %v7138_v41, %v7135_v51  ;;  %v7679_v3 = vsel %vm920_vm9, %v7678_v55, %v7672_v2 }
0x194b   : > { %7686 = vrot.lane.b32.xlu2 %v7139_v1, %s10666_s28 }
0x1950   : > { %v8210_v32 = vpop.permute.xlu1 %8209  ;;  %v5412_v28 = vpop.permute.xlu0 %5411 }
0x1951   : > { %v13292_v0 = vsel %vm1197_vm10, %v13572_v15, %v8210_v32  ;;  %v5419_v56 = vsel %vm920_vm9, %v5418_v10, %v5412_v28  ;;  %v5416_v13 = vpop.permute.xlu2 %5415 }
0x1952   : > { %v5420_v42 = vsel %vm1200_vm11, %v5419_v56, %v5416_v13 }
0x1953   : > { %5430 = vrot.lane.b32.xlu2 %v5420_v42, %s10663_s25 }
0x1958   : > { %v7676_v29 = vpop.permute.xlu0 %7675  ;;  %v9260_v50 = vpop.permute.xlu1 %9259 }
0x1959   : > { %v9270_v53 = vsel %vm1197_vm10, %v12999_v38, %v9260_v50  ;;  %v7680_v46 = vsel %vm1200_vm11, %v7679_v3, %v7676_v29 }
0x1960   : > { %v6045_v23 = vpop.permute.xlu0 %6044 }
0x1961   : > { %v6055_v62 = vsel %vm1197_vm10, %v13573_v22, %v6045_v23 }
0x1968   : > { %v6049_v11 = vpop.permute.xlu0 %6048 }
0x1969   : > { %v13300_v20 = vsel %vm920_vm9, %v6055_v62, %v6049_v11  ;;  %v498_v11 = vld [vmem:[%s453_s23] sm:$0xff] }
0x196a   : > { %v9819_v50 = vsub.f32 1.0, %v498_v11 }
0x1970   : > { %v9268_v45 = vpop.permute.xlu0 %9267 }
0x1978   : > { %v9264_v40 = vpop.permute.xlu0 %9263 }
0x1979   : > { %v9271_v25 = vsel %vm920_vm9, %v9270_v53, %v9264_v40  ;;  %v13575_v40 = vld [vmem:[#allocation61_spill] sm:$0xff] }
0x197a   : > { %v9272_v31 = vsel %vm1200_vm11, %v9271_v25, %v9268_v45  ;;  %v10676_v45 = vmov 0   ;;  %v13576_v25 = vld [vmem:[#allocation59_spill] sm:$0xff] }
0x197b   : > { %9803 = vrot.lane.b32.xlu0 %v9272_v31, %s10666_s28  ;;  %10599 = vset.pattern.permute.xlu2 %v10676_v45  ;;  %v3629_v31 = vpop.permute.xlu2 %3628 }
0x197c   : > { %10600 = vset.pattern.permute.xlu0 %v10676_v45  ;;  %9815 = vperm.xlu2 %10599, %v498_v11  }
0x1983   : > { %7690 = vrot.lane.b32.xlu0 %v7680_v46, %s10663_s25  ;;  %v3633_v55 = vpop.permute.xlu2 %3632  ;;  %v6053_v46 = vpop.permute.xlu0 %6052 }
0x198b   : > { %9822 = vperm.xlu0 %10600, %v9819_v50  }
0x198d   : > { %v9379_v61 = vpop.f32.mrf.mxu0 }
0x198e   : > { %10559 = vmatmul.msk.f32.vlgmr.msra.gmra.mxu0 %vm1197_vm10, %v9379_v61  ;;  %v9402_v38 = vpop.f32.mrf.mxu1  ;;  %v3637_v61 = vpop.permute.xlu2 %3636 }
0x198f   : > { %10561 = vmatmul.msk.f32.vlgmr.msra.gmra.mxu1 %vm1197_vm10, %v9402_v38  ;;  %v9425_v7 = vpop.f32.mrf.mxu2 }
0x1990   : > { %10563 = vmatmul.msk.f32.vlgmr.msra.gmra.mxu2 %vm1197_vm10, %v9425_v7 }
0x1994   : > { %v9448_v30 = vpop.f32.mrf.mxu3 }
0x1995   : > { %10565 = vmatmul.msk.f32.vlgmr.msra.gmra.mxu3 %vm1197_vm10, %v9448_v30  ;;  %v9471_v16 = vpop.f32.mrf.mxu0 }
0x1996   : > { %10567 = vmatmul.msk.f32.vlgmr.msrb.gmra.mxu0 %vm1197_vm10, %v9471_v16  ;;  %v9494_v54 = vpop.f32.mrf.mxu1 }
0x1997   : > { %10569 = vmatmul.msk.f32.vlgmr.msrb.gmra.mxu1 %vm1197_vm10, %v9494_v54  ;;  %v9517_v49 = vpop.f32.mrf.mxu2 }
0x1998   : > { %10571 = vmatmul.msk.f32.vlgmr.msrb.gmra.mxu2 %vm1197_vm10, %v9517_v49 }
0x199c   : > { %v9540_v37 = vpop.f32.mrf.mxu3 }
0x199d   : > { %10573 = vmatmul.msk.f32.vlgmr.msrb.gmra.mxu3 %vm1197_vm10, %v9540_v37 }
0x1a0b   : > { %v9563_v48 = vpop.f32.mrf.mxu0 }
0x1a0c   : > { %v9586_v18 = vpop.f32.mrf.mxu1 }
0x1a13   : > { %v9609_v4 = vpop.f32.mrf.mxu2  ;;  %v9655_v35 = vpop.f32.mrf.mxu0 }
0x1a14   : > { %v9727_v57 = vrot.slane %v9609_v4, 4  ;;  %v9678_v43 = vpop.f32.mrf.mxu1 }
0x1a16   : > { %v9728_v24 = vsel %vm600_vm8, %v9727_v57, %v9563_v48 }
0x1a17   : > { %v9732_v5 = vperm.slane %v9728_v24, %v10804_v33 }
0x1a18   : > { %v9632_v36 = vpop.f32.mrf.mxu3 }
0x1a19   : > { %v9733_v52 = vrot.slane %v9632_v36, 4  ;;  %v9753_v6 = vrot.slane %v9732_v5, 4  ;;  %v6057_v36 = vsel %vm1200_vm11, %v13300_v20, %v6053_v46 }
0x1a1b   : > { %v9734_v47 = vsel %vm600_vm8, %v9733_v52, %v9586_v18  ;;  %v9701_v21 = vpop.f32.mrf.mxu2 }
0x1a1c   : > { %v9738_v27 = vperm.slane %v9734_v47, %v10804_v33  ;;  %v9739_v8 = vrot.slane %v9701_v21, 4 }
0x1a1e   : > { %v9754_v59 = vsel %vm600_vm8, %v9738_v27, %v9753_v6  ;;  %v9740_v26 = vsel %vm600_vm8, %v9739_v8, %v9655_v35  ;;  %v9751_v41 = vrot.slane %v9738_v27, 4 }
0x1a1f   : > { %v9744_v39 = vperm.slane %v9740_v26, %v10804_v33  ;;  %v9762_v14 = vperm.slane %v9754_v59, %v10817_v58 }
0x1a20   : > { %v9724_v34 = vpop.f32.mrf.mxu3  ;;  %v9752_v15 = vsel %vm600_vm8, %v9751_v41, %v9732_v5 }
0x1a21   : > { %v9745_v19 = vrot.slane %v9724_v34, 4  ;;  %v9765_v2 = vrot.slane %v9744_v39, 4  ;;  %v9781_v28 = vrot.slane %v9762_v14, 4 }
0x1a23   : > { %v9746_v51 = vsel %vm600_vm8, %v9745_v19, %v9678_v43  ;;  %v13577_v19 = vld [vmem:[#allocation21_spill] sm:$0xff] }
0x1a24   : > { %v9750_v1 = vperm.slane %v9746_v51, %v10804_v33  ;;  %v9758_v33 = vperm.slane %v9752_v15, %v10817_v58 }
0x1a26   : > { %v9763_v12 = vrot.slane %v9750_v1, 4  ;;  %v9766_v10 = vsel %vm600_vm8, %v9750_v1, %v9765_v2  ;;  %v9777_v22 = vrot.slane %v9758_v33, 4 }
0x1a27   : > { %v9774_v32 = vperm.slane %v9766_v10, %v10817_v58 }
0x1a28   : > { %v9764_v56 = vsel %vm600_vm8, %v9763_v12, %v9744_v39  ;;  %v3639_v39 = vsel %vm1197_vm10, %v13577_v19, %v3629_v31 }
0x1a29   : > { %v9782_v13 = vsel %vm600_vm8, %v9774_v32, %v9781_v28  ;;  %v9770_v42 = vperm.slane %v9764_v56, %v10817_v58  ;;  %v9779_v58 = vrot.slane %v9774_v32, 4  ;;  %v3640_v51 = vsel %vm920_vm9, %v3639_v39, %v3633_v55 }
0x1a2a   : > { %9792 = vrot.lane.b32.xlu1 %v9782_v13, %s10673_s24 }
0x1a2b   : > { %v9775_v29 = vrot.slane %v9770_v42, 4  ;;  %v9778_v62 = vsel %vm600_vm8, %v9770_v42, %v9777_v22  ;;  %v9780_v53 = vsel %vm600_vm8, %v9779_v58, %v9762_v14  ;;  %v3641_v14 = vsel %vm1200_vm11, %v3640_v51, %v3637_v61 }
0x1a2d   : > { %v9776_v23 = vsel %vm600_vm8, %v9775_v29, %v9758_v33 }
0x1a32   : > { %9784 = vrot.lane.b32.xlu1 %v9778_v62, %s10675_s18 }
0x1a3a   : > { %9788 = vrot.lane.b32.xlu1 %v9780_v53, %s10674_s15 }
0x1a42   : > { %8213 = vrot.lane.b32.xlu1 %v13575_v40, %s10674_s15 }
0x1a4a   : > { %8217 = vrot.lane.b32.xlu1 %v13576_v25, %s10673_s24 }
0x1a52   : > { %7682 = vrot.lane.b32.xlu1 %v13271_v63, %s10664_s26  ;;  %v5423_v63 = vpop.permute.xlu0 %5422  ;;  %s493_s26 = scalar_lea.vmem %s13409_s9, %s13340_s19 }
0x1a53   : > { %v5433_v2 = vsel %vm554_vm7, %v3641_v14, %v5423_v63 }
0x1a5a   : > { %5426 = vrot.lane.b32.xlu1 %v13281_v9, %s10666_s28  ;;  %v3031_v9 = vpop.permute.xlu2 %3030  ;;  %v3035_v49 = vpop.permute.xlu0 %3034 }
0x1a5b   : > { %v3041_v6 = vsel %vm554_vm7, %v13195_v60, %v3031_v9 }
0x1a5c   : > { %v3043_v35 = vsel %vm3042_vm12, %v3041_v6, %v3035_v49 }
0x1a62   : > { %3038 = vrot.lane.b32.xlu1 %v13253_v17, %s10663_s25  ;;  %v9800_v17 = vpop.permute.xlu2 %9799  ;;  %v9804_v48 = vpop.permute.xlu0 %9803 }
0x1a6a   : > { %v7687_v4 = vpop.permute.xlu2 %7686  ;;  %v7691_v57 = vpop.permute.xlu0 %7690 }
0x1a72   : > { %v5431_v52 = vpop.permute.xlu2 %5430  ;;  %v9823_v21 = vpop.permute.xlu0 %9822 }
0x1a7a   : > { %v9816_v59 = vpop.permute.xlu2 %9815 }
0x1a9c   : > { %v9793_v44 = vpop.permute.xlu1 %9792 }
0x1aa4   : > { %v9785_v3 = vpop.permute.xlu1 %9784 }
0x1aa5   : > { %v9795_v38 = vsel %vm1197_vm10, %v9776_v23, %v9785_v3 }
0x1aac   : > { %v9789_v7 = vpop.permute.xlu1 %9788 }
0x1aad   : > { %v9796_v30 = vsel %vm920_vm9, %v9795_v38, %v9789_v7 }
0x1aae   : > { %v9797_v16 = vsel %vm1200_vm11, %v9796_v30, %v9793_v44 }
0x1aaf   : > { %9807 = vrot.lane.b32.xlu1 %v9797_v16, %s10663_s25 }
0x1ab4   : > { %v8214_v54 = vpop.permute.xlu1 %8213 }
0x1ab5   : > { %v8221_v60 = vsel %vm920_vm9, %v13292_v0, %v8214_v54 }
0x1abc   : > { %v8218_v37 = vpop.permute.xlu1 %8217 }
0x1abd   : > { %v8222_v41 = vsel %vm1200_vm11, %v8221_v60, %v8218_v37 }
0x1abe   : > { %v9810_v12 = vsel %vm554_vm7, %v8222_v41, %v9800_v17 }
0x1abf   : > { %v9811_v28 = vsel %vm3042_vm12, %v9810_v12, %v9804_v48 }
0x1ac4   : > { %v7683_v18 = vpop.permute.xlu1 %7682 }
0x1ac5   : > { %v7693_v5 = vsel %vm554_vm7, %v6057_v36, %v7683_v18 }
0x1ac6   : > { %v7694_v47 = vsel %vm3042_vm12, %v7693_v5, %v7687_v4 }
0x1ac7   : > { %v7695_v27 = vsel %vm3044_vm13, %v7694_v47, %v7691_v57 }
0x1ac8   : > { %v9825_v34 = vmul.f32 %v9823_v21, %v7695_v27 }
0x1acc   : > { %v5427_v24 = vpop.permute.xlu1 %5426 }
0x1acd   : > { %v5434_v1 = vsel %vm3042_vm12, %v5433_v2, %v5427_v24 }
0x1ace   : > { %v5435_v10 = vsel %vm3044_vm13, %v5434_v1, %v5431_v52 }
0x1acf   : > { %v9827_v56 = vmul.f32 %v9816_v59, %v5435_v10 }
0x1ad4   : > { %v3039_v8 = vpop.permute.xlu1 %3038 }
0x1ad5   : > { %v3045_v20 = vsel %vm3044_vm13, %v3043_v35, %v3039_v8 }
0x1ad6   : > { %v9818_v43 = vmul.f32 %v9816_v59, %v3045_v20 }
0x1ad8   : > { %v9826_v26 = vadd.f32 %v9825_v34, %v9818_v43 }
0x1b21   : > { %v9808_v32 = vpop.permute.xlu1 %9807 }
0x1b22   : > { %v9812_v15 = vsel %vm3044_vm13, %v9811_v28, %v9808_v32 }
0x1b23   : > { %v9828_v13 = vmul.f32 %v9823_v21, %v9812_v15 }
0x1b25   : > { %v9829_v0 = vadd.f32 %v9828_v13, %v9827_v56 }
0x1b27   : > { %9853 = vrot.lane.b32.xlu1 %v9829_v0, %s10668_s30  ;;  %v9830_v42 = vmax.f32 %v9826_v26, %v9829_v0 }
0x1b29   : > { %v9831_v33 = vsub.f32 %v9826_v26, %v9830_v42  ;;  %v9834_v29 = vsub.f32 %v9829_v0, %v9830_v42 }
0x1b2b   : > { %v9832_v23 = vmul.f32 1.442695, %v9831_v33  ;;  %v9835_v22 = vmul.f32 1.442695, %v9834_v29 }
0x1b2d   : > { %10601 = vpow2.f32 %v9832_v23 }
0x1b2e   : > { %10603 = vpow2.f32 %v9835_v22 }
0x1b33   : > { %v10602_v62 = vpop.eup %10601 }
0x1b34   : > { %v10604_v11 = vpop.eup %10603 }
0x1b35   : > { %v9837_v45 = vadd.f32 %v10604_v11, %v10602_v62 }
0x1b37   : > { %10605 = vrcp.f32 %v9837_v45  ;;  %v9849_v40 = vand.u32 2147483648, %v9837_v45  ;;  %v9847_v31 = vand.u32 2147483647, %v9837_v45  ;;  %vm9843_vm15 = vweird.f32 %v9837_v45 }
0x1b39   : > { %v9850_v55 = vor.u32 1.1754944e-38, %v9849_v40  ;;  %vm9848_vm1 = vcmp.eq.f32.partialorder %v9847_v31, 8.507059e+37 }
0x1b3d   : > { %v10606_v50 = vpop.eup %10605 }
0x1b3e   : > { %v9839_v58 = vmul.f32 %v10606_v50, %v9837_v45  ;;  %vm9844_vm14 = vweird.f32 %v10606_v50 }
0x1b3f   : > { %vm9845_vm0 = vmor %vm9843_vm15, %vm9844_vm14 }
0x1b40   : > { %v9840_v53 = vsub.f32 1.0, %v9839_v58 }
0x1b42   : > { %v9841_v25 = vmul.f32 %v10606_v50, %v9840_v53 }
0x1b44   : > { %v9842_v44 = vadd.f32 %v10606_v50, %v9841_v25 }
0x1b46   : > { %v9846_v3 = vsel %vm9845_vm0, %v10606_v50, %v9842_v44 }
0x1b47   : > { %v9851_v46 = vsel %vm9848_vm1, %v9850_v55, %v9846_v3 }
0x1b48   : > { %v9860_v61 = vmul.f32 %v10604_v11, %v9851_v46  ;;  %v9859_v38 = vmul.f32 %v10602_v62, %v9851_v46 }
0x1b4a   : > { %9862 = vrot.lane.b32.xlu2 %v9860_v61, %s10668_s30 }
0x1b99   : > { %v9854_v7 = vpop.permute.xlu1 %9853 }
0x1b9a   : > { %v9857_v30 = vsel %vm9856_vm2, %v9826_v26, %v9854_v7 }
0x1b9b   : > { %9858 = vst [vmem:[%s493_s26] sm:$0xff] %v9857_v30 }
0x1ba4   : > { %v9863_v16 = vpop.permute.xlu2 %9862 }
0x1ba5   : > { %v9865_v63 = vsel %vm9856_vm2, %v9859_v38, %v9863_v16 }
0x1ba6   : > { %9866 = vst [vmem:[%s497_s12] sm:$0xff] %v9865_v63 }
0x1ba7 PF: > { %s21_s13 = sadd.s32 1, %s10660_s13  }
0x1ba8   : > { %p18_p5 = scmp.ge.s32.totalorder %s21_s13, 5  }
0x1baa   :  { %20 = sbr.rel (!%p18_p5) target bundleno = 1 (0x1), region = 118 }

</bundles_post_ra>
